<compile_context>
chip_gen: v7x
topology: tpu7x:2x2x1
jax: 0.10.0
libtpu: 0.0.40
codegen_flags: <defaults>
</compile_context>

<pallas_src>
import math
import jax
import jax.numpy as jnp
from jax.experimental import pallas as pl
from jax.experimental.pallas import tpu as pltpu

# Model hyper-parameters (torch defaults are 60 / 256; structure identical,
# sizes shrunk for a small smoke test).
N_HARM = 8                       # n_harmonic_functions
HIDDEN = 64                      # n_hidden_neurons
EMB_HALF = N_HARM * 3            # 24 : sin (or cos) half of the embedding
EMBED_DIM = 2 * EMB_HALF         # 48 : full harmonic embedding width
OMEGA0 = 0.1
BETA = 10.0                      # torch.nn.Softplus(beta=10.0)
HALF_PI = math.pi / 2.0


def _softplus_b10(x):
    # torch.nn.Softplus(beta=10): stable single-exp form
    #   sp(x) = max(x, 0) + (1/B) * log1p(exp(-B*|x|))
    # differs from torch's thresholded variant by < exp(-20)/10 ~ 2e-10.
    return jnp.maximum(x, 0.0) + jnp.log1p(jnp.exp(-BETA * jnp.abs(x))) / BETA


def _round_up(x, m):
    return -(-x // m) * m


# ----------------------------- Pallas kernel ------------------------------ #
def nerf_kernel(orig_ref, dir_ref, len_ref, f_ref,
                w1_ref, b1_ref, w2_ref, b2_ref,
                wdir_ref, wcd_ref, bcd_ref, wc2_ref, bc2_ref,
                out_ref):
    orig = orig_ref[...]                         # (TR, 3)  per-ray origins
    dirs = dir_ref[...]                          # (TR, 3)  per-ray directions
    lens = len_ref[...]                          # (TR, P)  per-ray sample lengths
    F = f_ref[...]                               # (3, 24)  block-diagonal freqs
    TR, P = lens.shape
    T = TR * P
    cdt = w1_ref.dtype                           # MXU operand dtype (bf16 / f32)

    def harmonic_arg(x3):
        # exact f32 equivalent of x3 @ F (F block-diagonal); per-ray only -> cheap.
        return (x3[:, 0:1] * F[0:1, :]
                + x3[:, 1:2] * F[1:2, :]
                + x3[:, 2:3] * F[2:3, :])        # (TR, 24)

    # ----------------- per-ray work (factor P cheaper than per-point) ------
    arg_o = harmonic_arg(orig)                   # orig @ F
    arg_d = harmonic_arg(dirs)                   # dirs @ F
    # sin/cos fused: cos(x) = sin(x + pi/2)  ->  one 48-lane sin downstream
    arg_o48 = jnp.concatenate([arg_o, arg_o + HALF_PI], axis=-1)   # (TR, 48)
    arg_d48 = jnp.concatenate([arg_d, arg_d], axis=-1)             # (TR, 48)

    # direction harmonic embedding + its (48, H+1) projection, once per ray
    # (last output column is zero -> density column untouched by the broadcast add)
    nrm = jnp.sqrt(jnp.sum(dirs * dirs, axis=-1, keepdims=True))
    dirs_n = dirs / jnp.maximum(nrm, 1e-12)
    arg_v = harmonic_arg(dirs_n)
    arg_v48 = jnp.concatenate([arg_v, arg_v + HALF_PI], axis=-1)
    dir_h = jnp.dot(jnp.sin(arg_v48).astype(cdt), wdir_ref[...],
                    preferred_element_type=jnp.float32)            # (TR, H+1)

    # ----------------- ray -> point expansion (point index fastest) --------
    # pts @ F == orig@F + lengths * (dirs@F)   (linearity + block-diagonal F)
    arg48 = (arg_o48[:, None, :]
             + lens[:, :, None] * arg_d48[:, None, :]).reshape(T, EMBED_DIM)
    emb = jnp.sin(arg48)                         # (T, 48) = [sin(emb) | cos(emb)]

    # ----------------- per-point MLP (self.mlp) ----------------------------
    h1 = _softplus_b10(
        jnp.dot(emb.astype(cdt), w1_ref[...],
                preferred_element_type=jnp.float32) + b1_ref[...])
    feat = _softplus_b10(
        jnp.dot(h1.astype(cdt), w2_ref[...],
                preferred_element_type=jnp.float32) + b2_ref[...])

    # --- fused color-branch first layer + density head: feat @ (H, H+1) ----
    cd = jnp.dot(feat.astype(cdt), wcd_ref[...],
                 preferred_element_type=jnp.float32) + bcd_ref[...]    # (T, H+1)

    # per-ray dir projection added via implicit sublane broadcast on a
    # (TR, P, H+1) view; ONE softplus covers color + density columns.
    act = _softplus_b10(cd.reshape(TR, P, HIDDEN + 1) + dir_h[:, None, :])
    c1 = act[..., :HIDDEN].reshape(T, HIDDEN)                          # color hidden
    raw_d = act[..., HIDDEN:].reshape(T, 1)                            # density head

    col_pre = jnp.dot(c1.astype(cdt), wc2_ref[...],
                      preferred_element_type=jnp.float32) + bc2_ref[...]   # (T, 3)

    # --- fused output nonlinearities + single full-width packed store ------
    #   density = 1 - exp(-raw_d);  color = sigmoid(col_pre) = 1/(1+exp(-col_pre))
    neg = jnp.minimum(jnp.concatenate([-raw_d, -col_pre], axis=-1), 60.0)  # (T, 4)
    e = jnp.exp(neg)
    dens = 1.0 - e[:, 0:1]
    col = pl.reciprocal(1.0 + e[:, 1:4], approx=True)
    out_ref[...] = jnp.concatenate([dens, col], axis=-1)               # [d | r g b]


# ------------------------------- wrapper ---------------------------------- #
def nerf_forward(origins, directions, lengths, params, tile_pts=None, use_bf16=True):
    spatial = origins.shape[:-1]
    P = lengths.shape[-1]
    assert lengths.shape[:-1] == spatial
    NR = math.prod(spatial)           # total rays
    N = NR * P                        # total sample points

    # Pad P to a multiple of 8 so the in-kernel (TR,P,*) -> (T,*) flatten is
    # layout-preserving (no XLU sublane repack).
    P_pad = _round_up(P, 8)

    # Generation-aware tile / VMEM budget (v5e/v6e: 128 MiB VMEM, v7x: 64 MiB).
    try:
        vmem = int(getattr(pltpu.get_tpu_info(), "vmem_capacity_bytes", 64 << 20))
    except Exception:
        vmem = 64 << 20
    big_vmem = vmem >= (96 << 20)
    if tile_pts is None:
        tile_pts = 16384 if big_vmem else 8192
    vmem_limit = (96 << 20) if big_vmem else (48 << 20)

    # cdiv-based grid: tiles stay near the target size for any NR (no divisor search).
    tile_rays = max(8, (tile_pts // P_pad) // 8 * 8)
    if NR > 8:
        # keep at least 2 grid steps so both v7x TensorCores get work
        tile_rays = min(tile_rays, _round_up(-(-NR // 2), 8))
    else:
        tile_rays = 8
    n_tiles = -(-NR // tile_rays)
    NR_pad = n_tiles * tile_rays
    tile_pts_actual = tile_rays * P_pad

    orig2 = origins.reshape(NR, 3).astype(jnp.float32)
    dirs2 = directions.reshape(NR, 3).astype(jnp.float32)
    lens2 = lengths.reshape(NR, P).astype(jnp.float32)
    if P_pad != P:
        lens2 = jnp.pad(lens2, ((0, 0), (0, P_pad - P)))
    if NR_pad != NR:
        pad = ((0, NR_pad - NR), (0, 0))
        orig2 = jnp.pad(orig2, pad)
        dirs2 = jnp.pad(dirs2, pad)
        lens2 = jnp.pad(lens2, pad)

    cdt = jnp.bfloat16 if use_bf16 else jnp.float32   # use_bf16=False may win on v5e

    # Block-diagonal frequency matrix: (x @ F)[:, d*NH + k] = x[:, d] * freq[k],
    # matching torch's (x[...,None]*freqs).view(...,-1) embedding ordering.
    F = jnp.kron(jnp.eye(3, dtype=jnp.float32), params["freqs"])       # (3, 24)

    w1 = params["w1"].astype(cdt)                        # (48, H) — un-split (fused sin/cos)
    w2 = params["w2"].astype(cdt)                        # (H, H)
    # dir-embedding rows of wc1, zero-padded with a density column -> (48, H+1)
    wdir = jnp.concatenate([params["wc1"][HIDDEN:],
                            jnp.zeros((EMBED_DIM, 1), jnp.float32)], axis=1).astype(cdt)
    # fuse density head into the color-branch first matmul: (H, H+1)
    wcd = jnp.concatenate([params["wc1"][:HIDDEN], params["wd"]], axis=1).astype(cdt)
    bcd = jnp.concatenate([params["bc1"], params["bd"]], axis=1)        # (1, H+1) f32
    wc2 = params["wc2"].astype(cdt)

    operands = (orig2, dirs2, lens2, F, w1, params["b1"], w2, params["b2"],
                wdir, wcd, bcd, wc2, params["bc2"])

    def ray_spec(last):
        return pl.BlockSpec((tile_rays, last), lambda i: (i, 0))

    def full_spec(arr):
        return pl.BlockSpec(arr.shape, lambda i: (0, 0))

    in_specs = [ray_spec(3), ray_spec(3), ray_spec(P_pad)] + \
               [full_spec(a) for a in operands[3:]]

    out = pl.pallas_call(
        nerf_kernel,
        out_shape=jax.ShapeDtypeStruct((NR_pad * P_pad, 4), jnp.float32),
        grid=(n_tiles,),
        in_specs=in_specs,
        out_specs=pl.BlockSpec((tile_pts_actual, 4), lambda i: (i, 0)),
        compiler_params=pltpu.CompilerParams(
            dimension_semantics=("parallel",),
            vmem_limit_bytes=vmem_limit),
    )(*operands)

    out3 = out.reshape(NR_pad, P_pad, 4)[:NR, :P]       # drop ray/point padding
    dens = out3[..., 0:1].reshape(*spatial, P, 1)
    col = out3[..., 1:4].reshape(*spatial, P, 3)
    return dens, col


# -------------------------- deterministic params --------------------------- #
def init_params(key):
    def linear(k, fin, fout):
        kw, kb = jax.random.split(k)
        bound = 1.0 / math.sqrt(fin)
        w = jax.random.uniform(kw, (fin, fout), jnp.float32, -bound, bound)
        b = jax.random.uniform(kb, (1, fout), jnp.float32, -bound, bound)
        return w, b

    ks = jax.random.split(key, 5)
    freqs = (OMEGA0 * 2.0 ** jnp.arange(N_HARM, dtype=jnp.float32)).reshape(1, N_HARM)
    w1, b1 = linear(ks[0], EMBED_DIM, HIDDEN)
    w2, b2 = linear(ks[1], HIDDEN, HIDDEN)
    wc1, bc1 = linear(ks[2], HIDDEN + EMBED_DIM, HIDDEN)
    wc2, bc2 = linear(ks[3], HIDDEN, 3)
    wd, bd = linear(ks[4], HIDDEN, 1)
    bd = bd.at[0, 0].set(-1.5)   # density_layer[0].bias.data[0] = -1.5
    return dict(freqs=freqs, w1=w1, b1=b1, w2=w2, b2=b2,
                wc1=wc1, bc1=bc1, wc2=wc2, bc2=bc2, wd=wd, bd=bd)


# ----------------------------- pure-JAX reference -------------------------- #
def harmonic_embedding_ref(x, freqs_1d):
    emb = (x[..., None] * freqs_1d).reshape(*x.shape[:-1], -1)
    return jnp.concatenate([jnp.sin(emb), jnp.cos(emb)], axis=-1)


def nerf_reference(origins, directions, lengths, params):
    freqs = params["freqs"].reshape(-1)
    pts = origins[..., None, :] + directions[..., None, :] * lengths[..., :, None]
    emb = harmonic_embedding_ref(pts, freqs)
    h1 = _softplus_b10(emb @ params["w1"] + params["b1"])
    feat = _softplus_b10(h1 @ params["w2"] + params["b2"])
    raw_d = _softplus_b10(feat @ params["wd"] + params["bd"])
    dens = 1.0 - jnp.exp(-raw_d)
    nrm = jnp.sqrt(jnp.sum(directions ** 2, axis=-1, keepdims=True))
    dirs_n = directions / jnp.maximum(nrm, 1e-12)
    demb = harmonic_embedding_ref(dirs_n, freqs)
    demb_e = jnp.broadcast_to(demb[..., None, :], (*feat.shape[:-1], EMBED_DIM))
    cin = jnp.concatenate([feat, demb_e], axis=-1)
    c1 = _softplus_b10(cin @ params["wc1"] + params["bc1"])
    col = jax.nn.sigmoid(c1 @ params["wc2"] + params["bc2"])
    return dens, col


if __name__ == "__main__":
    key = jax.random.PRNGKey(0)
    kp, ko, kd, kl = jax.random.split(key, 4)
    params = init_params(kp)

    B, R, P = 2, 16, 8          # minibatch, rays per batch, points per ray -> N=256
    origins = jax.random.normal(ko, (B, R, 3), jnp.float32)
    directions = jax.random.normal(kd, (B, R, 3), jnp.float32)
    lengths = jax.random.uniform(kl, (B, R, P), jnp.float32, 0.5, 2.0)

    dens, col = nerf_forward(origins, directions, lengths, params)
    jax.block_until_ready((dens, col))

    dens_ref, col_ref = nerf_reference(origins, directions, lengths, params)
    assert dens.shape == (B, R, P, 1) and col.shape == (B, R, P, 3)
    # bf16 MXU operands (~1e-2) + approx reciprocal sigmoid (~1e-3) drift.
    if not (jnp.allclose(dens, dens_ref, atol=3e-2, rtol=3e-2)
            and jnp.allclose(col, col_ref, atol=3e-2, rtol=3e-2)):
        raise AssertionError("Pallas kernel mismatch vs reference")

    print("KERNEL_OK")
</pallas_src>

<mosaic_0001>
module attributes {stable_mosaic.version = 11 : i64} {
  func.func @nerf_kernel(%arg0: i32, %arg1: memref<16x3xf32, #tpu.memory_space<vmem>>, %arg2: memref<16x3xf32, #tpu.memory_space<vmem>>, %arg3: memref<16x8xf32, #tpu.memory_space<vmem>>, %arg4: memref<3x24xf32, #tpu.memory_space<vmem>>, %arg5: memref<48x64xbf16, #tpu.memory_space<vmem>>, %arg6: memref<1x64xf32, #tpu.memory_space<vmem>>, %arg7: memref<64x64xbf16, #tpu.memory_space<vmem>>, %arg8: memref<1x64xf32, #tpu.memory_space<vmem>>, %arg9: memref<48x65xbf16, #tpu.memory_space<vmem>>, %arg10: memref<64x65xbf16, #tpu.memory_space<vmem>>, %arg11: memref<1x65xf32, #tpu.memory_space<vmem>>, %arg12: memref<64x3xbf16, #tpu.memory_space<vmem>>, %arg13: memref<1x3xf32, #tpu.memory_space<vmem>>, %arg14: memref<128x4xf32, #tpu.memory_space<vmem>>) attributes {dimension_semantics = [#tpu.dimension_semantics<parallel>], iteration_bounds = array<i64: 2>, scalar_prefetch = 0 : i64, scratch_operands = 0 : i64, tpu.core_type = #tpu.core_type<tc>, window_params = [{transform_indices = @transform_0, window_bounds = array<i64: 16, 3>}, {transform_indices = @transform_1, window_bounds = array<i64: 16, 3>}, {transform_indices = @transform_2, window_bounds = array<i64: 16, 8>}, {pipeline_mode = #tpu.pipeline_mode<synchronous>, transform_indices = @transform_3, window_bounds = array<i64: 3, 24>}, {pipeline_mode = #tpu.pipeline_mode<synchronous>, transform_indices = @transform_4, window_bounds = array<i64: 48, 64>}, {pipeline_mode = #tpu.pipeline_mode<synchronous>, transform_indices = @transform_5, window_bounds = array<i64: 1, 64>}, {pipeline_mode = #tpu.pipeline_mode<synchronous>, transform_indices = @transform_6, window_bounds = array<i64: 64, 64>}, {pipeline_mode = #tpu.pipeline_mode<synchronous>, transform_indices = @transform_7, window_bounds = array<i64: 1, 64>}, {pipeline_mode = #tpu.pipeline_mode<synchronous>, transform_indices = @transform_8, window_bounds = array<i64: 48, 65>}, {pipeline_mode = #tpu.pipeline_mode<synchronous>, transform_indices = @transform_9, window_bounds = array<i64: 64, 65>}, {pipeline_mode = #tpu.pipeline_mode<synchronous>, transform_indices = @transform_10, window_bounds = array<i64: 1, 65>}, {pipeline_mode = #tpu.pipeline_mode<synchronous>, transform_indices = @transform_11, window_bounds = array<i64: 64, 3>}, {pipeline_mode = #tpu.pipeline_mode<synchronous>, transform_indices = @transform_12, window_bounds = array<i64: 1, 3>}, {transform_indices = @transform_13, window_bounds = array<i64: 128, 4>}]} {
    %c0 = arith.constant 0 : index
    %c0_0 = arith.constant 0 : index
    %0 = vector.load %arg1[%c0, %c0_0] : memref<16x3xf32, #tpu.memory_space<vmem>>, vector<16x3xf32>
    %c0_1 = arith.constant 0 : index
    %c0_2 = arith.constant 0 : index
    %1 = vector.load %arg2[%c0_1, %c0_2] : memref<16x3xf32, #tpu.memory_space<vmem>>, vector<16x3xf32>
    %c0_3 = arith.constant 0 : index
    %c0_4 = arith.constant 0 : index
    %2 = vector.load %arg3[%c0_3, %c0_4] : memref<16x8xf32, #tpu.memory_space<vmem>>, vector<16x8xf32>
    %c0_5 = arith.constant 0 : index
    %c0_6 = arith.constant 0 : index
    %3 = vector.load %arg4[%c0_5, %c0_6] : memref<3x24xf32, #tpu.memory_space<vmem>>, vector<3x24xf32>
    %4 = vector.extract_strided_slice %0 {offsets = [0, 0], sizes = [16, 1], strides = [1, 1]} : vector<16x3xf32> to vector<16x1xf32>
    %5 = vector.extract_strided_slice %3 {offsets = [0, 0], sizes = [1, 24], strides = [1, 1]} : vector<3x24xf32> to vector<1x24xf32>
    %6 = vector.broadcast %4 : vector<16x1xf32> to vector<16x24xf32>
    %7 = vector.broadcast %5 : vector<1x24xf32> to vector<16x24xf32>
    %8 = arith.mulf %6, %7 : vector<16x24xf32>
    %9 = vector.extract_strided_slice %0 {offsets = [0, 1], sizes = [16, 1], strides = [1, 1]} : vector<16x3xf32> to vector<16x1xf32>
    %10 = vector.extract_strided_slice %3 {offsets = [1, 0], sizes = [1, 24], strides = [1, 1]} : vector<3x24xf32> to vector<1x24xf32>
    %11 = vector.broadcast %9 : vector<16x1xf32> to vector<16x24xf32>
    %12 = vector.broadcast %10 : vector<1x24xf32> to vector<16x24xf32>
    %13 = arith.mulf %11, %12 : vector<16x24xf32>
    %14 = arith.addf %8, %13 : vector<16x24xf32>
    %15 = vector.extract_strided_slice %0 {offsets = [0, 2], sizes = [16, 1], strides = [1, 1]} : vector<16x3xf32> to vector<16x1xf32>
    %16 = vector.extract_strided_slice %3 {offsets = [2, 0], sizes = [1, 24], strides = [1, 1]} : vector<3x24xf32> to vector<1x24xf32>
    %17 = vector.broadcast %15 : vector<16x1xf32> to vector<16x24xf32>
    %18 = vector.broadcast %16 : vector<1x24xf32> to vector<16x24xf32>
    %19 = arith.mulf %17, %18 : vector<16x24xf32>
    %20 = arith.addf %14, %19 : vector<16x24xf32>
    %21 = vector.extract_strided_slice %1 {offsets = [0, 0], sizes = [16, 1], strides = [1, 1]} : vector<16x3xf32> to vector<16x1xf32>
    %22 = vector.extract_strided_slice %3 {offsets = [0, 0], sizes = [1, 24], strides = [1, 1]} : vector<3x24xf32> to vector<1x24xf32>
    %23 = vector.broadcast %21 : vector<16x1xf32> to vector<16x24xf32>
    %24 = vector.broadcast %22 : vector<1x24xf32> to vector<16x24xf32>
    %25 = arith.mulf %23, %24 : vector<16x24xf32>
    %26 = vector.extract_strided_slice %1 {offsets = [0, 1], sizes = [16, 1], strides = [1, 1]} : vector<16x3xf32> to vector<16x1xf32>
    %27 = vector.extract_strided_slice %3 {offsets = [1, 0], sizes = [1, 24], strides = [1, 1]} : vector<3x24xf32> to vector<1x24xf32>
    %28 = vector.broadcast %26 : vector<16x1xf32> to vector<16x24xf32>
    %29 = vector.broadcast %27 : vector<1x24xf32> to vector<16x24xf32>
    %30 = arith.mulf %28, %29 : vector<16x24xf32>
    %31 = arith.addf %25, %30 : vector<16x24xf32>
    %32 = vector.extract_strided_slice %1 {offsets = [0, 2], sizes = [16, 1], strides = [1, 1]} : vector<16x3xf32> to vector<16x1xf32>
    %33 = vector.extract_strided_slice %3 {offsets = [2, 0], sizes = [1, 24], strides = [1, 1]} : vector<3x24xf32> to vector<1x24xf32>
    %34 = vector.broadcast %32 : vector<16x1xf32> to vector<16x24xf32>
    %35 = vector.broadcast %33 : vector<1x24xf32> to vector<16x24xf32>
    %36 = arith.mulf %34, %35 : vector<16x24xf32>
    %37 = arith.addf %31, %36 : vector<16x24xf32>
    %cst = arith.constant 1.57079637 : f32
    %38 = vector.broadcast %cst : f32 to vector<16x24xf32>
    %39 = arith.addf %20, %38 : vector<16x24xf32>
    %40 = tpu.concatenate %20, %39 in 1 : vector<16x24xf32>, vector<16x24xf32> -> vector<16x48xf32>
    %41 = tpu.concatenate %37, %37 in 1 : vector<16x24xf32>, vector<16x24xf32> -> vector<16x48xf32>
    %42 = arith.mulf %1, %1 : vector<16x3xf32>
    %cst_7 = arith.constant dense<0.000000e+00> : vector<16xf32>
    %43 = vector.multi_reduction <add>, %42, %cst_7 [1] : vector<16x3xf32> to vector<16xf32>
    %44 = vector.shape_cast %43 : vector<16xf32> to vector<16x1xf32>
    %45 = math.sqrt %44 : vector<16x1xf32>
    %cst_8 = arith.constant 9.99999996E-13 : f32
    %46 = vector.broadcast %cst_8 : f32 to vector<16x1xf32>
    %47 = arith.maximumf %45, %46 : vector<16x1xf32>
    %48 = vector.broadcast %47 : vector<16x1xf32> to vector<16x3xf32>
    %49 = arith.divf %1, %48 : vector<16x3xf32>
    %50 = vector.extract_strided_slice %49 {offsets = [0, 0], sizes = [16, 1], strides = [1, 1]} : vector<16x3xf32> to vector<16x1xf32>
    %51 = vector.extract_strided_slice %3 {offsets = [0, 0], sizes = [1, 24], strides = [1, 1]} : vector<3x24xf32> to vector<1x24xf32>
    %52 = vector.broadcast %50 : vector<16x1xf32> to vector<16x24xf32>
    %53 = vector.broadcast %51 : vector<1x24xf32> to vector<16x24xf32>
    %54 = arith.mulf %52, %53 : vector<16x24xf32>
    %55 = vector.extract_strided_slice %49 {offsets = [0, 1], sizes = [16, 1], strides = [1, 1]} : vector<16x3xf32> to vector<16x1xf32>
    %56 = vector.extract_strided_slice %3 {offsets = [1, 0], sizes = [1, 24], strides = [1, 1]} : vector<3x24xf32> to vector<1x24xf32>
    %57 = vector.broadcast %55 : vector<16x1xf32> to vector<16x24xf32>
    %58 = vector.broadcast %56 : vector<1x24xf32> to vector<16x24xf32>
    %59 = arith.mulf %57, %58 : vector<16x24xf32>
    %60 = arith.addf %54, %59 : vector<16x24xf32>
    %61 = vector.extract_strided_slice %49 {offsets = [0, 2], sizes = [16, 1], strides = [1, 1]} : vector<16x3xf32> to vector<16x1xf32>
    %62 = vector.extract_strided_slice %3 {offsets = [2, 0], sizes = [1, 24], strides = [1, 1]} : vector<3x24xf32> to vector<1x24xf32>
    %63 = vector.broadcast %61 : vector<16x1xf32> to vector<16x24xf32>
    %64 = vector.broadcast %62 : vector<1x24xf32> to vector<16x24xf32>
    %65 = arith.mulf %63, %64 : vector<16x24xf32>
    %66 = arith.addf %60, %65 : vector<16x24xf32>
    %cst_9 = arith.constant 1.57079637 : f32
    %67 = vector.broadcast %cst_9 : f32 to vector<16x24xf32>
    %68 = arith.addf %66, %67 : vector<16x24xf32>
    %69 = tpu.concatenate %66, %68 in 1 : vector<16x24xf32>, vector<16x24xf32> -> vector<16x48xf32>
    %70 = math.sin %69 : vector<16x48xf32>
    %71 = arith.truncf %70 : vector<16x48xf32> to vector<16x48xbf16>
    %c0_10 = arith.constant 0 : index
    %c0_11 = arith.constant 0 : index
    %72 = vector.load %arg9[%c0_10, %c0_11] : memref<48x65xbf16, #tpu.memory_space<vmem>>, vector<48x65xbf16>
    %cst_12 = arith.constant dense<0.000000e+00> : vector<16x65xf32>
    %73 = tpu.matmul %71, %72, %cst_12 {dimension_numbers = #tpu.dot_dimension_numbers<[1], [0], [0], [1], [0, 0, 1, 1], [], []>} : vector<16x48xbf16>, vector<48x65xbf16>, vector<16x65xf32> -> vector<16x65xf32>
    %74 = vector.shape_cast %40 : vector<16x48xf32> to vector<16x1x48xf32>
    %75 = vector.shape_cast %2 : vector<16x8xf32> to vector<16x8x1xf32>
    %76 = vector.shape_cast %41 : vector<16x48xf32> to vector<16x1x48xf32>
    %77 = vector.broadcast %75 : vector<16x8x1xf32> to vector<16x8x48xf32>
    %78 = vector.broadcast %76 : vector<16x1x48xf32> to vector<16x8x48xf32>
    %79 = arith.mulf %77, %78 : vector<16x8x48xf32>
    %80 = vector.broadcast %74 : vector<16x1x48xf32> to vector<16x8x48xf32>
    %81 = arith.addf %80, %79 : vector<16x8x48xf32>
    %82 = vector.shape_cast %81 : vector<16x8x48xf32> to vector<128x48xf32>
    %83 = math.sin %82 : vector<128x48xf32>
    %84 = arith.truncf %83 : vector<128x48xf32> to vector<128x48xbf16>
    %c0_13 = arith.constant 0 : index
    %c0_14 = arith.constant 0 : index
    %85 = vector.load %arg5[%c0_13, %c0_14] : memref<48x64xbf16, #tpu.memory_space<vmem>>, vector<48x64xbf16>
    %cst_15 = arith.constant dense<0.000000e+00> : vector<128x64xf32>
    %86 = tpu.matmul %84, %85, %cst_15 {dimension_numbers = #tpu.dot_dimension_numbers<[1], [0], [0], [1], [0, 0, 1, 1], [], []>} : vector<128x48xbf16>, vector<48x64xbf16>, vector<128x64xf32> -> vector<128x64xf32>
    %c0_16 = arith.constant 0 : index
    %c0_17 = arith.constant 0 : index
    %87 = vector.load %arg6[%c0_16, %c0_17] : memref<1x64xf32, #tpu.memory_space<vmem>>, vector<1x64xf32>
    %88 = vector.broadcast %87 : vector<1x64xf32> to vector<128x64xf32>
    %89 = arith.addf %86, %88 : vector<128x64xf32>
    %cst_18 = arith.constant 0.000000e+00 : f32
    %90 = vector.broadcast %cst_18 : f32 to vector<128x64xf32>
    %91 = arith.maximumf %89, %90 : vector<128x64xf32>
    %92 = math.absf %89 : vector<128x64xf32>
    %cst_19 = arith.constant -1.000000e+01 : f32
    %93 = vector.broadcast %cst_19 : f32 to vector<128x64xf32>
    %94 = arith.mulf %93, %92 : vector<128x64xf32>
    %95 = math.exp %94 : vector<128x64xf32>
    %96 = math.log1p %95 : vector<128x64xf32>
    %cst_20 = arith.constant 1.000000e+01 : f32
    %97 = vector.broadcast %cst_20 : f32 to vector<128x64xf32>
    %98 = arith.divf %96, %97 : vector<128x64xf32>
    %99 = arith.addf %91, %98 : vector<128x64xf32>
    %100 = arith.truncf %99 : vector<128x64xf32> to vector<128x64xbf16>
    %c0_21 = arith.constant 0 : index
    %c0_22 = arith.constant 0 : index
    %101 = vector.load %arg7[%c0_21, %c0_22] : memref<64x64xbf16, #tpu.memory_space<vmem>>, vector<64x64xbf16>
    %cst_23 = arith.constant dense<0.000000e+00> : vector<128x64xf32>
    %102 = tpu.matmul %100, %101, %cst_23 {dimension_numbers = #tpu.dot_dimension_numbers<[1], [0], [0], [1], [0, 0, 1, 1], [], []>} : vector<128x64xbf16>, vector<64x64xbf16>, vector<128x64xf32> -> vector<128x64xf32>
    %c0_24 = arith.constant 0 : index
    %c0_25 = arith.constant 0 : index
    %103 = vector.load %arg8[%c0_24, %c0_25] : memref<1x64xf32, #tpu.memory_space<vmem>>, vector<1x64xf32>
    %104 = vector.broadcast %103 : vector<1x64xf32> to vector<128x64xf32>
    %105 = arith.addf %102, %104 : vector<128x64xf32>
    %cst_26 = arith.constant 0.000000e+00 : f32
    %106 = vector.broadcast %cst_26 : f32 to vector<128x64xf32>
    %107 = arith.maximumf %105, %106 : vector<128x64xf32>
    %108 = math.absf %105 : vector<128x64xf32>
    %cst_27 = arith.constant -1.000000e+01 : f32
    %109 = vector.broadcast %cst_27 : f32 to vector<128x64xf32>
    %110 = arith.mulf %109, %108 : vector<128x64xf32>
    %111 = math.exp %110 : vector<128x64xf32>
    %112 = math.log1p %111 : vector<128x64xf32>
    %cst_28 = arith.constant 1.000000e+01 : f32
    %113 = vector.broadcast %cst_28 : f32 to vector<128x64xf32>
    %114 = arith.divf %112, %113 : vector<128x64xf32>
    %115 = arith.addf %107, %114 : vector<128x64xf32>
    %116 = arith.truncf %115 : vector<128x64xf32> to vector<128x64xbf16>
    %c0_29 = arith.constant 0 : index
    %c0_30 = arith.constant 0 : index
    %117 = vector.load %arg10[%c0_29, %c0_30] : memref<64x65xbf16, #tpu.memory_space<vmem>>, vector<64x65xbf16>
    %cst_31 = arith.constant dense<0.000000e+00> : vector<128x65xf32>
    %118 = tpu.matmul %116, %117, %cst_31 {dimension_numbers = #tpu.dot_dimension_numbers<[1], [0], [0], [1], [0, 0, 1, 1], [], []>} : vector<128x64xbf16>, vector<64x65xbf16>, vector<128x65xf32> -> vector<128x65xf32>
    %c0_32 = arith.constant 0 : index
    %c0_33 = arith.constant 0 : index
    %119 = vector.load %arg11[%c0_32, %c0_33] : memref<1x65xf32, #tpu.memory_space<vmem>>, vector<1x65xf32>
    %120 = vector.broadcast %119 : vector<1x65xf32> to vector<128x65xf32>
    %121 = arith.addf %118, %120 : vector<128x65xf32>
    %122 = vector.shape_cast %121 : vector<128x65xf32> to vector<16x8x65xf32>
    %123 = vector.shape_cast %73 : vector<16x65xf32> to vector<16x1x65xf32>
    %124 = vector.broadcast %123 : vector<16x1x65xf32> to vector<16x8x65xf32>
    %125 = arith.addf %122, %124 : vector<16x8x65xf32>
    %cst_34 = arith.constant 0.000000e+00 : f32
    %126 = vector.broadcast %cst_34 : f32 to vector<16x8x65xf32>
    %127 = arith.maximumf %125, %126 : vector<16x8x65xf32>
    %128 = math.absf %125 : vector<16x8x65xf32>
    %cst_35 = arith.constant -1.000000e+01 : f32
    %129 = vector.broadcast %cst_35 : f32 to vector<16x8x65xf32>
    %130 = arith.mulf %129, %128 : vector<16x8x65xf32>
    %131 = math.exp %130 : vector<16x8x65xf32>
    %132 = math.log1p %131 : vector<16x8x65xf32>
    %cst_36 = arith.constant 1.000000e+01 : f32
    %133 = vector.broadcast %cst_36 : f32 to vector<16x8x65xf32>
    %134 = arith.divf %132, %133 : vector<16x8x65xf32>
    %135 = arith.addf %127, %134 : vector<16x8x65xf32>
    %136 = vector.extract_strided_slice %135 {offsets = [0, 0, 0], sizes = [16, 8, 64], strides = [1, 1, 1]} : vector<16x8x65xf32> to vector<16x8x64xf32>
    %137 = vector.shape_cast %136 : vector<16x8x64xf32> to vector<128x64xf32>
    %138 = vector.extract_strided_slice %135 {offsets = [0, 0, 64], sizes = [16, 8, 1], strides = [1, 1, 1]} : vector<16x8x65xf32> to vector<16x8x1xf32>
    %139 = vector.shape_cast %138 : vector<16x8x1xf32> to vector<128x1xf32>
    %140 = arith.truncf %137 : vector<128x64xf32> to vector<128x64xbf16>
    %c0_37 = arith.constant 0 : index
    %c0_38 = arith.constant 0 : index
    %141 = vector.load %arg12[%c0_37, %c0_38] : memref<64x3xbf16, #tpu.memory_space<vmem>>, vector<64x3xbf16>
    %cst_39 = arith.constant dense<0.000000e+00> : vector<128x3xf32>
    %142 = tpu.matmul %140, %141, %cst_39 {dimension_numbers = #tpu.dot_dimension_numbers<[1], [0], [0], [1], [0, 0, 1, 1], [], []>} : vector<128x64xbf16>, vector<64x3xbf16>, vector<128x3xf32> -> vector<128x3xf32>
    %c0_40 = arith.constant 0 : index
    %c0_41 = arith.constant 0 : index
    %143 = vector.load %arg13[%c0_40, %c0_41] : memref<1x3xf32, #tpu.memory_space<vmem>>, vector<1x3xf32>
    %144 = vector.broadcast %143 : vector<1x3xf32> to vector<128x3xf32>
    %145 = arith.addf %142, %144 : vector<128x3xf32>
    %cst_42 = arith.constant 0.000000e+00 : f32
    %146 = vector.broadcast %cst_42 : f32 to vector<128x1xf32>
    %147 = arith.subf %146, %139 : vector<128x1xf32>
    %cst_43 = arith.constant 0.000000e+00 : f32
    %148 = vector.broadcast %cst_43 : f32 to vector<128x3xf32>
    %149 = arith.subf %148, %145 : vector<128x3xf32>
    %150 = tpu.concatenate %147, %149 in 1 : vector<128x1xf32>, vector<128x3xf32> -> vector<128x4xf32>
    %cst_44 = arith.constant 6.000000e+01 : f32
    %151 = vector.broadcast %cst_44 : f32 to vector<128x4xf32>
    %152 = arith.minimumf %150, %151 : vector<128x4xf32>
    %153 = math.exp %152 : vector<128x4xf32>
    %154 = vector.extract_strided_slice %153 {offsets = [0, 0], sizes = [128, 1], strides = [1, 1]} : vector<128x4xf32> to vector<128x1xf32>
    %cst_45 = arith.constant 1.000000e+00 : f32
    %155 = vector.broadcast %cst_45 : f32 to vector<128x1xf32>
    %156 = arith.subf %155, %154 : vector<128x1xf32>
    %157 = vector.extract_strided_slice %153 {offsets = [0, 1], sizes = [128, 3], strides = [1, 1]} : vector<128x4xf32> to vector<128x3xf32>
    %cst_46 = arith.constant 1.000000e+00 : f32
    %158 = vector.broadcast %cst_46 : f32 to vector<128x3xf32>
    %159 = arith.addf %158, %157 : vector<128x3xf32>
    %160 = tpu.reciprocal %159 {approx = true} : vector<128x3xf32> -> vector<128x3xf32>
    %161 = tpu.concatenate %156, %160 in 1 : vector<128x1xf32>, vector<128x3xf32> -> vector<128x4xf32>
    %c0_47 = arith.constant 0 : index
    %c0_48 = arith.constant 0 : index
    %162 = vector.load %arg14[%c0_47, %c0_48] : memref<128x4xf32, #tpu.memory_space<vmem>>, vector<128x4xf32>
    tpu.vector_store %arg14[%c0_47, %c0_48], %161 {strides = array<i32>} : memref<128x4xf32, #tpu.memory_space<vmem>>, vector<128x4xf32>,
    return
  }
  func.func @transform_0(%arg0: i32) -> (i32, i32) {
    %c0_i32 = arith.constant 0 : i32
    %c0_i32_0 = arith.constant 0 : i32
    return %arg0, %c0_i32 : i32, i32
  }
  func.func @transform_1(%arg0: i32) -> (i32, i32) {
    %c0_i32 = arith.constant 0 : i32
    %c0_i32_0 = arith.constant 0 : i32
    return %arg0, %c0_i32 : i32, i32
  }
  func.func @transform_2(%arg0: i32) -> (i32, i32) {
    %c0_i32 = arith.constant 0 : i32
    %c0_i32_0 = arith.constant 0 : i32
    return %arg0, %c0_i32 : i32, i32
  }
  func.func @transform_3(%arg0: i32) -> (i32, i32) {
    %c0_i32 = arith.constant 0 : i32
    %c0_i32_0 = arith.constant 0 : i32
    %c0_i32_1 = arith.constant 0 : i32
    return %c0_i32, %c0_i32_0 : i32, i32
  }
  func.func @transform_4(%arg0: i32) -> (i32, i32) {
    %c0_i32 = arith.constant 0 : i32
    %c0_i32_0 = arith.constant 0 : i32
    %c0_i32_1 = arith.constant 0 : i32
    return %c0_i32, %c0_i32_0 : i32, i32
  }
  func.func @transform_5(%arg0: i32) -> (i32, i32) {
    %c0_i32 = arith.constant 0 : i32
    %c0_i32_0 = arith.constant 0 : i32
    %c0_i32_1 = arith.constant 0 : i32
    return %c0_i32, %c0_i32_0 : i32, i32
  }
  func.func @transform_6(%arg0: i32) -> (i32, i32) {
    %c0_i32 = arith.constant 0 : i32
    %c0_i32_0 = arith.constant 0 : i32
    %c0_i32_1 = arith.constant 0 : i32
    return %c0_i32, %c0_i32_0 : i32, i32
  }
  func.func @transform_7(%arg0: i32) -> (i32, i32) {
    %c0_i32 = arith.constant 0 : i32
    %c0_i32_0 = arith.constant 0 : i32
    %c0_i32_1 = arith.constant 0 : i32
    return %c0_i32, %c0_i32_0 : i32, i32
  }
  func.func @transform_8(%arg0: i32) -> (i32, i32) {
    %c0_i32 = arith.constant 0 : i32
    %c0_i32_0 = arith.constant 0 : i32
    %c0_i32_1 = arith.constant 0 : i32
    return %c0_i32, %c0_i32_0 : i32, i32
  }
  func.func @transform_9(%arg0: i32) -> (i32, i32) {
    %c0_i32 = arith.constant 0 : i32
    %c0_i32_0 = arith.constant 0 : i32
    %c0_i32_1 = arith.constant 0 : i32
    return %c0_i32, %c0_i32_0 : i32, i32
  }
  func.func @transform_10(%arg0: i32) -> (i32, i32) {
    %c0_i32 = arith.constant 0 : i32
    %c0_i32_0 = arith.constant 0 : i32
    %c0_i32_1 = arith.constant 0 : i32
    return %c0_i32, %c0_i32_0 : i32, i32
  }
  func.func @transform_11(%arg0: i32) -> (i32, i32) {
    %c0_i32 = arith.constant 0 : i32
    %c0_i32_0 = arith.constant 0 : i32
    %c0_i32_1 = arith.constant 0 : i32
    return %c0_i32, %c0_i32_0 : i32, i32
  }
  func.func @transform_12(%arg0: i32) -> (i32, i32) {
    %c0_i32 = arith.constant 0 : i32
    %c0_i32_0 = arith.constant 0 : i32
    %c0_i32_1 = arith.constant 0 : i32
    return %c0_i32, %c0_i32_0 : i32, i32
  }
  func.func @transform_13(%arg0: i32) -> (i32, i32) {
    %c0_i32 = arith.constant 0 : i32
    %c0_i32_0 = arith.constant 0 : i32
    return %arg0, %c0_i32 : i32, i32
  }
}

</mosaic_0001>

<bundles_post_ra>
// kernel: tpu_custom_call.1
= control target key start
LH: loop header
LB: loop body
LE: loop exit
PB: predicated region body
PF: predicated region fallthrough
CT: control target
= control target key end

     0   :  { %s6007_s25 = smov 0   ;;  %s9075_s0 = inlined_call_operand.vmem [shape: f32[32,3], index: 0, kind: input, shape index: {}]   ;;  %s9076_s1 = inlined_call_operand.vmem [shape: f32[32,3], index: 1, kind: input, shape index: {}]   ;;  %s9077_s2 = inlined_call_operand.vmem [shape: f32[32,8], index: 2, kind: input, shape index: {}]   ;;  %s9078_s3 = inlined_call_operand.vmem [shape: f32[3,24], index: 3, kind: input, shape index: {}]   ;;  %s9079_s4 = inlined_call_operand.vmem [shape: bf16[48,64], index: 4, kind: input, shape index: {}]   ;;  %s9080_s5 = inlined_call_operand.vmem [shape: f32[1,64], index: 5, kind: input, shape index: {}]   ;;  %s9081_s6 = inlined_call_operand.vmem [shape: bf16[64,64], index: 6, kind: input, shape index: {}]   ;;  %s9082_s7 = inlined_call_operand.vmem [shape: f32[1,64], index: 7, kind: input, shape index: {}]   ;;  %s9083_s8 = inlined_call_operand.vmem [shape: bf16[48,65], index: 8, kind: input, shape index: {}]   ;;  %s9084_s9 = inlined_call_operand.vmem [shape: bf16[64,65], index: 9, kind: input, shape index: {}]   ;;  %s9085_s10 = inlined_call_operand.vmem [shape: f32[1,65], index: 10, kind: input, shape index: {}]   ;;  %s9086_s11 = inlined_call_operand.vmem [shape: bf16[64,3], index: 11, kind: input, shape index: {}]   ;;  %s9087_s12 = inlined_call_operand.vmem [shape: f32[1,3], index: 12, kind: input, shape index: {}]   ;;  %s9088_s13 = inlined_call_operand.vmem [shape: f32[256,4], index: 13, kind: output, shape index: {}]  }
   0x1 LB: > { %s5142_s26 = sadd.s32 4294967295, %s5920_s25   ;;  %p5146_p0 = scmp.ge.s32.totalorder %s5920_s25, 1  ;;  %s5920_s25 = sphi %s6007_s25, %s23_s25  }
   0x2   : > { %p410_p1 = scmp.lt.s32.totalorder %s5920_s25, 3 }
   0x4   : > { %p411_p2 = pnand %p5146_p0, %p410_p1 }
   0x6   : > { %414 = sbr.rel (%p411_p2) target bundleno = 2046 (0x7fe), region = 72 }
   0xd   : > { %s5147_s27 = sshll.u32 %s5142_s26, 1  ;;  %v5922_v0 = vmov 0   ;;  %v9089_v3 = vmov 1   ;;  %v9090_v4 = vmov 2   ;;  %v506_v5 = vlaneseq  ;;  %v495_v36 = vld [vmem:[%s9078_s3] sm:$0x7] }
   0xe   : > { %5544 = vset.pattern.permute.xlu1 %v5922_v0  ;;  %5542 = vset.pattern.permute.xlu0 %v5922_v0  ;;  %p465_p3 = scmp.lt.s32.totalorder %s5147_s27, 3  ;;  %s5925_s23 = smov 24   ;;  %vm605_vm0 = vcmask 23552   ;;  %vm9162_vm1 = vcmask 195584  }
   0xf   : > { %v6043_v8 = vshrl.u32 %v506_v5, 7  ;;  %s5935_s21 = smov 64   ;;  %s5936_s24 = smov 1  }
  0x10   : > { %s9485_s27 = smov (!%p465_p3, %s5147_s27), 3 }
  0x11   : > { %s5148_s28 = sshll.u32 %s9485_s27, 3  ;;  %v6051_v10 = vsub.s32 0, %v6043_v8  ;;  %v6054_v11 = vsub.s32 1, %v6043_v8  ;;  %v6063_v14 = vsub.s32 2, %v6043_v8  ;;  %v1081_v15 = vsub.s32 3, %v6043_v8  ;;  %s5153_s27 = sshll.u32 %s5142_s26, 4 }
  0x12   : > { %s6020_s14 = scalar_lea.vmem %s9076_s1, %s5148_s28  ;;  %s468_s17 = scalar_lea.vmem %s9075_s0, %s5148_s28  ;;  %v1095_v18 = vsub.s32 5, %v6043_v8  ;;  %v1088_v20 = vsub.s32 4, %v6043_v8  ;;  %v1102_v22 = vsub.s32 6, %v6043_v8  ;;  %v1109_v23 = vsub.s32 7, %v6043_v8 }
  0x13   : > { %v6023_v1 = vld [vmem:[%s6020_s14] sm:$0xff]  ;;  %v490_v6 = vld [vmem:[%s468_s17 + $0x8] sm:$0xff]  ;;  %s6041_s20 = scalar_lea.vmem %s9077_s2, %s5148_s28  ;;  %9189 = vst [vmem:[#allocation2_spill] sm:$0xff] %v6051_v10  ;;  %v6086_v37 = vrot.slane %v495_v36, %v6054_v11  ;;  %v6089_v39 = vrot.slane %v495_v36, %v6051_v10  ;;  %v6092_v41 = vrot.slane %v495_v36, %v6063_v14  ;;  %p483_p4 = scmp.lt.s32.totalorder %s5153_s27, 31 }
  0x14   : > { %546 = vperm.xlu1 %5544, %v6023_v1   ;;  %v489_v2 = vld [vmem:[%s468_s17] sm:$0xff]  ;;  %v6036_v7 = vld [vmem:[%s6020_s14 + $0x8] sm:$0xff] }
  0x15   : > { %498 = vperm.xlu0 %5542, %v489_v2   ;;  %v6047_v9 = vld [vmem:[%s6041_s20] sm:$0xff]  ;;  %v494_v26 = vld [vmem:[%s6041_s20 + $0x8] sm:$0xff]  ;;  %9190 = vst [vmem:[#allocation3_spill] sm:$0xff] %v6086_v37  ;;  %9191 = vst [vmem:[#allocation4_spill] sm:$0xff] %v6089_v39  ;;  %s9487_s27 = smov (!%p483_p4, %s5153_s27), 31 }
  0x16   : > { %v1061_v12 = vrot.slane %v6047_v9, %v6051_v10  ;;  %v1068_v13 = vrot.slane %v6047_v9, %v6054_v11  ;;  %v1075_v16 = vrot.slane %v6047_v9, %v6063_v14  ;;  %v1082_v17 = vrot.slane %v6047_v9, %v1081_v15  ;;  %9192 = vst [vmem:[#allocation5_spill] sm:$0xff] %v6092_v41  ;;  %s5154_s26 = sshll.u32 %s9487_s27, 3 }
  0x17   : > { %v1096_v19 = vrot.slane %v6047_v9, %v1095_v18  ;;  %v1089_v21 = vrot.slane %v6047_v9, %v1088_v20  ;;  %v1103_v24 = vrot.slane %v6047_v9, %v1102_v22  ;;  %v1110_v25 = vrot.slane %v6047_v9, %v1109_v23  ;;  %s9006_s30 = scalar_lea.vmem %s9088_s13, %s5154_s26 }
  0x18   : > { %5545 = vset.pattern.permute.xlu1 %v9089_v3  ;;  %v1124_v27 = vrot.slane %v494_v26, %v6054_v11  ;;  %v1131_v28 = vrot.slane %v494_v26, %v6063_v14  ;;  %v1138_v29 = vrot.slane %v494_v26, %v1081_v15  ;;  %v1145_v30 = vrot.slane %v494_v26, %v1088_v20 }
  0x19   : > { %5543 = vset.pattern.permute.xlu0 %v9089_v3  ;;  %557 = vperm.xlu1 %5545, %v6023_v1   ;;  %v1152_v31 = vrot.slane %v494_v26, %v1095_v18  ;;  %v1159_v32 = vrot.slane %v494_v26, %v1102_v22  ;;  %v1166_v33 = vrot.slane %v494_v26, %v1109_v23 }
  0x1a   : > { %513 = vperm.xlu0 %5543, %v489_v2   ;;  %v1117_v14 = vrot.slane %v494_v26, %v6051_v10  ;;  %v603_v15 = vmul.f32 %v6023_v1, %v6023_v1 }
  0x1d   : > { %5546 = vset.pattern.permute.xlu1 %v9090_v4 }
  0x1e   : > { %5547 = vset.pattern.permute.xlu0 %v9090_v4  ;;  %529 = vperm.xlu1 %5546, %v489_v2  }
  0x1f   : > { %569 = vperm.xlu0 %5547, %v6023_v1  }
  0x22   : > { %5548 = vset.pattern.permute.xlu1 %v5922_v0 }
  0x23   : > { %503 = vperm.xlu1 %5548, %v490_v6   ;;  %5550 = vset.pattern.permute.xlu0 %v5922_v0 }
  0x24   : > { %551 = vperm.xlu0 %5550, %v6036_v7  }
  0x27   : > { %5549 = vset.pattern.permute.xlu1 %v9089_v3 }
  0x28   : > { %517 = vperm.xlu1 %5549, %v490_v6   ;;  %5552 = vset.pattern.permute.xlu0 %v9090_v4 }
  0x29   : > { %573 = vperm.xlu0 %5552, %v6036_v7  }
  0x2c   : > { %561 = vperm.xlu1 %5549, %v6036_v7  }
  0x2d   : > { %1063 = vbcast.lane.b32.xlu0 %v1061_v12, 256 }
  0x2e   : > { %5553 = vset.pattern.permute.xlu0 %v5922_v0 }
  0x30   : > { %5551 = vset.pattern.permute.xlu1 %v9090_v4 }
  0x31   : > { %533 = vperm.xlu1 %5551, %v490_v6   ;;  %1077 = vbcast.lane.b32.xlu0 %v1075_v16, 256  ;;  %v606_v16 = vsel %vm605_vm0, %v603_v15, 0.0 }
  0x35   : > { %5554 = vset.pattern.permute.xlu1 %v5922_v0 }
  0x93   : > { %v547_v34 = vpop.permute.xlu1 %546 }
  0x94   : > { %v499_v35 = vpop.permute.xlu0 %498  ;;  %v554_v44 = vmul.f32 %v547_v34, %v6089_v39 }
  0x95   : > { %v510_v45 = vmul.f32 %v6089_v39, %v499_v35 }
  0x98   : > { %v558_v38 = vpop.permute.xlu1 %557 }
  0x99   : > { %v514_v40 = vpop.permute.xlu0 %513  ;;  %v564_v42 = vmul.f32 %v558_v38, %v6086_v37 }
  0x9a   : > { %v524_v43 = vmul.f32 %v6086_v37, %v514_v40 }
  0x9b   : > { %v566_v49 = vadd.f32 %v564_v42, %v554_v44 }
  0x9c   : > { %v526_v50 = vadd.f32 %v524_v43, %v510_v45 }
  0x9d   : > { %v530_v46 = vpop.permute.xlu1 %529 }
  0x9e   : > { %v540_v47 = vmul.f32 %v6092_v41, %v530_v46  ;;  %v570_v48 = vpop.permute.xlu0 %569 }
  0x9f   : > { %v576_v51 = vmul.f32 %v570_v48, %v6092_v41 }
  0xa0   : > { %v542_v52 = vadd.f32 %v540_v47, %v526_v50 }
  0xa1   : > { %v578_v53 = vadd.f32 %v576_v51, %v566_v49 }
  0xa2   : > { %v504_v54 = vpop.permute.xlu1 %503  ;;  %v580_v56 = vadd.f32 1.5707964, %v542_v52 }
  0xa3   : > { %595 = vrot.lane.b32.xlu1 %v578_v53, %s5925_s23  ;;  %v552_v55 = vpop.permute.xlu0 %551  ;;  %v511_v2 = vmul.f32 %v6089_v39, %v504_v54 }
  0xa4   : > { %v555_v59 = vmul.f32 %v552_v55, %v6089_v39 }
  0xa7   : > { %584 = vrot.lane.b32.xlu1 %v580_v56, %s5925_s23  ;;  %v518_v57 = vpop.permute.xlu1 %517 }
  0xa8   : > { %v574_v58 = vpop.permute.xlu0 %573  ;;  %v525_v63 = vmul.f32 %v6086_v37, %v518_v57 }
  0xa9   : > { %v577_v62 = vmul.f32 %v574_v58, %v6092_v41 }
  0xaa   : > { %v527_v9 = vadd.f32 %v525_v63, %v511_v2 }
  0xab   : > { %1070 = vbcast.lane.b32.xlu1 %v1068_v13, 256  ;;  %v562_v60 = vpop.permute.xlu1 %561 }
  0xac   : > { %v565_v61 = vmul.f32 %v562_v60, %v6086_v37 }
  0xae   : > { %v567_v0 = vadd.f32 %v565_v61, %v555_v59 }
  0xaf   : > { %1084 = vbcast.lane.b32.xlu1 %v1082_v17, 256  ;;  %v604_v17 = vmul.f32 %v6036_v7, %v6036_v7 }
  0xb0   : > { %v6107_v5 = vadd.f32 %v577_v62, %v567_v0  ;;  %v534_v6 = vpop.permute.xlu1 %533 }
  0xb1   : > { %v541_v11 = vmul.f32 %v6092_v41, %v534_v6  ;;  %v609_v18 = vsel %vm605_vm0, %v604_v17, 0.0 }
  0xb2   : > { %597 = vrot.lane.b32.xlu0 %v6107_v5, %s5925_s23 }
  0xb3   : > { %v6112_v12 = vadd.f32 %v541_v11, %v527_v9  ;;  %1098 = vbcast.lane.b32.xlu1 %v1096_v19, 256  ;;  %v5926_v19 = vmov 1966171168  }
  0xb4   : > { %v962_v20 = vunpack.c.l.s4 %v5926_v19 }
  0xb5   : > { %v581_v13 = vadd.f32 1.5707964, %v6112_v12 }
  0xb6   : > { %1091 = vbcast.lane.b32.xlu0 %v1089_v21, 256  ;;  %v963_v21 = vunpack.c.0.s8 %v962_v20 }
  0xb7   : > { %586 = vrot.lane.b32.xlu1 %v581_v13, %s5925_s23 }
  0xb8   : > { %v6122_v22 = vsub.s32 %v963_v21, %v6043_v8 }
  0xba   : > { %1105 = vbcast.lane.b32.xlu0 %v1103_v24, 256  ;;  %9193 = vst [vmem:[#allocation6_spill] sm:$0xff] %v6122_v22 }
  0xbb   : > { %1112 = vbcast.lane.b32.xlu1 %v1110_v25, 256  ;;  %v1064_v25 = vpop.permute.xlu0 %1063 }
  0xbe   : > { %1119 = vbcast.lane.b32.xlu0 %v1117_v14, 256 }
  0xbf   : > { %1126 = vbcast.lane.b32.xlu1 %v1124_v27, 256  ;;  %v1078_v35 = vpop.permute.xlu0 %1077 }
  0xc2   : > { %1133 = vbcast.lane.b32.xlu0 %v1131_v28, 256 }
  0xc3   : > { %1140 = vbcast.lane.b32.xlu1 %v1138_v29, 256 }
  0xc6   : > { %1147 = vbcast.lane.b32.xlu0 %v1145_v30, 256 }
  0xc7   : > { %1154 = vbcast.lane.b32.xlu1 %v1152_v31, 256 }
  0xca   : > { %1161 = vbcast.lane.b32.xlu0 %v1159_v32, 256 }
  0xcb   : > { %1168 = vbcast.lane.b32.xlu1 %v1166_v33, 256 }
  0xe9   : > { %607 = vadd.xlane.f32.xlu0 %v606_v16 }
  0xef   : > { %610 = vadd.xlane.f32.xlu1 %v609_v18 }
 0x115   : > { %v596_v23 = vpop.permute.xlu1 %595 }
 0x116   : > { %v601_v24 = vsel %vm9162_vm1, %v578_v53, %v596_v23 }
 0x117   : > { %v1179_v1 = vrot.slane %v601_v24, %v6122_v22  ;;  %v1172_v47 = vcombine.high %v601_v24, %v601_v24 }
 0x119   : > { %v1187_v26 = vcombine.high %v1179_v1, %v1179_v1  ;;  %v585_v27 = vpop.permute.xlu1 %584  ;;  %v1195_v7 = vrot.slane %v1179_v1, %v6122_v22  ;;  %v6141_v54 = vrot.slane %v1172_v47, %v6122_v22 }
 0x11a   : > { %v591_v28 = vsel %vm9162_vm1, %v542_v52, %v585_v27 }
 0x11b   : > { %v967_v29 = vrot.slane %v591_v28, %v6122_v22  ;;  %v1209_v30 = vrot.slane %v1187_v26, %v6122_v22  ;;  %v1217_v31 = vcombine.high %v1195_v7, %v1195_v7  ;;  %v1273_v48 = vrot.slane %v1195_v7, %v6051_v10 }
 0x11c   : > { %v960_v50 = vcombine.high %v591_v28, %v591_v28  ;;  %v1188_v2 = vcombine.high %v6141_v54, %v6141_v54 }
 0x11d   : > { %v975_v8 = vcombine.high %v967_v29, %v967_v29  ;;  %v983_v32 = vrot.slane %v967_v29, %v6122_v22  ;;  %v1071_v33 = vpop.permute.xlu1 %1070  ;;  %v1281_v34 = vrot.slane %v1217_v31, %v6051_v10  ;;  %v1219_v36 = vcombine.high %v1209_v30, %v1209_v30 }
 0x11e   : > { %v1350_v55 = vmul.f32 %v1273_v48, %v1064_v25  ;;  %v6147_v58 = vrot.slane %v960_v50, %v6122_v22  ;;  %v1277_v63 = vrot.slane %v1209_v30, %v6051_v10  ;;  %v6163_v17 = vrot.slane %v1188_v2, %v6122_v22 }
 0x11f   : > { %v997_v38 = vrot.slane %v975_v8, %v6122_v22  ;;  %v1005_v40 = vcombine.high %v983_v32, %v983_v32  ;;  %v1285_v42 = vrot.slane %v1219_v36, %v6051_v10  ;;  %v1352_v44 = vmul.f32 %v1281_v34, %v1078_v35 }
 0x120   : > { %v1369_v53 = vrot.slane %v983_v32, %v6051_v10  ;;  %v976_v6 = vcombine.high %v6147_v58, %v6147_v58  ;;  %v1351_v16 = vmul.f32 %v1277_v63, %v1071_v33  ;;  %v1293_v27 = vrot.slane %v6163_v17, %v6051_v10 }
 0x121   : > { %v1377_v43 = vrot.slane %v1005_v40, %v6051_v10  ;;  %v1007_v45 = vcombine.high %v997_v38, %v997_v38  ;;  %v1085_v46 = vpop.permute.xlu1 %1084  ;;  %v1373_v11 = vrot.slane %v997_v38, %v6051_v10  ;;  %v9098_v34 = vmov 683565275  }
 0x122   : > { %v1353_v49 = vmul.f32 %v1285_v42, %v1085_v46  ;;  %v6149_v59 = vadd.f32 %v1369_v53, %v1350_v55  ;;  %v6167_v19 = vrot.slane %v976_v6, %v6122_v22  ;;  %v9100_v36 = vmov 2475754826  }
 0x123   : > { %v6136_v51 = vadd.f32 %v1377_v43, %v1352_v44  ;;  %v1381_v52 = vrot.slane %v1007_v45, %v6051_v10  ;;  %v6169_v21 = vadd.f32 %v1373_v11, %v1351_v16  ;;  %v9108_v43 = vmov 2131351028  }
 0x124   : > { %v1465_v9 = vand.u32 2139095040, %v6149_v59  ;;  %v1389_v29 = vrot.slane %v6167_v19, %v6051_v10  ;;  %v9110_v46 = vmov 2102212464   ;;  %v9123_v50 = vmov 920167782  }
 0x125   : > { %9194 = vst [vmem:[#allocation7_spill] sm:$0xff] %v6136_v51  ;;  %v1673_v56 = vand.u32 2139095040, %v6136_v51  ;;  %v6144_v57 = vadd.f32 %v1381_v52, %v1353_v49  ;;  %v9095_v62 = vand.u32 2147483647, %v6136_v51  ;;  %9196 = vst [vmem:[#allocation9_spill] sm:$0xff] %v6169_v21  ;;  %v1099_v26 = vpop.permute.xlu1 %1098  ;;  %v1569_v31 = vand.u32 2139095040, %v6169_v21 }
 0x126   : > { %v1466_v20 = vshrl.u32 %v1465_v9, 23  ;;  %v1355_v32 = vmul.f32 %v1293_v27, %v1099_v26 }
 0x127   : > { %9195 = vst [vmem:[#allocation8_spill] sm:$0xff] %v6144_v57  ;;  %v1674_v60 = vshrl.u32 %v1673_v56, 23  ;;  %v1777_v61 = vand.u32 2139095040, %v6144_v57  ;;  %v1677_v15 = vand.u32 8388607, %v9095_v62 }
 0x128   : > { %v9094_v18 = vand.u32 2147483647, %v6144_v57  ;;  %v6177_v30 = vadd.s32 4294967169, %v1466_v20 }
 0x129   : > { %v5175_v0 = vadd.s32 4294967169, %v1674_v60  ;;  %v1778_v14 = vshrl.u32 %v1777_v61, 23  ;;  %v1678_v1 = vor.u32 8388608, %v1677_v15 }
 0x12a   : > { %v1781_v28 = vand.u32 8388607, %v9094_v18 }
 0x12b   : > { %v1680_v13 = vadd.s32 1, %v5175_v0  ;;  %v5179_v24 = vadd.s32 4294967169, %v1778_v14  ;;  %v6182_v40 = vshll.u32 %v1678_v1, 8  ;;  %v9096_v0 = vmov 1326507024  }
 0x12c   : > { %v1782_v53 = vor.u32 8388608, %v1781_v28 }
 0x12d   : > { %vm1681_vm2 = vcmp.gt.s32.totalorder %v1680_v13, 0  ;;  %v1784_v8 = vadd.s32 1, %v5179_v24 }
 0x12e   : > { %v1682_v23 = vsel %vm1681_vm2, %v1680_v13, 0 }
 0x12f   : > { %v1684_v25 = vand.u32 31, %v1682_v23  ;;  %v1683_v33 = vshrl.u32 %v1682_v23, 5  ;;  %vm1785_vm3 = vcmp.gt.s32.totalorder %v1784_v8, 0 }
 0x130   : > { %v1786_v23 = vsel %vm1785_vm3, %v1784_v8, 0 }
 0x131   : > { %v1685_v7 = vsub.s32 32, %v1684_v25  ;;  %v1687_v35 = vshll.u32 %v9098_v34, %v1684_v25  ;;  %v1690_v42 = vshll.u32 %v9100_v36, %v1684_v25  ;;  %v1693_v45 = vshll.u32 %v9108_v43, %v1684_v25 }
 0x132   : > { %v1696_v49 = vshll.u32 %v9110_v46, %v1684_v25  ;;  %v1699_v63 = vshll.u32 %v9123_v50, %v1684_v25  ;;  %vm1702_vm4 = vcmp.lt.s32.totalorder %v1683_v33, 1  ;;  %vm1703_vm5 = vcmp.lt.s32.totalorder %v1683_v33, 2 }
 0x133   : > { %v1688_v38 = vshrl.u32 %v9100_v36, %v1685_v7  ;;  %v1691_v44 = vshrl.u32 %v9108_v43, %v1685_v7  ;;  %v1694_v47 = vshrl.u32 %v9110_v46, %v1685_v7  ;;  %v1697_v52 = vshrl.u32 %v9123_v50, %v1685_v7 }
 0x134   : > { %v1686_v55 = vshrl.u32 %v9098_v34, %v1685_v7  ;;  %v1700_v2 = vshrl.u32 %v9096_v0, %v1685_v7  ;;  %vm1705_vm6 = vcmp.lt.s32.totalorder %v1683_v33, 4  ;;  %vm1704_vm7 = vcmp.lt.s32.totalorder %v1683_v33, 3 }
 0x135   : > { %v1689_v48 = vor.u32 %v1688_v38, %v1687_v35  ;;  %v1692_v56 = vor.u32 %v1691_v44, %v1690_v42  ;;  %v1695_v60 = vor.u32 %v1694_v47, %v1693_v45  ;;  %v1698_v61 = vor.u32 %v1697_v52, %v1696_v49 }
 0x136   : > { %v1701_v11 = vor.u32 %v1700_v2, %v1699_v63  ;;  %v1787_v26 = vshrl.u32 %v1786_v23, 5  ;;  %v6201_v35 = vadd.f32 %v1389_v29, %v1355_v32  ;;  %v1570_v38 = vshrl.u32 %v1569_v31, 23 }
 0x137   : > { %v1706_v6 = vsel %vm1702_vm4, %v1686_v55, %v1689_v48  ;;  %v1710_v9 = vsel %vm1702_vm4, %v1689_v48, %v1692_v56  ;;  %v1707_v13 = vsel %vm1705_vm6, %v1695_v60, 2102212464  ;;  %v1711_v14 = vsel %vm1705_vm6, %v1698_v61, 920167782 }
 0x138   : > { %v1708_v15 = vsel %vm1704_vm7, %v1692_v56, %v1707_v13  ;;  %v1712_v16 = vsel %vm1704_vm7, %v1695_v60, %v1711_v14  ;;  %v1714_v20 = vsel %vm1702_vm4, %v1692_v56, %v1695_v60  ;;  %v1715_v25 = vsel %vm1705_vm6, %v1701_v11, 1326507024  ;;  %9197 = vst [vmem:[#allocation10_spill] sm:$0xff] %v6201_v35 }
 0x139   : > { %v1709_v24 = vsel %vm1703_vm5, %v1706_v6, %v1708_v15  ;;  %v1713_v1 = vsel %vm1703_vm5, %v1710_v9, %v1712_v16  ;;  %v1716_v27 = vsel %vm1704_vm7, %v1698_v61, %v1715_v25  ;;  %v1788_v44 = vand.u32 31, %v1786_v23 }
 0x13a   : > { %v6197_v7 = vmul.u32.u64.low %v6182_v40, %v1713_v1  ;;  %v6198_v28 = vmul.u32.u64.high %v6182_v40, %v1713_v1, %v6197_v7  ;;  %v1717_v42 = vsel %vm1703_vm5, %v1714_v20, %v1716_v27  ;;  %v6204_v45 = vshll.u32 %v1782_v53, 8 }
 0x13b   : > { %v6207_v8 = vmul.u32.u64.low %v6182_v40, %v1717_v42  ;;  %v6208_v47 = vmul.u32.u64.high %v6182_v40, %v1717_v42, %v6207_v8  ;;  %v1725_v48 = vmul.u32 %v6182_v40, %v1709_v24  ;;  %vm1806_vm8 = vcmp.lt.s32.totalorder %v1787_v26, 1 }
 0x13c   : > { %v1789_v49 = vsub.s32 32, %v1788_v44  ;;  %v1791_v52 = vshll.u32 %v9098_v34, %v1788_v44  ;;  %vm1807_vm9 = vcmp.lt.s32.totalorder %v1787_v26, 2  ;;  %vm1809_vm10 = vcmp.lt.s32.totalorder %v1787_v26, 4 }
 0x13d   : > { %v1728_v29 = vadd.s32 1, %v6198_v28  ;;  %v1794_v31 = vshll.u32 %v9100_v36, %v1788_v44  ;;  %v1797_v32 = vshll.u32 %v9108_v43, %v1788_v44  ;;  %v1985_v33 = vand.u32 2139095040, %v6201_v35 }
 0x13e   : > { %v1792_v53 = vshrl.u32 %v9100_v36, %v1789_v49  ;;  %v1795_v55 = vshrl.u32 %v9108_v43, %v1789_v49  ;;  %v1798_v40 = vshrl.u32 %v9110_v46, %v1789_v49  ;;  %v1800_v56 = vshll.u32 %v9110_v46, %v1788_v44 }
 0x13f   : > { %vm1727_vm11 = vc.u32 %v6208_v47, %v6197_v7  ;;  %v1801_v60 = vshrl.u32 %v9123_v50, %v1789_v49  ;;  %v1803_v61 = vshll.u32 %v9123_v50, %v1788_v44  ;;  %v1804_v63 = vshrl.u32 %v9096_v0, %v1789_v49 }
 0x140   : > { %v1729_v2 = vsel %vm1727_vm11, %v1728_v29, %v6198_v28  ;;  %v1793_v6 = vor.u32 %v1792_v53, %v1791_v52  ;;  %v1796_v9 = vor.u32 %v1795_v55, %v1794_v31  ;;  %v1799_v11 = vor.u32 %v1798_v40, %v1797_v32 }
 0x141   : > { %v1730_v13 = vadd.s32 %v1729_v2, %v1725_v48  ;;  %v1802_v14 = vor.u32 %v1801_v60, %v1800_v56  ;;  %v1805_v15 = vor.u32 %v1804_v63, %v1803_v61  ;;  %v1986_v16 = vshrl.u32 %v1985_v33, 23 }
 0x142   : > { %v1790_v20 = vshrl.u32 %v9098_v34, %v1789_v49  ;;  %v1811_v23 = vsel %vm1809_vm10, %v1799_v11, 2102212464  ;;  %v1814_v24 = vsel %vm1806_vm8, %v1793_v6, %v1796_v9  ;;  %v1818_v1 = vsel %vm1806_vm8, %v1796_v9, %v1799_v11 }
 0x143   : > { %v1731_v25 = vadd.s32 536870912, %v1730_v13  ;;  %vm1808_vm12 = vcmp.lt.s32.totalorder %v1787_v26, 3  ;;  %v1815_v27 = vsel %vm1809_vm10, %v1802_v14, 920167782  ;;  %v1819_v28 = vsel %vm1809_vm10, %v1805_v15, 1326507024 }
 0x144   : > { %v1810_v42 = vsel %vm1806_vm8, %v1790_v20, %v1793_v6  ;;  %v1816_v44 = vsel %vm1808_vm12, %v1799_v11, %v1815_v27  ;;  %v1820_v8 = vsel %vm1808_vm12, %v1802_v14, %v1819_v28  ;;  %v5187_v48 = vadd.s32 4294967169, %v1986_v16 }
 0x145   : > { %v6233_v52 = vshrl.u32 %v1731_v25, 30  ;;  %v1812_v49 = vsel %vm1808_vm12, %v1796_v9, %v1811_v23  ;;  %v1817_v29 = vsel %vm1807_vm9, %v1814_v24, %v1816_v44  ;;  %v1821_v31 = vsel %vm1807_vm9, %v1818_v1, %v1820_v8 }
 0x146   : > { %v6238_v32 = vmul.u32.u64.low %v6204_v45, %v1821_v31  ;;  %v6239_v33 = vmul.u32.u64.high %v6204_v45, %v1821_v31, %v6238_v32  ;;  %v6242_v53 = vmul.u32.u64.low %v6204_v45, %v1817_v29  ;;  %v6243_v55 = vmul.u32.u64.high %v6204_v45, %v1817_v29, %v6242_v53 }
 0x147   : > { %v1472_v40 = vadd.s32 1, %v6177_v30  ;;  %v1733_v56 = vshll.u32 %v6233_v52, 30  ;;  %v1992_v60 = vadd.s32 1, %v5187_v48  ;;  %v1813_v61 = vsel %vm1807_vm9, %v1810_v42, %v1812_v49 }
 0x148   : > { %v9092_v2 = vand.u32 2147483647, %v6201_v35  ;;  %v5171_v6 = vadd.s32 4294967169, %v1570_v38  ;;  %vm1831_vm14 = vc.u32 %v6239_v33, %v6242_v53  ;;  %v1832_v9 = vadd.s32 1, %v6243_v55 }
 0x149   : > { %v6249_v63 = vsub.s32 %v1730_v13, %v1733_v56  ;;  %vm1993_vm13 = vcmp.gt.s32.totalorder %v1992_v60, 0  ;;  %vm1473_vm15 = vcmp.gt.s32.totalorder %v1472_v40, 0  ;;  %v1829_v14 = vmul.u32 %v6204_v45, %v1813_v61  ;;  %v6258_v13 = vpop.permute.xlu0 %597 }
 0x14a   : > { %v1994_v11 = vsel %vm1993_vm13, %v1992_v60, 0  ;;  %v1833_v26 = vsel %vm1831_vm14, %v1832_v9, %v6243_v55  ;;  %v6262_v16 = vrot.slane %v6141_v54, %v6122_v22  ;;  %v1989_v20 = vand.u32 8388607, %v9092_v2 }
 0x14b   : > { %v1736_v30 = vsub.s32 0, %v6249_v63  ;;  %v1996_v15 = vand.u32 31, %v1994_v11  ;;  %v1834_v38 = vadd.s32 %v1833_v26, %v1829_v14  ;;  %v6268_v24 = vrot.slane %v6147_v58, %v6122_v22 }
 0x14c   : > { %v6270_v1 = vsel %vm1473_vm15, %v1472_v40, 0  ;;  %v1576_v45 = vadd.s32 1, %v5171_v6  ;;  %v1990_v31 = vor.u32 8388608, %v1989_v20  ;;  %v1995_v32 = vshrl.u32 %v1994_v11, 5 }
 0x14d   : > { %v1997_v23 = vsub.s32 32, %v1996_v15  ;;  %v5176_v25 = vmin.u32 %v1736_v30, %v6249_v63  ;;  %v1999_v27 = vshll.u32 %v9098_v34, %v1996_v15  ;;  %v1835_v28 = vadd.s32 536870912, %v1834_v38  ;;  %v1092_v6 = vpop.permute.xlu0 %1091 }
 0x14e   : > { %v2002_v42 = vshll.u32 %v9100_v36, %v1996_v15  ;;  %v2008_v44 = vshll.u32 %v9110_v46, %v1996_v15  ;;  %v2005_v55 = vshll.u32 %v9108_v43, %v1996_v15  ;;  %v2011_v61 = vshll.u32 %v9123_v50, %v1996_v15 }
 0x14f   : > { %v2000_v54 = vshrl.u32 %v9100_v36, %v1997_v23  ;;  %v2003_v8 = vshrl.u32 %v9108_v43, %v1997_v23  ;;  %v2006_v48 = vshrl.u32 %v9110_v46, %v1997_v23  ;;  %v2009_v58 = vshrl.u32 %v9123_v50, %v1997_v23 }
 0x150   : > { %v2012_v49 = vshrl.u32 %v9096_v0, %v1997_v23  ;;  %v6281_v29 = vshrl.u32 %v1835_v28, 30  ;;  %v1738_v9 = vclz %v5176_v25  ;;  %v1289_v14 = vrot.slane %v6262_v16, %v6051_v10 }
 0x151   : > { %v2001_v40 = vor.u32 %v2000_v54, %v1999_v27  ;;  %v2004_v56 = vor.u32 %v2003_v8, %v2002_v42  ;;  %v2010_v60 = vor.u32 %v2009_v58, %v2008_v44  ;;  %v6289_v26 = vand.u32 31, %v6270_v1 }
 0x152   : > { %v1837_v30 = vshll.u32 %v6281_v29, 30  ;;  %v2007_v28 = vor.u32 %v2006_v48, %v2005_v55  ;;  %v2013_v20 = vor.u32 %v2012_v49, %v2011_v61  ;;  %v1385_v11 = vrot.slane %v6268_v24, %v6051_v10 }
 0x153   : > { %9198 = vst [vmem:[#allocation11_spill] sm:$0xff] %v6289_v26  ;;  %vm2014_vm0 = vcmp.lt.s32.totalorder %v1995_v32, 1  ;;  %vm2017_vm2 = vcmp.lt.s32.totalorder %v1995_v32, 4  ;;  %v1354_v15 = vmul.f32 %v1289_v14, %v1092_v6  ;;  %vm1577_vm3 = vcmp.gt.s32.totalorder %v1576_v45, 0 }
 0x154   : > { %v6293_v27 = vsub.s32 %v1834_v38, %v1837_v30  ;;  %v2022_v25 = vsel %vm2014_vm0, %v2001_v40, %v2004_v56  ;;  %v2023_v54 = vsel %vm2017_vm2, %v2010_v60, 920167782  ;;  %v2030_v42 = vshll.u32 %v1990_v31, 8 }
 0x155   : > { %v5177_v44 = vadd.s32 4294967294, %v1738_v9  ;;  %vm2015_vm4 = vcmp.lt.s32.totalorder %v1995_v32, 2  ;;  %vm2016_vm5 = vcmp.lt.s32.totalorder %v1995_v32, 3  ;;  %v2019_v48 = vsel %vm2017_vm2, %v2007_v28, 2102212464 }
 0x156   : > { %v1840_v8 = vsub.s32 0, %v6293_v27  ;;  %v2024_v58 = vsel %vm2016_vm5, %v2007_v28, %v2023_v54  ;;  %v2026_v49 = vsel %vm2014_vm0, %v2004_v56, %v2007_v28  ;;  %v2027_v55 = vsel %vm2017_vm2, %v2013_v20, 1326507024 }
 0x157   : > { %v1578_v38 = vsel %vm1577_vm3, %v1576_v45, 0  ;;  %v1998_v61 = vshrl.u32 %v9098_v34, %v1997_v23  ;;  %v2025_v6 = vsel %vm2015_vm4, %v2022_v25, %v2024_v58  ;;  %v6300_v30 = vadd.f32 %v1385_v11, %v1354_v15 }
 0x158   : > { %v6303_v14 = vsub.s32 32, %v6289_v26  ;;  %v2028_v31 = vsel %vm2016_vm5, %v2010_v60, %v2027_v55  ;;  %v6305_v9 = vmul.u32.u64.low %v2030_v42, %v2025_v6  ;;  %v6306_v3 = vmul.u32.u64.high %v2030_v42, %v2025_v6, %v6305_v9 }
 0x159   : > { %9199 = vst [vmem:[#allocation12_spill] sm:$0xff] %v6300_v30  ;;  %v5180_v54 = vmin.u32 %v1840_v8, %v6293_v27  ;;  %v2018_v28 = vsel %vm2014_vm0, %v1998_v61, %v2001_v40  ;;  %v2020_v20 = vsel %vm2016_vm5, %v2004_v56, %v2019_v48  ;;  %v2029_v45 = vsel %vm2015_vm4, %v2026_v49, %v2028_v31 }
 0x15a   : > { %v6312_v23 = vand.u32 31, %v1578_v38  ;;  %vm5178_vm6 = vcmp.lt.s32.totalorder %v5177_v44, 0  ;;  %v6314_v11 = vmul.u32.u64.low %v2030_v42, %v2029_v45  ;;  %v6315_v15 = vmul.u32.u64.high %v2030_v42, %v2029_v45, %v6314_v11 }
 0x15b   : > { %v1881_v25 = vand.u32 2139095040, %v6300_v30  ;;  %v2021_v58 = vsel %vm2015_vm4, %v2018_v28, %v2020_v20  ;;  %v2040_v8 = vadd.s32 1, %v6306_v3  ;;  %v6325_v40 = vsel %vm9162_vm1, %v6107_v5, %v6258_v13 }
 0x15c   : > { %9200 = vst [vmem:[#allocation13_spill] sm:$0xff] %v6312_v23  ;;  %v1218_v56 = vcombine.high %v6262_v16, %v6262_v16  ;;  %v6330_v48 = vshrl.u32 %v6270_v1, 5  ;;  %v6332_v49 = vsel %vm5178_vm6, 0, %v5177_v44  ;;  %v1842_v55 = vclz %v5180_v54 }
 0x15d   : > { %v1882_v61 = vshrl.u32 %v1881_v25, 23  ;;  %v1489_v32 = vshrl.u32 %v9123_v50, %v6303_v14  ;;  %v1492_v6 = vshrl.u32 %v9096_v0, %v6303_v14  ;;  %v6339_v31 = vsub.s32 32, %v6312_v23 }
 0x15e   : > { %9201 = vst [vmem:[#allocation14_spill] sm:$0xff] %v6330_v48  ;;  %vm2039_vm7 = vc.u32 %v6315_v15, %v6305_v9  ;;  %v1488_v5 = vshll.u32 %v9110_v46, %v6289_v26  ;;  %v1491_v13 = vshll.u32 %v9123_v50, %v6289_v26  ;;  %v6347_v16 = vshrl.u32 %v1578_v38, 5 }
 0x15f   : > { %9202 = vst [vmem:[#allocation15_spill] sm:$0xff] %v6339_v31  ;;  %v2037_v1 = vmul.u32 %v2030_v42, %v2021_v58  ;;  %v1746_v44 = vsub.s32 4294967266, %v6332_v49  ;;  %v2041_v54 = vsel %vm2039_vm7, %v2040_v8, %v6306_v3  ;;  %v9093_v28 = vand.u32 2147483647, %v6300_v30 }
 0x160   : > { %9203 = vst [vmem:[#allocation16_spill] sm:$0xff] %v6347_v16  ;;  %v5183_v20 = vadd.s32 4294967169, %v1882_v61  ;;  %vm9168_vm8 = vcmp.lt.s32.totalorder %v6330_v48, 4  ;;  %v1592_v45 = vshll.u32 %v9110_v46, %v6312_v23  ;;  %v5181_v11 = vadd.s32 4294967294, %v1842_v55 }
 0x161   : > { %v2042_v25 = vadd.s32 %v2041_v54, %v2037_v1  ;;  %v6355_v4 = vor.u32 %v1489_v32, %v1488_v5  ;;  %v1493_v2 = vor.u32 %v1492_v6, %v1491_v13  ;;  %v1593_v42 = vshrl.u32 %v9123_v50, %v6339_v31 }
 0x162   : > { %v1888_v38 = vadd.s32 1, %v5183_v20  ;;  %v6361_v3 = vshll.u32 %v9123_v50, %v6312_v23  ;;  %v6365_v58 = vshrl.u32 %v9096_v0, %v6339_v31  ;;  %v1742_v8 = vsub.s32 32, %v6332_v49 }
 0x163   : > { %9204 = vst [vmem:[#allocation17_spill] sm:$0xff] %v6355_v4  ;;  %v2043_v61 = vadd.s32 536870912, %v2042_v25  ;;  %vm9167_vm9 = vcmp.lt.s32.totalorder %v6347_v16, 4  ;;  %v1747_v55 = vadd.s32 127, %v1746_v44  ;;  %v1885_v32 = vand.u32 8388607, %v9093_v28 }
 0x164   : > { %vm1889_vm10 = vcmp.gt.s32.totalorder %v1888_v38, 0  ;;  %v1726_v6 = vadd.s32 %v6197_v7, %v6208_v47  ;;  %vm5182_vm11 = vcmp.lt.s32.totalorder %v5181_v11, 0  ;;  %v6378_v1 = vsel %vm9168_vm8, %v6355_v4, 920167782 }
 0x165   : > { %v6373_v5 = vshrl.u32 %v2043_v61, 30  ;;  %v1890_v13 = vsel %vm1889_vm10, %v1888_v38, 0  ;;  %9205 = vst [vmem:[#allocation18_spill] sm:$0xff] %v6378_v1  ;;  %v6382_v54 = vsel %vm9168_vm8, %v1493_v2, 1326507024  ;;  %v6384_v44 = vor.u32 %v1593_v42, %v1592_v45 }
 0x166   : > { %9206 = vst [vmem:[#allocation19_spill] sm:$0xff] %v6382_v54  ;;  %v1892_v20 = vand.u32 31, %v1890_v13  ;;  %v1597_v28 = vor.u32 %v6365_v58, %v6361_v3  ;;  %v1743_v7 = vshll.u32 %v6249_v63, %v6332_v49  ;;  %v1744_v47 = vshrl.u32 %v1726_v6, %v1742_v8 }
 0x167   : > { %9207 = vst [vmem:[#allocation20_spill] sm:$0xff] %v6384_v44  ;;  %v2045_v38 = vshll.u32 %v6373_v5, 30  ;;  %v1748_v61 = vshll.u32 %v1747_v55, 23  ;;  %v6391_v18 = vsel %vm5182_vm11, 0, %v5181_v11  ;;  %v1886_v62 = vor.u32 8388608, %v1885_v32  ;;  %v1106_v32 = vpop.permute.xlu0 %1105 }
 0x168   : > { %v1893_v60 = vsub.s32 32, %v1892_v20  ;;  %v1891_v2 = vshrl.u32 %v1890_v13, 5  ;;  %v1895_v45 = vshll.u32 %v9098_v34, %v1892_v20  ;;  %v1297_v42 = vrot.slane %v1218_v56, %v6051_v10 }
 0x169   : > { %v6393_v0 = vsub.s32 %v2042_v25, %v2045_v38  ;;  %v1898_v58 = vshll.u32 %v9100_v36, %v1892_v20  ;;  %v1901_v8 = vshll.u32 %v9108_v43, %v1892_v20  ;;  %v1904_v25 = vshll.u32 %v9110_v46, %v1892_v20 }
 0x16a   : > { %v1896_v3 = vshrl.u32 %v9100_v36, %v1893_v60  ;;  %v1899_v63 = vshrl.u32 %v9108_v43, %v1893_v60  ;;  %v1902_v49 = vshrl.u32 %v9110_v46, %v1893_v60  ;;  %v1905_v55 = vshrl.u32 %v9123_v50, %v1893_v60 }
 0x16b   : > { %v2048_v11 = vsub.s32 0, %v6393_v0  ;;  %v1907_v56 = vshll.u32 %v9123_v50, %v1892_v20  ;;  %v9208_v38 = vmov 1326507024   ;;  %v6410_v36 = vsel %vm9167_vm9, %v6384_v44, 920167782 }
 0x16c   : > { %v1897_v6 = vor.u32 %v1896_v3, %v1895_v45  ;;  %v1900_v13 = vor.u32 %v1899_v63, %v1898_v58  ;;  %v1908_v34 = vshrl.u32 %v9208_v38, %v1893_v60  ;;  %9209 = vst [vmem:[#allocation21_spill] sm:$0xff] %v6410_v36  ;;  %v1745_v41 = vor.u32 %v1744_v47, %v1743_v7 }
 0x16d   : > { %v1903_v39 = vor.u32 %v1902_v49, %v1901_v8  ;;  %v1906_v37 = vor.u32 %v1905_v55, %v1904_v25  ;;  %v1749_v43 = vor.u32 4788187, %v1748_v61  ;;  %v1850_v46 = vsub.s32 4294967266, %v6391_v18  ;;  %v587_v8 = vpop.permute.xlu1 %586 }
 0x16e   : > { %v1909_v23 = vor.u32 %v1908_v34, %v1907_v56  ;;  %v1356_v31 = vmul.f32 %v1297_v42, %v1106_v32  ;;  %vm1910_vm12 = vcmp.lt.s32.totalorder %v1891_v2, 1  ;;  %vm1913_vm13 = vcmp.lt.s32.totalorder %v1891_v2, 4 }
 0x16f   : > { %v1926_v45 = vshll.u32 %v1886_v62, 8  ;;  %v9210_v20 = vcombine.high %v6268_v24, %v6268_v24  ;;  %v5188_v58 = vmin.u32 %v2048_v11, %v6393_v0  ;;  %vm1912_vm14 = vcmp.lt.s32.totalorder %v1891_v2, 3 }
 0x170   : > { %v1918_v7 = vsel %vm1910_vm12, %v1897_v6, %v1900_v13  ;;  %v1919_v47 = vsel %vm1913_vm13, %v1906_v37, 920167782  ;;  %vm1911_vm15 = vcmp.lt.s32.totalorder %v1891_v2, 2  ;;  %v1915_v61 = vsel %vm1913_vm13, %v1903_v39, 2102212464 }
 0x171   : > { %v1393_v3 = vrot.slane %v9210_v20, %v6051_v10  ;;  %v1920_v63 = vsel %vm1912_vm14, %v1903_v39, %v1919_v47  ;;  %v1922_v34 = vsel %vm1910_vm12, %v1900_v13, %v1903_v39  ;;  %vm1672_vm0 = vcmp.lt.s32.totalorder %v6136_v51, 0 }
 0x172   : > { %v9211_v62 = vmov 683565275   ;;  %v1921_v49 = vsel %vm1911_vm15, %v1918_v7, %v1920_v63  ;;  %v1923_v24 = vsel %vm1913_vm13, %v1909_v23, 1326507024  ;;  %v6428_v11 = vsel %vm9167_vm9, %v1597_v28, 1326507024 }
 0x173   : > { %v1894_v42 = vshrl.u32 %v9211_v62, %v1893_v60  ;;  %v6424_v25 = vadd.f32 %v1393_v3, %v1356_v31  ;;  %9213 = vst [vmem:[#allocation23_spill] sm:$0xff] %v6428_v11  ;;  %v1924_v55 = vsel %vm1912_vm14, %v1906_v37, %v1923_v24  ;;  %v1750_v39 = vand.u32 2147483647, %v1749_v43 }
 0x174   : > { %v6431_v32 = vmul.u32.u64.low %v1926_v45, %v1921_v49  ;;  %v6432_v56 = vmul.u32.u64.high %v1926_v45, %v1921_v49, %v6431_v32  ;;  %v1916_v60 = vsel %vm1912_vm14, %v1900_v13, %v1915_v61  ;;  %v1925_v23 = vsel %vm1911_vm15, %v1922_v34, %v1924_v55  ;;  %v1113_v34 = vpop.permute.xlu1 %1112 }
 0x175   : > { %9212 = vst [vmem:[#allocation22_spill] sm:$0xff] %v6424_v25  ;;  %v1914_v20 = vsel %vm1910_vm12, %v1894_v42, %v1897_v6  ;;  %v1752_v7 = vcvt.s32.f32 %v1745_v41  ;;  %v1756_v31 = vsub.s32 4, %v6233_v52  ;;  %v2050_v3 = vclz %v5188_v58 }
 0x176   : > { %v1220_v28 = vcombine.high %v6163_v17, %v6163_v17  ;;  %v1851_v47 = vadd.s32 127, %v1850_v46  ;;  %v6441_v37 = vmul.u32.u64.low %v1926_v45, %v1925_v23  ;;  %v6442_v63 = vmul.u32.u64.high %v1926_v45, %v1925_v23, %v6441_v37 }
 0x177   : > { %v2089_v49 = vand.u32 2139095040, %v6424_v25  ;;  %v1221_v43 = vcombine.high %v6325_v40, %v6325_v40  ;;  %v1917_v6 = vsel %vm1911_vm15, %v1914_v20, %v1916_v60  ;;  %v1936_v13 = vadd.s32 1, %v6432_v56 }
 0x178   : > { %v9116_v41 = vand.u32 2147483647, %v6424_v25  ;;  %v1753_v61 = vmul.f32 %v1752_v7, %v1750_v39  ;;  %vm1776_vm2 = vcmp.lt.s32.totalorder %v6144_v57, 0  ;;  %v6453_v17 = vrot.slane %v6325_v40, %v6122_v22 }
 0x179   : > { %v6457_v46 = vsel %vm9162_vm1, %v6112_v12, %v587_v8  ;;  %v2090_v58 = vshrl.u32 %v2089_v49, 23  ;;  %v1846_v2 = vsub.s32 32, %v6391_v18  ;;  %v5189_v42 = vadd.s32 4294967294, %v2050_v3 }
 0x17a   : > { %v1008_v24 = vcombine.high %v6167_v19, %v6167_v19  ;;  %v1301_v55 = vrot.slane %v1220_v28, %v6051_v10  ;;  %v1852_v39 = vshll.u32 %v1851_v47, 23  ;;  %v1933_v20 = vmul.u32 %v1926_v45, %v1917_v6 }
 0x17b   : > { %vm1935_vm3 = vc.u32 %v6442_v63, %v6431_v32  ;;  %v5191_v40 = vadd.s32 4294967169, %v2090_v58  ;;  %v6468_v12 = vsel %vm1672_vm0, %v1756_v31, %v6233_v52  ;;  %v2093_v60 = vand.u32 8388607, %v9116_v41 }
 0x17c   : > { %9214 = vst [vmem:[#allocation24_spill] sm:$0xff] %v6468_v12  ;;  %v1937_v8 = vsel %vm1935_vm3, %v1936_v13, %v6432_v56  ;;  %v1357_v23 = vmul.f32 %v1301_v55, %v1113_v34  ;;  %v1830_v19 = vadd.s32 %v6242_v53, %v6239_v33  ;;  %v1860_v45 = vsub.s32 4, %v6281_v29 }
 0x17d   : > { %v1938_v7 = vadd.s32 %v1937_v8, %v1933_v20  ;;  %v2096_v3 = vadd.s32 1, %v5191_v40  ;;  %v1754_v28 = vxor.u32 2147483648, %v1753_v61  ;;  %vm5190_vm4 = vcmp.lt.s32.totalorder %v5189_v42, 0 }
 0x17e   : > { %v6478_v47 = vrot.slane %v6457_v46, %v6122_v22  ;;  %v1397_v52 = vrot.slane %v1008_v24, %v6051_v10  ;;  %v1848_v56 = vshrl.u32 %v1830_v19, %v1846_v2  ;;  %v6481_v31 = vor.u32 4788187, %v1852_v39 }
 0x17f   : > { %v1939_v37 = vadd.s32 536870912, %v1938_v7  ;;  %vm2097_vm5 = vcmp.gt.s32.totalorder %v2096_v3, 0  ;;  %v6484_v49 = vrot.slane %v1221_v43, %v6122_v22  ;;  %v2094_v33 = vor.u32 8388608, %v2093_v60 }
 0x180   : > { %v2098_v53 = vsel %vm2097_vm5, %v2096_v3, 0  ;;  %v6486_v6 = vadd.f32 %v1397_v52, %v1357_v23  ;;  %v1847_v13 = vshll.u32 %v6293_v27, %v6391_v18  ;;  %v6490_v58 = vsel %vm5190_vm4, 0, %v5189_v42 }
 0x181   : > { %v6492_v34 = vshrl.u32 %v1939_v37, 30  ;;  %v2100_v24 = vand.u32 31, %v2098_v53  ;;  %v6496_v2 = vsel %vm1672_vm0, %v1754_v28, %v1753_v61  ;;  %v6501_v43 = vsel %vm1776_vm2, %v1860_v45, %v6281_v29 }
 0x182   : > { %9215 = vst [vmem:[#allocation25_spill] sm:$0xff] %v6486_v6  ;;  %9216 = vst [vmem:[#allocation26_spill] sm:$0xff] %v6501_v43  ;;  %v6507_v18 = vrot.slane %v6478_v47, %v6122_v22  ;;  %v6509_v27 = vor.u32 %v1848_v56, %v1847_v13  ;;  %v2058_v20 = vsub.s32 4294967266, %v6490_v58  ;;  %v6514_v40 = vshll.u32 %v2094_v33, 8 }
 0x183   : > { %v1941_v39 = vshll.u32 %v6492_v34, 30  ;;  %v2101_v61 = vsub.s32 32, %v2100_v24  ;;  %v2193_v29 = vand.u32 2139095040, %v6486_v6  ;;  %v6519_v8 = vrot.slane %v6453_v17, %v6122_v22 }
 0x184   : > { %v2099_v23 = vshrl.u32 %v2098_v53, 5  ;;  %v2103_v19 = vshll.u32 %v9211_v62, %v2100_v24  ;;  %v9217_v45 = vmov 2475754826   ;;  %v9218_v52 = vmov 2131351028  }
 0x185   : > { %v6521_v60 = vsub.s32 %v1938_v7, %v1941_v39  ;;  %v2106_v3 = vshll.u32 %v9217_v45, %v2100_v24  ;;  %v2104_v28 = vshrl.u32 %v9217_v45, %v2101_v61  ;;  %v2107_v56 = vshrl.u32 %v9218_v52, %v2101_v61 }
 0x186   : > { %v2109_v37 = vshll.u32 %v9218_v52, %v2100_v24  ;;  %v9219_v33 = vmov 2102212464   ;;  %v2113_v7 = vshrl.u32 %v9123_v50, %v2101_v61  ;;  %v2115_v53 = vshll.u32 %v9123_v50, %v2100_v24 }
 0x187   : > { %v2110_v13 = vshrl.u32 %v9219_v33, %v2101_v61  ;;  %v1944_v41 = vsub.s32 0, %v6521_v60  ;;  %v2112_v55 = vshll.u32 %v9219_v33, %v2100_v24  ;;  %v2105_v39 = vor.u32 %v2104_v28, %v2103_v19 }
 0x188   : > { %v2108_v42 = vor.u32 %v2107_v56, %v2106_v3  ;;  %v2116_v12 = vshrl.u32 %v9208_v38, %v2101_v61  ;;  %v9220_v44 = vand.u32 2147483647, %v6136_v51  ;;  %v9221_v11 = vmov 0 }
 0x189   : > { %v2111_v43 = vor.u32 %v2110_v13, %v2109_v37  ;;  %v5184_v36 = vmin.u32 %v1944_v41, %v6521_v60  ;;  %v2102_v16 = vshrl.u32 %v9211_v62, %v2101_v61  ;;  %v2114_v21 = vor.u32 %v2113_v7, %v2112_v55  ;;  %v1120_v61 = vpop.permute.xlu0 %1119 }
 0x18a   : > { %vm6536_vm6 = vcmp.le.f32.partialorder %v9220_v44, 0.7853982  ;;  %v2194_v4 = vshrl.u32 %v2193_v29, 23  ;;  %v2117_v54 = vor.u32 %v2116_v12, %v2115_v53  ;;  %vm2118_vm7 = vcmp.lt.s32.totalorder %v2099_v23, 1 }
 0x18b   : > { %v9222_v11 = vsel %vm6536_vm6, 4294967295, %v9221_v11  ;;  %vm2119_vm10 = vcmp.lt.s32.totalorder %v2099_v23, 2  ;;  %vm2121_vm11 = vcmp.lt.s32.totalorder %v2099_v23, 4  ;;  %vm2120_vm12 = vcmp.lt.s32.totalorder %v2099_v23, 3 }
 0x18c   : > { %9223 = vst [vmem:[#allocation27_spill] sm:$0xff] %v9222_v11  ;;  %v2123_v24 = vsel %vm2121_vm11, %v2111_v43, 2102212464  ;;  %v2126_v19 = vsel %vm2118_vm7, %v2105_v39, %v2108_v42  ;;  %v2127_v3 = vsel %vm2121_vm11, %v2114_v21, 920167782  ;;  %v2122_v28 = vsel %vm2118_vm7, %v2102_v16, %v2105_v39 }
 0x18d   : > { %v2128_v56 = vsel %vm2120_vm12, %v2111_v43, %v2127_v3  ;;  %v2130_v44 = vsel %vm2118_vm7, %v2108_v42, %v2111_v43  ;;  %v2131_v37 = vsel %vm2121_vm11, %v2117_v54, 1326507024  ;;  %v1946_v13 = vclz %v5184_v36 }
 0x18e   : > { %v2124_v50 = vsel %vm2120_vm12, %v2108_v42, %v2123_v24  ;;  %v2129_v41 = vsel %vm2119_vm10, %v2126_v19, %v2128_v56  ;;  %v2132_v1 = vsel %vm2120_vm12, %v2114_v21, %v2131_v37  ;;  %v1305_v7 = vrot.slane %v6519_v8, %v6051_v10 }
 0x18f   : > { %v2133_v55 = vsel %vm2119_vm10, %v2130_v44, %v2132_v1  ;;  %v6545_v12 = vmul.u32.u64.low %v6514_v40, %v2129_v41  ;;  %v6546_v29 = vmul.u32.u64.high %v6514_v40, %v2129_v41, %v6545_v12  ;;  %v2054_v16 = vsub.s32 32, %v6490_v58 }
 0x190   : > { %v6553_v54 = vmul.u32.u64.low %v6514_v40, %v2133_v55  ;;  %v6554_v36 = vmul.u32.u64.high %v6514_v40, %v2133_v55, %v6553_v54  ;;  %v5195_v43 = vadd.s32 4294967169, %v2194_v4  ;;  %v1856_v21 = vcvt.s32.f32 %v6509_v27 }
 0x191   : > { %v2059_v42 = vadd.s32 127, %v2058_v20  ;;  %v2125_v1 = vsel %vm2119_vm10, %v2122_v28, %v2124_v50  ;;  %v1358_v53 = vmul.f32 %v1305_v7, %v1120_v61  ;;  %v2038_v39 = vadd.s32 %v6305_v9, %v6315_v15 }
 0x192   : > { %v5185_v24 = vadd.s32 4294967294, %v1946_v13  ;;  %v9125_v19 = vand.u32 2147483647, %v6486_v6  ;;  %v2200_v3 = vadd.s32 1, %v5195_v43  ;;  %v6565_v56 = vsel %vm6536_vm6, %v6136_v51, %v6496_v2 }
 0x193   : > { %v9224_v4 = vand.u32 2147483647, %v6481_v31  ;;  %v2144_v50 = vadd.s32 1, %v6546_v29  ;;  %v1401_v20 = vrot.slane %v6507_v18, %v6051_v10  ;;  %v2055_v9 = vshll.u32 %v6393_v0, %v6490_v58 }
 0x194   : > { %v2056_v15 = vshrl.u32 %v2038_v39, %v2054_v16  ;;  %v2141_v23 = vmul.u32 %v6514_v40, %v2125_v1  ;;  %vm2143_vm13 = vc.u32 %v6554_v36, %v6545_v12  ;;  %v2060_v2 = vshll.u32 %v2059_v42, 23 }
 0x195   : > { %v6569_v27 = vmul.f32 %v1856_v21, %v9224_v4  ;;  %v2145_v28 = vsel %vm2143_vm13, %v2144_v50, %v6546_v29  ;;  %vm2201_vm14 = vcmp.gt.s32.totalorder %v2200_v3, 0  ;;  %v6580_v31 = vadd.f32 %v1401_v20, %v1358_v53 }
 0x196   : > { %vm5186_vm15 = vcmp.lt.s32.totalorder %v5185_v24, 0  ;;  %v2146_v44 = vadd.s32 %v2145_v28, %v2141_v23  ;;  %v2197_v37 = vand.u32 8388607, %v9125_v19  ;;  %v2202_v13 = vsel %vm2201_vm14, %v2200_v3, 0 }
 0x197   : > { %9225 = vst [vmem:[#allocation28_spill] sm:$0xff] %v6580_v31  ;;  %5576 = vcosq.f32 %v6565_v56  ;;  %v2204_v40 = vand.u32 31, %v2202_v13  ;;  %v1858_v41 = vxor.u32 2147483648, %v6569_v27  ;;  %v2057_v61 = vor.u32 %v2056_v15, %v2055_v9 }
 0x198   : > { %v1934_v55 = vadd.s32 %v6431_v32, %v6442_v63  ;;  %v2147_v29 = vadd.s32 536870912, %v2146_v44  ;;  %v2061_v7 = vor.u32 4788187, %v2060_v2  ;;  %v6592_v16 = vsel %vm5186_vm15, 0, %v5185_v24 }
 0x199   : > { %v2205_v54 = vsub.s32 32, %v2204_v40  ;;  %v2297_v43 = vand.u32 2139095040, %v6580_v31  ;;  %v2198_v42 = vor.u32 8388608, %v2197_v37  ;;  %v2203_v1 = vshrl.u32 %v2202_v13, 5 }
 0x19a   : > { %v6595_v21 = vshrl.u32 %v2147_v29, 30  ;;  %v2207_v53 = vshll.u32 %v9211_v62, %v2204_v40  ;;  %v2210_v3 = vshll.u32 %v9217_v45, %v2204_v40  ;;  %v2213_v24 = vshll.u32 %v9218_v52, %v2204_v40 }
 0x19b   : > { %v2208_v39 = vshrl.u32 %v9217_v45, %v2205_v54  ;;  %v2211_v4 = vshrl.u32 %v9218_v52, %v2205_v54  ;;  %v2214_v32 = vshrl.u32 %v9219_v33, %v2205_v54  ;;  %v2216_v50 = vshll.u32 %v9219_v33, %v2204_v40 }
 0x19c   : > { %v2149_v63 = vshll.u32 %v6595_v21, 30  ;;  %v9226_v20 = vmov 920167782   ;;  %v2220_v2 = vshrl.u32 %v9208_v38, %v2205_v54  ;;  %v2298_v28 = vshrl.u32 %v2297_v43, 23 }
 0x19d   : > { %v2217_v9 = vshrl.u32 %v9226_v20, %v2205_v54  ;;  %v2209_v15 = vor.u32 %v2208_v39, %v2207_v53  ;;  %v2212_v23 = vor.u32 %v2211_v4, %v2210_v3  ;;  %v2215_v13 = vor.u32 %v2214_v32, %v2213_v24 }
 0x19e   : > { %v6607_v37 = vsub.s32 %v2146_v44, %v2149_v63  ;;  %v2219_v19 = vshll.u32 %v9226_v20, %v2204_v40  ;;  %v2062_v58 = vand.u32 2147483647, %v2061_v7  ;;  %v2064_v0 = vcvt.s32.f32 %v2057_v61 }
 0x19f   : > { %v2218_v29 = vor.u32 %v2217_v9, %v2216_v50  ;;  %v1950_v51 = vsub.s32 32, %v6592_v16  ;;  %vm2222_vm0 = vcmp.lt.s32.totalorder %v2203_v1, 1  ;;  %vm2225_vm3 = vcmp.lt.s32.totalorder %v2203_v1, 4 }
 0x1a0   : > { %v2152_v48 = vsub.s32 0, %v6607_v37  ;;  %v2221_v26 = vor.u32 %v2220_v2, %v2219_v19  ;;  %v9227_v44 = vand.u32 2147483647, %v6144_v57  ;;  %v9228_v43 = vmov 0 }
 0x1a1   : > { %v6613_v53 = vpop.eup %5576  ;;  %vm2224_vm5 = vcmp.lt.s32.totalorder %v2203_v1, 3  ;;  %v2230_v40 = vsel %vm2222_vm0, %v2209_v15, %v2212_v23  ;;  %v2231_v61 = vsel %vm2225_vm3, %v2218_v29, 920167782  ;;  %v5199_v7 = vadd.s32 4294967169, %v2298_v28 }
 0x1a2   : > { %vm6617_vm4 = vcmp.le.f32.partialorder %v9227_v44, 0.7853982  ;;  %vm2223_vm7 = vcmp.lt.s32.totalorder %v2203_v1, 2  ;;  %v2227_v39 = vsel %vm2225_vm3, %v2215_v13, 2102212464  ;;  %v2232_v19 = vsel %vm2224_vm5, %v2215_v13, %v2231_v61 }
 0x1a3   : > { %v9229_v43 = vsel %vm6617_vm4, 4294967295, %v9228_v43  ;;  %v2238_v3 = vshll.u32 %v2198_v42, 8  ;;  %v5192_v4 = vmin.u32 %v2152_v48, %v6607_v37  ;;  %v2206_v32 = vshrl.u32 %v9211_v62, %v2205_v54 }
 0x1a4   : > { %9230 = vst [vmem:[#allocation29_spill] sm:$0xff] %v9229_v43  ;;  %v2233_v63 = vsel %vm2223_vm7, %v2230_v40, %v2232_v19  ;;  %v2234_v24 = vsel %vm2222_vm0, %v2212_v23, %v2215_v13  ;;  %v1954_v50 = vsub.s32 4294967266, %v6592_v16  ;;  %v2235_v9 = vsel %vm2225_vm3, %v2221_v26, 1326507024 }
 0x1a5   : > { %v6631_v2 = vmul.u32.u64.low %v2238_v3, %v2233_v63  ;;  %v6632_v28 = vmul.u32.u64.high %v2238_v3, %v2233_v63, %v6631_v2  ;;  %v2226_v44 = vsel %vm2222_vm0, %v2206_v32, %v2209_v15  ;;  %v2228_v42 = vsel %vm2224_vm5, %v2212_v23, %v2227_v39 }
 0x1a6   : > { %v2236_v48 = vsel %vm2224_vm5, %v2218_v29, %v2235_v9  ;;  %v2304_v61 = vadd.s32 1, %v5199_v7  ;;  %v1859_v54 = vsel %vm1776_vm2, %v1858_v41, %v6569_v27  ;;  %v6641_v13 = vmul.f32 %v2064_v0, %v2062_v58 }
 0x1a7   : > { %v1952_v40 = vshrl.u32 %v1934_v55, %v1950_v51  ;;  %v2237_v26 = vsel %vm2223_vm7, %v2234_v24, %v2236_v48  ;;  %v2154_v19 = vclz %v5192_v4  ;;  %v1955_v15 = vadd.s32 127, %v1954_v50 }
 0x1a8   : > { %v6644_v63 = vmul.u32.u64.low %v2238_v3, %v2237_v26  ;;  %v6645_v11 = vmul.u32.u64.high %v2238_v3, %v2237_v26, %v6644_v63  ;;  %vm2305_vm10 = vcmp.gt.s32.totalorder %v2304_v61, 0  ;;  %v2229_v23 = vsel %vm2223_vm7, %v2226_v44, %v2228_v42 }
 0x1a9   : > { %v2248_v29 = vadd.s32 1, %v6632_v28  ;;  %v2306_v7 = vsel %vm2305_vm10, %v2304_v61, 0  ;;  %5578 = vsinq.f32 %v6565_v56  ;;  %v9231_v27 = vcombine.high %v6457_v46, %v6457_v46  ;;  %v1127_v63 = vpop.permute.xlu1 %1126 }
 0x1aa   : > { %v9232_v0 = vand.u32 2147483647, %v6580_v31  ;;  %v2308_v41 = vand.u32 31, %v2306_v7  ;;  %v6661_v55 = vsel %vm6617_vm4, %v6144_v57, %v1859_v54  ;;  %v1951_v1 = vshll.u32 %v6521_v60, %v6592_v16 }
 0x1ab   : > { %v6654_v51 = vrot.slane %v9231_v27, %v6122_v22  ;;  %v9233_v56 = vcombine.high %v6478_v47, %v6478_v47  ;;  %v9234_v46 = vcombine.high %v6453_v17, %v6453_v17  ;;  %v5193_v32 = vadd.s32 4294967294, %v2154_v19 }
 0x1ac   : > { %v2301_v58 = vand.u32 8388607, %v9232_v0  ;;  %v2245_v24 = vmul.u32 %v2238_v3, %v2229_v23  ;;  %vm2247_vm2 = vc.u32 %v6645_v11, %v6631_v2  ;;  %v2309_v50 = vsub.s32 32, %v2308_v41 }
 0x1ad   : > { %v6669_v39 = vrot.slane %v9233_v56, %v6122_v22  ;;  %v6675_v4 = vrot.slane %v9234_v46, %v6122_v22  ;;  %v2066_v60 = vxor.u32 2147483648, %v6641_v13  ;;  %v6680_v16 = vor.u32 %v1952_v40, %v1951_v1 }
 0x1ae   : > { %v1956_v9 = vshll.u32 %v1955_v15, 23  ;;  %v2249_v47 = vsel %vm2247_vm2, %v2248_v29, %v6632_v28  ;;  %v2302_v42 = vor.u32 8388608, %v2301_v58  ;;  %v2312_v48 = vshrl.u32 %v9217_v45, %v2309_v50 }
 0x1af   : > { %v2250_v44 = vadd.s32 %v2249_v47, %v2245_v24  ;;  %v2315_v17 = vshrl.u32 %v9218_v52, %v2309_v50  ;;  %v2311_v61 = vshll.u32 %v9211_v62, %v2308_v41  ;;  %v2314_v3 = vshll.u32 %v9217_v45, %v2308_v41 }
 0x1b0   : > { %v2318_v54 = vshrl.u32 %v9219_v33, %v2309_v50  ;;  %v1309_v26 = vrot.slane %v6675_v4, %v6051_v10  ;;  %vm5194_vm11 = vcmp.lt.s32.totalorder %v5193_v32, 0  ;;  %v2307_v19 = vshrl.u32 %v2306_v7, 5 }
 0x1b1   : > { %v2251_v40 = vadd.s32 536870912, %v2250_v44  ;;  %v2317_v28 = vshll.u32 %v9218_v52, %v2308_v41  ;;  %v2313_v15 = vor.u32 %v2312_v48, %v2311_v61  ;;  %v2316_v23 = vor.u32 %v2315_v17, %v2314_v3 }
 0x1b2   : > { %v2320_v29 = vshll.u32 %v9219_v33, %v2308_v41  ;;  %v2321_v27 = vshrl.u32 %v9226_v20, %v2309_v50  ;;  %vm1984_vm12 = vcmp.lt.s32.totalorder %v6201_v35, 0  ;;  %v2323_v1 = vshll.u32 %v9226_v20, %v2308_v41 }
 0x1b3   : > { %v6694_v0 = vshrl.u32 %v2251_v40, 30  ;;  %v2319_v58 = vor.u32 %v2318_v54, %v2317_v28  ;;  %v2324_v56 = vshrl.u32 %v9208_v38, %v2309_v50  ;;  %v1957_v46 = vor.u32 4788187, %v1956_v9  ;;  %v6700_v48 = vpop.eup %5578 }
 0x1b4   : > { %v2322_v7 = vor.u32 %v2321_v27, %v2320_v29  ;;  %v1405_v24 = vrot.slane %v6669_v39, %v6051_v10  ;;  %v1359_v47 = vmul.f32 %v1309_v26, %v1127_v63  ;;  %vm2326_vm13 = vcmp.lt.s32.totalorder %v2307_v19, 1 }
 0x1b5   : > { %v2253_v17 = vshll.u32 %v6694_v0, 30  ;;  %v2325_v61 = vor.u32 %v2324_v56, %v2323_v1  ;;  %v2342_v3 = vshll.u32 %v2302_v42, 8  ;;  %v9235_v40 = vand.u32 2147483647, %v6201_v35 }
 0x1b6   : > { %v9236_v54 = vmov 0  ;;  %v6710_v41 = vsel %vm5194_vm11, 0, %v5193_v32  ;;  %v2310_v9 = vshrl.u32 %v9211_v62, %v2309_v50  ;;  %vm2329_vm15 = vcmp.lt.s32.totalorder %v2307_v19, 4 }
 0x1b7   : > { %vm6705_vm14 = vcmp.le.f32.partialorder %v9235_v40, 0.7853982  ;;  %v2334_v26 = vsel %vm2326_vm13, %v2313_v15, %v2316_v23  ;;  %v6714_v28 = vsub.s32 %v2250_v44, %v2253_v17  ;;  %vm2328_vm0 = vcmp.lt.s32.totalorder %v2307_v19, 3 }
 0x1b8   : > { %v9237_v54 = vsel %vm6705_vm14, 4294967295, %v9236_v54  ;;  %v2331_v63 = vsel %vm2329_vm15, %v2319_v58, 2102212464  ;;  %v2335_v29 = vsel %vm2329_vm15, %v2322_v7, 920167782  ;;  %vm2327_vm3 = vcmp.lt.s32.totalorder %v2307_v19, 2  ;;  %v1134_v19 = vpop.permute.xlu0 %1133 }
 0x1b9   : > { %9238 = vst [vmem:[#allocation30_spill] sm:$0xff] %v9237_v54  ;;  %v2336_v42 = vsel %vm2328_vm0, %v2319_v58, %v2335_v29  ;;  %v2338_v27 = vsel %vm2326_vm13, %v2316_v23, %v2319_v58  ;;  %v6717_v1 = vadd.f32 %v1405_v24, %v1359_v47  ;;  %v2256_v56 = vsub.s32 0, %v6714_v28 }
 0x1ba   : > { %v2330_v32 = vsel %vm2326_vm13, %v2310_v9, %v2313_v15  ;;  %v2337_v50 = vsel %vm2327_vm3, %v2334_v26, %v2336_v42  ;;  %v2339_v40 = vsel %vm2329_vm15, %v2325_v61, 1326507024  ;;  %v2332_v57 = vsel %vm2328_vm0, %v2316_v23, %v2331_v63 }
 0x1bb   : > { %9239 = vst [vmem:[#allocation31_spill] sm:$0xff] %v6717_v1  ;;  %v2340_v43 = vsel %vm2328_vm0, %v2322_v7, %v2339_v40  ;;  %v6722_v44 = vmul.u32.u64.low %v2342_v3, %v2337_v50  ;;  %v6723_v17 = vmul.u32.u64.high %v2342_v3, %v2337_v50, %v6722_v44  ;;  %5580 = vcosq.f32 %v6661_v55 }
 0x1bc   : > { %v1958_v29 = vand.u32 2147483647, %v1957_v46  ;;  %v5196_v58 = vmin.u32 %v2256_v56, %v6714_v28  ;;  %v2341_v24 = vsel %vm2327_vm3, %v2338_v27, %v2340_v43  ;;  %v2067_v15 = vsel %vm1984_vm12, %v2066_v60, %v6641_v13 }
 0x1bd   : > { %v6732_v47 = vmul.u32.u64.low %v2342_v3, %v2341_v24  ;;  %v6733_v9 = vmul.u32.u64.high %v2342_v3, %v2341_v24, %v6732_v47  ;;  %v1266_v23 = vcombine.high %v6519_v8, %v6519_v8  ;;  %v1960_v7 = vcvt.s32.f32 %v6680_v16 }
 0x1be   : > { %v2162_v61 = vsub.s32 4294967266, %v6710_v41  ;;  %v2333_v46 = vsel %vm2327_vm3, %v2330_v32, %v2332_v57  ;;  %v2401_v26 = vand.u32 2139095040, %v6717_v1  ;;  %5582 = vsinq.f32 %v6661_v55 }
 0x1bf   : > { %vm1880_vm5 = vcmp.lt.s32.totalorder %v6300_v30, 0  ;;  %v2258_v13 = vclz %v5196_v58  ;;  %v2352_v60 = vadd.s32 1, %v6723_v17  ;;  %v2070_v8 = vsel %vm6705_vm14, %v6201_v35, %v2067_v15 }
 0x1c0   : > { %v1961_v16 = vmul.f32 %v1960_v7, %v1958_v29  ;;  %v2402_v63 = vshrl.u32 %v2401_v26, 23  ;;  %v1054_v57 = vcombine.high %v6507_v18, %v6507_v18  ;;  %v2158_v55 = vsub.s32 32, %v6710_v41 }
 0x1c1   : > { %v2349_v42 = vmul.u32 %v2342_v3, %v2333_v46  ;;  %vm2351_vm7 = vc.u32 %v6733_v9, %v6722_v44  ;;  %v1313_v27 = vrot.slane %v1266_v23, %v6051_v10  ;;  %v2163_v56 = vadd.s32 127, %v2162_v61 }
 0x1c2   : > { %v2353_v32 = vsel %vm2351_vm7, %v2352_v60, %v6723_v17  ;;  %v9136_v50 = vand.u32 2147483647, %v6717_v1  ;;  %v5203_v40 = vadd.s32 4294967169, %v2402_v63  ;;  %v2142_v29 = vadd.s32 %v6545_v12, %v6554_v36 }
 0x1c3   : > { %v5197_v58 = vadd.s32 4294967294, %v2258_v13  ;;  %v2354_v18 = vadd.s32 %v2353_v32, %v2349_v42  ;;  %v1360_v24 = vmul.f32 %v1313_v27, %v1134_v19  ;;  %v2068_v15 = vsub.s32 4, %v6373_v5 }
 0x1c4   : > { %5584 = vcosq.f32 %v2070_v8  ;;  %v1964_v3 = vsub.s32 4, %v6492_v34  ;;  %v2408_v47 = vadd.s32 1, %v5203_v40  ;;  %v1962_v7 = vxor.u32 2147483648, %v1961_v16 }
 0x1c5   : > { %v2160_v23 = vshrl.u32 %v2142_v29, %v2158_v55  ;;  %v2355_v61 = vadd.s32 536870912, %v2354_v18  ;;  %v1409_v17 = vrot.slane %v1054_v57, %v6051_v10  ;;  %v6762_v46 = vpop.eup %5580  ;;  %v2159_v26 = vshll.u32 %v6607_v37, %v6710_v41 }
 0x1c6   : > { %9240 = vst [vmem:[#allocation32_spill] sm:$0xff] %v6762_v46  ;;  %v2164_v12 = vshll.u32 %v2163_v56, 23  ;;  %v2405_v36 = vand.u32 8388607, %v9136_v50  ;;  %vm2409_vm10 = vcmp.gt.s32.totalorder %v2408_v47, 0  ;;  %vm5198_vm2 = vcmp.lt.s32.totalorder %v5197_v58, 0 }
 0x1c7   : > { %v6768_v13 = vshrl.u32 %v2355_v61, 30  ;;  %v2410_v60 = vsel %vm2409_vm10, %v2408_v47, 0  ;;  %v6770_v63 = vadd.f32 %v1409_v17, %v1360_v24  ;;  %v6775_v57 = vsel %vm1984_vm12, %v2068_v15, %v6373_v5 }
 0x1c8   : > { %9242 = vst [vmem:[#allocation34_spill] sm:$0xff] %v6775_v57  ;;  %5586 = vsinq.f32 %v2070_v8  ;;  %v6780_v37 = vsel %vm1880_vm5, %v1964_v3, %v6492_v34  ;;  %v2412_v41 = vand.u32 31, %v2410_v60  ;;  %v6782_v19 = vpop.eup %5582  ;;  %v1963_v55 = vsel %vm1880_vm5, %v1962_v7, %v1961_v16 }
 0x1c9   : > { %9241 = vst [vmem:[#allocation33_spill] sm:$0xff] %v6770_v63  ;;  %9243 = vst [vmem:[#allocation35_spill] sm:$0xff] %v6780_v37  ;;  %v2161_v42 = vor.u32 %v2160_v23, %v2159_v26  ;;  %v2357_v56 = vshll.u32 %v6768_v13, 30  ;;  %v2165_v32 = vor.u32 4788187, %v2164_v12  ;;  %v6788_v5 = vsel %vm5198_vm2, 0, %v5197_v58 }
 0x1ca   : > { %9244 = vst [vmem:[#allocation36_spill] sm:$0xff] %v6782_v19  ;;  %v2406_v8 = vor.u32 8388608, %v2405_v36  ;;  %v2413_v40 = vsub.s32 32, %v2412_v41  ;;  %v2411_v34 = vshrl.u32 %v2410_v60, 5  ;;  %v2415_v24 = vshll.u32 %v9211_v62, %v2412_v41 }
 0x1cb   : > { %v6790_v29 = vsub.s32 %v2354_v18, %v2357_v56  ;;  %v2505_v15 = vand.u32 2139095040, %v6770_v63  ;;  %v2418_v16 = vshll.u32 %v9217_v45, %v2412_v41  ;;  %v2421_v7 = vshll.u32 %v9218_v52, %v2412_v41 }
 0x1cc   : > { %v2416_v3 = vshrl.u32 %v9217_v45, %v2413_v40  ;;  %v2419_v47 = vshrl.u32 %v9218_v52, %v2413_v40  ;;  %v2422_v23 = vshrl.u32 %v9219_v33, %v2413_v40  ;;  %v2424_v18 = vshll.u32 %v9219_v33, %v2412_v41 }
 0x1cd   : > { %v2360_v58 = vsub.s32 0, %v6790_v29  ;;  %v2425_v61 = vshrl.u32 %v9226_v20, %v2413_v40  ;;  %v9246_v26 = vand.u32 2147483647, %v6300_v30  ;;  %v9247_v12 = vmov 0 }
 0x1ce   : > { %v6802_v17 = vpop.eup %5584  ;;  %v2168_v36 = vcvt.s32.f32 %v2161_v42  ;;  %v2417_v60 = vor.u32 %v2416_v3, %v2415_v24  ;;  %v2420_v56 = vor.u32 %v2419_v47, %v2418_v16  ;;  %v2427_v50 = vshll.u32 %v9226_v20, %v2412_v41 }
 0x1cf   : > { %9245 = vst [vmem:[#allocation37_spill] sm:$0xff] %v6802_v17  ;;  %vm6806_vm11 = vcmp.le.f32.partialorder %v9246_v26, 0.7853982  ;;  %v5200_v43 = vmin.u32 %v2360_v58, %v6790_v29  ;;  %v2423_v27 = vor.u32 %v2422_v23, %v2421_v7  ;;  %v2426_v35 = vor.u32 %v2425_v61, %v2424_v18 }
 0x1d0   : > { %v9248_v12 = vsel %vm6806_vm11, 4294967295, %v9247_v12  ;;  %v2428_v54 = vshrl.u32 %v9208_v38, %v2413_v40  ;;  %v2166_v57 = vand.u32 2147483647, %v2165_v32  ;;  %v2266_v17 = vsub.s32 4294967266, %v6788_v5 }
 0x1d1   : > { %9249 = vst [vmem:[#allocation38_spill] sm:$0xff] %v9248_v12  ;;  %v2446_v37 = vshll.u32 %v2406_v8, 8  ;;  %v2506_v46 = vshrl.u32 %v2505_v15, 23  ;;  %v2362_v26 = vclz %v5200_v43  ;;  %vm2430_vm12 = vcmp.lt.s32.totalorder %v2411_v34, 1 }
 0x1d2   : > { %v2429_v19 = vor.u32 %v2428_v54, %v2427_v50  ;;  %vm2433_vm13 = vcmp.lt.s32.totalorder %v2411_v34, 4  ;;  %v6814_v42 = vpop.eup %5586  ;;  %vm2432_vm15 = vcmp.lt.s32.totalorder %v2411_v34, 3  ;;  %v2438_v41 = vsel %vm2430_vm12, %v2417_v60, %v2420_v56 }
 0x1d3   : > { %9250 = vst [vmem:[#allocation39_spill] sm:$0xff] %v6814_v42  ;;  %v2439_v24 = vsel %vm2433_vm13, %v2426_v35, 920167782  ;;  %v2414_v16 = vshrl.u32 %v9211_v62, %v2413_v40  ;;  %vm2431_vm0 = vcmp.lt.s32.totalorder %v2411_v34, 2  ;;  %v2435_v32 = vsel %vm2433_vm13, %v2423_v27, 2102212464 }
 0x1d4   : > { %v2440_v8 = vsel %vm2432_vm15, %v2423_v27, %v2439_v24  ;;  %v2262_v54 = vsub.s32 32, %v6788_v5  ;;  %v2442_v50 = vsel %vm2430_vm12, %v2420_v56, %v2423_v27  ;;  %v5207_v15 = vadd.s32 4294967169, %v2506_v46 }
 0x1d5   : > { %v2441_v43 = vsel %vm2431_vm0, %v2438_v41, %v2440_v8  ;;  %v2267_v47 = vadd.s32 127, %v2266_v17  ;;  %v5201_v7 = vadd.s32 4294967294, %v2362_v26  ;;  %v2434_v58 = vsel %vm2430_vm12, %v2414_v16, %v2417_v60 }
 0x1d6   : > { %v2443_v23 = vsel %vm2433_vm13, %v2429_v19, 1326507024  ;;  %v2436_v40 = vsel %vm2432_vm15, %v2420_v56, %v2435_v32  ;;  %v6829_v61 = vmul.u32.u64.low %v2446_v37, %v2441_v43  ;;  %v6830_v3 = vmul.u32.u64.high %v2446_v37, %v2441_v43, %v6829_v61 }
 0x1d7   : > { %v2444_v18 = vsel %vm2432_vm15, %v2426_v35, %v2443_v23  ;;  %v6836_v41 = vsel %vm6806_vm11, %v6300_v30, %v1963_v55  ;;  %v6838_v46 = vmul.f32 %v2168_v36, %v2166_v57  ;;  %v2246_v27 = vadd.s32 %v6631_v2, %v6645_v11 }
 0x1d8   : > { %v2445_v19 = vsel %vm2431_vm0, %v2442_v50, %v2444_v18  ;;  %v2512_v35 = vadd.s32 1, %v5207_v15  ;;  %v1056_v56 = vcombine.high %v6669_v39, %v6669_v39  ;;  %vm5202_vm3 = vcmp.lt.s32.totalorder %v5201_v7, 0 }
 0x1d9   : > { %v6843_v17 = vmul.u32.u64.low %v2446_v37, %v2445_v19  ;;  %v6844_v60 = vmul.u32.u64.high %v2446_v37, %v2445_v19, %v6843_v17  ;;  %v2264_v26 = vshrl.u32 %v2246_v27, %v2262_v54  ;;  %v2437_v24 = vsel %vm2431_vm0, %v2434_v58, %v2436_v40  ;;  %v1141_v19 = vpop.permute.xlu1 %1140 }
 0x1da   : > { %v1268_v57 = vcombine.high %v6675_v4, %v6675_v4  ;;  %v2268_v55 = vshll.u32 %v2267_v47, 23  ;;  %v2456_v36 = vadd.s32 1, %v6830_v3  ;;  %v9251_v11 = vand.u32 2147483647, %v6770_v63 }
 0x1db   : > { %vm2513_vm5 = vcmp.gt.s32.totalorder %v2512_v35, 0  ;;  %v2263_v32 = vshll.u32 %v6714_v28, %v6788_v5  ;;  %v6859_v39 = vadd.s32 %v6722_v44, %v6733_v9  ;;  %v6861_v8 = vsel %vm5202_vm3, 0, %v5201_v7 }
 0x1dc   : > { %v2509_v2 = vand.u32 8388607, %v9251_v11  ;;  %v2514_v34 = vsel %vm2513_vm5, %v2512_v35, 0  ;;  %v2453_v4 = vmul.u32 %v2446_v37, %v2437_v24  ;;  %vm2455_vm7 = vc.u32 %v6844_v60, %v6829_v61 }
 0x1dd   : > { %v2516_v54 = vand.u32 31, %v2514_v34  ;;  %v2265_v43 = vor.u32 %v2264_v26, %v2263_v32  ;;  %v2457_v50 = vsel %vm2455_vm7, %v2456_v36, %v6830_v3  ;;  %v1413_v15 = vrot.slane %v1056_v56, %v6051_v10 }
 0x1de   : > { %v1317_v47 = vrot.slane %v1268_v57, %v6051_v10  ;;  %v2269_v28 = vor.u32 4788187, %v2268_v55  ;;  %v2458_v5 = vadd.s32 %v2457_v50, %v2453_v4  ;;  %v2510_v58 = vor.u32 8388608, %v2509_v2 }
 0x1df   : > { %v2517_v44 = vsub.s32 32, %v2516_v54  ;;  %v2370_v9 = vsub.s32 4294967266, %v6861_v8  ;;  %v2515_v7 = vshrl.u32 %v2514_v34, 5  ;;  %v2519_v37 = vshll.u32 %v9211_v62, %v2516_v54 }
 0x1e0   : > { %v2522_v23 = vshll.u32 %v9217_v45, %v2516_v54  ;;  %v2459_v40 = vadd.s32 536870912, %v2458_v5  ;;  %v2525_v27 = vshll.u32 %v9218_v52, %v2516_v54  ;;  %v2528_v35 = vshll.u32 %v9219_v33, %v2516_v54 }
 0x1e1   : > { %v2520_v18 = vshrl.u32 %v9217_v45, %v2517_v44  ;;  %v2523_v3 = vshrl.u32 %v9218_v52, %v2517_v44  ;;  %v2526_v17 = vshrl.u32 %v9219_v33, %v2517_v44  ;;  %v2529_v56 = vshrl.u32 %v9226_v20, %v2517_v44 }
 0x1e2   : > { %v2532_v26 = vshrl.u32 %v9208_v38, %v2517_v44  ;;  %v2272_v24 = vcvt.s32.f32 %v2265_v43  ;;  %v6878_v57 = vshrl.u32 %v2459_v40, 30  ;;  %v2531_v32 = vshll.u32 %v9226_v20, %v2516_v54 }
 0x1e3   : > { %v2521_v55 = vor.u32 %v2520_v18, %v2519_v37  ;;  %v2524_v36 = vor.u32 %v2523_v3, %v2522_v23  ;;  %v2527_v11 = vor.u32 %v2526_v17, %v2525_v27  ;;  %v2530_v2 = vor.u32 %v2529_v56, %v2528_v35 }
 0x1e4   : > { %v1361_v34 = vmul.f32 %v1317_v47, %v1141_v19  ;;  %vm2088_vm10 = vcmp.lt.s32.totalorder %v6424_v25, 0  ;;  %v2270_v4 = vand.u32 2147483647, %v2269_v28  ;;  %v2366_v50 = vsub.s32 32, %v6861_v8 }
 0x1e5   : > { %v2461_v16 = vshll.u32 %v6878_v57, 30  ;;  %v2550_v30 = vshll.u32 %v2510_v58, 8  ;;  %v2371_v42 = vadd.s32 127, %v2370_v9  ;;  %v2533_v12 = vor.u32 %v2532_v26, %v2531_v32 }
 0x1e6   : > { %vm2534_vm2 = vcmp.lt.s32.totalorder %v2515_v7, 1  ;;  %vm2537_vm12 = vcmp.lt.s32.totalorder %v2515_v7, 4  ;;  %v6889_v54 = vrot.slane %v6484_v49, %v6122_v22  ;;  %v2518_v47 = vshrl.u32 %v9211_v62, %v2517_v44 }
 0x1e7   : > { %v6884_v43 = vsub.s32 %v2458_v5, %v2461_v16  ;;  %v2539_v37 = vsel %vm2537_vm12, %v2527_v11, 2102212464  ;;  %v2542_v23 = vsel %vm2534_vm2, %v2521_v55, %v2524_v36  ;;  %vm2536_vm13 = vcmp.lt.s32.totalorder %v2515_v7, 3 }
 0x1e8   : > { %v2543_v28 = vsel %vm2537_vm12, %v2530_v2, 920167782  ;;  %v6893_v40 = vadd.f32 %v1413_v15, %v1361_v34  ;;  %vm2535_vm15 = vcmp.lt.s32.totalorder %v2515_v7, 2  ;;  %v2546_v16 = vsel %vm2534_vm2, %v2524_v36, %v2527_v11 }
 0x1e9   : > { %v2464_v58 = vsub.s32 0, %v6884_v43  ;;  %v2544_v9 = vsel %vm2536_vm13, %v2527_v11, %v2543_v28  ;;  %v2538_v5 = vsel %vm2534_vm2, %v2518_v47, %v2521_v55  ;;  %v2540_v18 = vsel %vm2536_vm13, %v2524_v36, %v2539_v37 }
 0x1ea   : > { %v2545_v3 = vsel %vm2535_vm15, %v2542_v23, %v2544_v9  ;;  %v2547_v27 = vsel %vm2537_vm12, %v2533_v12, 1326507024  ;;  %v9252_v19 = vand.u32 2147483647, %v6424_v25  ;;  %v9253_v44 = vmov 0 }
 0x1eb   : > { %vm2192_vm3 = vcmp.lt.s32.totalorder %v6486_v6, 0  ;;  %v5204_v15 = vmin.u32 %v2464_v58, %v6884_v43  ;;  %v2548_v17 = vsel %vm2536_vm13, %v2530_v2, %v2547_v27  ;;  %v2273_v26 = vmul.f32 %v2272_v24, %v2270_v4  ;;  %v1148_v4 = vpop.permute.xlu0 %1147 }
 0x1ec   : > { %vm6900_vm0 = vcmp.le.f32.partialorder %v9252_v19, 0.7853982  ;;  %v6906_v35 = vmul.u32.u64.low %v2550_v30, %v2545_v3  ;;  %v6907_v56 = vmul.u32.u64.high %v2550_v30, %v2545_v3, %v6906_v35  ;;  %v2372_v55 = vshll.u32 %v2371_v42, 23 }
 0x1ed   : > { %v9254_v44 = vsel %vm6900_vm0, 4294967295, %v9253_v44  ;;  %v2549_v36 = vsel %vm2535_vm15, %v2546_v16, %v2548_v17  ;;  %v2609_v12 = vand.u32 2139095040, %v6893_v40  ;;  %5588 = vcosq.f32 %v6836_v41 }
 0x1ee   : > { %9255 = vst [vmem:[#allocation40_spill] sm:$0xff] %v9254_v44  ;;  %v2466_v11 = vclz %v5204_v15  ;;  %v6913_v32 = vmul.u32.u64.low %v2550_v30, %v2549_v36  ;;  %v6914_v34 = vmul.u32.u64.high %v2550_v30, %v2549_v36, %v6913_v32  ;;  %v9256_v37 = vxor.u32 2147483648, %v6838_v46 }
 0x1ef   : > { %v2368_v23 = vshrl.u32 %v6859_v39, %v2366_v50  ;;  %v2541_v42 = vsel %vm2535_vm15, %v2538_v5, %v2540_v18  ;;  %v2610_v24 = vshrl.u32 %v2609_v12, 23  ;;  %v9257_v47 = vand.u32 2147483647, %v6486_v6 }
 0x1f0   : > { %v2171_v2 = vsel %vm2088_vm10, %v9256_v37, %v6838_v46  ;;  %v9258_v28 = vmov 0  ;;  %v5205_v58 = vadd.s32 4294967294, %v2466_v11  ;;  %v2560_v9 = vadd.s32 1, %v6907_v56 }
 0x1f1   : > { %vm6925_vm5 = vcmp.le.f32.partialorder %v9257_v47, 0.7853982  ;;  %v6932_v16 = vrot.slane %v6654_v51, %v6122_v22  ;;  %v1321_v46 = vrot.slane %v6889_v54, %v6051_v10  ;;  %v2274_v39 = vxor.u32 2147483648, %v2273_v26 }
 0x1f2   : > { %v9259_v28 = vsel %vm6925_vm5, 4294967295, %v9258_v28  ;;  %v2367_v7 = vshll.u32 %v6790_v29, %v6861_v8  ;;  %v2373_v50 = vor.u32 4788187, %v2372_v55  ;;  %v5211_v5 = vadd.s32 4294967169, %v2610_v24 }
 0x1f3   : > { %9260 = vst [vmem:[#allocation41_spill] sm:$0xff] %v9259_v28  ;;  %vm5206_vm7 = vcmp.lt.s32.totalorder %v5205_v58, 0  ;;  %v2557_v18 = vmul.u32 %v2550_v30, %v2541_v42  ;;  %vm2559_vm2 = vc.u32 %v6914_v34, %v6906_v35  ;;  %v1362_v3 = vmul.f32 %v1321_v46, %v1148_v4 }
 0x1f4   : > { %v2369_v27 = vor.u32 %v2368_v23, %v2367_v7  ;;  %v6940_v19 = vsel %vm5206_vm7, 0, %v5205_v58  ;;  %v2561_v15 = vsel %vm2559_vm2, %v2560_v9, %v6907_v56  ;;  %v2616_v17 = vadd.s32 1, %v5211_v5 }
 0x1f5   : > { %v2276_v36 = vsub.s32 4, %v6694_v0  ;;  %v2562_v12 = vadd.s32 %v2561_v15, %v2557_v18  ;;  %v9146_v11 = vand.u32 2147483647, %v6893_v40  ;;  %v1417_v29 = vrot.slane %v6932_v16, %v6051_v10 }
 0x1f6   : > { %v6950_v30 = vsel %vm6900_vm0, %v6424_v25, %v2171_v2  ;;  %v2275_v8 = vsel %vm2192_vm3, %v2274_v39, %v2273_v26  ;;  %v2374_v55 = vand.u32 2147483647, %v2373_v50  ;;  %vm2617_vm12 = vcmp.gt.s32.totalorder %v2616_v17, 0 }
 0x1f7   : > { %v2474_v56 = vsub.s32 4294967266, %v6940_v19  ;;  %v2563_v32 = vadd.s32 536870912, %v2562_v12  ;;  %v2618_v37 = vsel %vm2617_vm12, %v2616_v17, 0  ;;  %v6955_v23 = vadd.f32 %v1417_v29, %v1362_v3  ;;  %v6965_v26 = vpop.eup %5588 }
 0x1f8   : > { %5590 = vsinq.f32 %v6836_v41  ;;  %v9261_v42 = vsub.s32 4, %v6595_v21  ;;  %v2376_v24 = vcvt.s32.f32 %v2369_v27  ;;  %v2620_v4 = vand.u32 31, %v2618_v37 }
 0x1f9   : > { %5592 = vcosq.f32 %v6950_v30  ;;  %v6971_v47 = vsel %vm2192_vm3, %v2276_v36, %v6694_v0  ;;  %v6973_v58 = vshrl.u32 %v2563_v32, 30  ;;  %v2613_v41 = vand.u32 8388607, %v9146_v11 }
 0x1fa   : > { %v6963_v2 = vsel %vm2088_vm10, %v9261_v42, %v6595_v21  ;;  %9263 = vst [vmem:[#allocation43_spill] sm:$0xff] %v6971_v47  ;;  %v5558_v21 = vld [vmem:[%s9079_s4] sm:$0xff]   ;;  %v6983_v9 = vsel %vm6925_vm5, %v6486_v6, %v2275_v8  ;;  %v6985_v46 = vmul.f32 %v2376_v24, %v2374_v55  ;;  %v2454_v0 = vadd.s32 %v6829_v61, %v6844_v60  ;;  %v5559_v8 = vld [vmem:[%s9079_s4 + $0x8] sm:$0xff]  }
 0x1fb   : > { %9262 = vst [vmem:[#allocation42_spill] sm:$0xff] %v6963_v2  ;;  %v2621_v39 = vsub.s32 32, %v2620_v4  ;;  %v2475_v7 = vadd.s32 127, %v2474_v56  ;;  %v2565_v50 = vshll.u32 %v6973_v58, 30  ;;  %v2623_v5 = vshll.u32 %v9211_v62, %v2620_v4  ;;  %5345 = vmatprep.subr.bf16.mxu1 %v5558_v21 }
 0x1fc   : > { %v2713_v18 = vand.u32 2139095040, %v6955_v23  ;;  %v2626_v27 = vshll.u32 %v9217_v45, %v2620_v4  ;;  %5346 = vmatpush3.bf16.msra.mxu1 %v5558_v21  ;;  %v2614_v61 = vor.u32 8388608, %v2613_v41  ;;  %v2619_v60 = vshrl.u32 %v2618_v37, 5 }
 0x1fd   : > { %v2624_v3 = vshrl.u32 %v9217_v45, %v2621_v39  ;;  %v2627_v15 = vshrl.u32 %v9218_v52, %v2621_v39  ;;  %v2630_v17 = vshrl.u32 %v9219_v33, %v2621_v39  ;;  %v6996_v36 = vsub.s32 %v2562_v12, %v2565_v50  ;;  %5347 = vmatprep.subr.bf16.mxu1 %v5559_v8 }
 0x1fe   : > { %v2629_v29 = vshll.u32 %v9218_v52, %v2620_v4  ;;  %v2632_v32 = vshll.u32 %v9219_v33, %v2620_v4  ;;  %v2633_v42 = vshrl.u32 %v9226_v20, %v2621_v39  ;;  %v2635_v12 = vshll.u32 %v9226_v20, %v2620_v4 }
 0x1ff   : > { %v2625_v55 = vor.u32 %v2624_v3, %v2623_v5  ;;  %v2628_v56 = vor.u32 %v2627_v15, %v2626_v27  ;;  %v2568_v24 = vsub.s32 0, %v6996_v36  ;;  %v2636_v41 = vshrl.u32 %v9208_v38, %v2621_v39  ;;  %v5560_v27 = vld [vmem:[%s9079_s4 + $0x10] sm:$0xff]  }
 0x200   : > { %v2631_v11 = vor.u32 %v2630_v17, %v2629_v29  ;;  %v2470_v37 = vsub.s32 32, %v6940_v19  ;;  %v2476_v21 = vshll.u32 %v2475_v7, 23  ;;  %v2634_v50 = vor.u32 %v2633_v42, %v2632_v32  ;;  %5348 = vmatpush3.bf16.msra.mxu1 %v5559_v8 }
 0x201   : > { %v2714_v6 = vshrl.u32 %v2713_v18, 23  ;;  %v5208_v5 = vmin.u32 %v2568_v24, %v6996_v36  ;;  %v2637_v3 = vor.u32 %v2636_v41, %v2635_v12  ;;  %vm2638_vm10 = vcmp.lt.s32.totalorder %v2619_v60, 1  ;;  %5349 = vmatprep.subr.bf16.mxu1 %v5560_v27 }
 0x202   : > { %vm2641_vm13 = vcmp.lt.s32.totalorder %v2619_v60, 4  ;;  %v7012_v15 = vpop.eup %5590  ;;  %v2622_v4 = vshrl.u32 %v9211_v62, %v2621_v39  ;;  %vm2640_vm15 = vcmp.lt.s32.totalorder %v2619_v60, 3  ;;  %v2646_v17 = vsel %vm2638_vm10, %v2625_v55, %v2628_v56 }
 0x203   : > { %v2647_v7 = vsel %vm2641_vm13, %v2634_v50, 920167782  ;;  %v7017_v18 = vpop.eup %5592  ;;  %v2570_v29 = vclz %v5208_v5  ;;  %vm2639_vm3 = vcmp.lt.s32.totalorder %v2619_v60, 2  ;;  %v2643_v8 = vsel %vm2641_vm13, %v2631_v11, 2102212464 }
 0x204   : > { %9264 = vst [vmem:[#allocation44_spill] sm:$0xff] %v7017_v18  ;;  %v2648_v32 = vsel %vm2640_vm15, %v2631_v11, %v2647_v7  ;;  %vm2296_vm7 = vcmp.lt.s32.totalorder %v6580_v31, 0  ;;  %v2650_v39 = vsel %vm2638_vm10, %v2628_v56, %v2631_v11  ;;  %v2654_v24 = vshll.u32 %v2614_v61, 8  ;;  %5350 = vmatpush3.bf16.msra.mxu1 %v5560_v27 }
 0x205   : > { %v2649_v42 = vsel %vm2639_vm3, %v2646_v17, %v2648_v32  ;;  %v1237_v12 = vcombine.high %v6484_v49, %v6484_v49  ;;  %v2471_v41 = vshll.u32 %v6884_v43, %v6940_v19  ;;  %v2472_v5 = vshrl.u32 %v2454_v0, %v2470_v37 }
 0x206   : > { %v2642_v25 = vsel %vm2638_vm10, %v2622_v4, %v2625_v55  ;;  %v2651_v7 = vsel %vm2641_vm13, %v2637_v3, 1326507024  ;;  %v2644_v18 = vsel %vm2640_vm15, %v2628_v56, %v2643_v8  ;;  %v2477_v11 = vor.u32 4788187, %v2476_v21  ;;  %v1155_v8 = vpop.permute.xlu1 %1154 }
 0x207   : > { %v2652_v28 = vsel %vm2640_vm15, %v2634_v50, %v2651_v7  ;;  %v7032_v17 = vmul.u32.u64.low %v2654_v24, %v2649_v42  ;;  %v7033_v32 = vmul.u32.u64.high %v2654_v24, %v2649_v42, %v7032_v17  ;;  %v5209_v61 = vadd.s32 4294967294, %v2570_v29 }
 0x208   : > { %v2653_v49 = vsel %vm2639_vm3, %v2650_v39, %v2652_v28  ;;  %v5215_v27 = vadd.s32 4294967169, %v2714_v6  ;;  %v9153_v19 = vand.u32 2147483647, %v6955_v23  ;;  %v9265_v0 = vcombine.high %v6654_v51, %v6654_v51 }
 0x209   : > { %v7037_v47 = vmul.u32.u64.low %v2654_v24, %v2653_v49  ;;  %v7038_v43 = vmul.u32.u64.high %v2654_v24, %v2653_v49, %v7037_v47  ;;  %v2378_v56 = vxor.u32 2147483648, %v6985_v46  ;;  %v2473_v37 = vor.u32 %v2472_v5, %v2471_v41 }
 0x20a   : > { %v7045_v55 = vrot.slane %v9265_v0, %v6122_v22  ;;  %v2645_v21 = vsel %vm2639_vm3, %v2642_v25, %v2644_v18  ;;  %v2720_v50 = vadd.s32 1, %v5215_v27  ;;  %5594 = vsinq.f32 %v6950_v30 }
 0x20b   : > { %v2664_v28 = vadd.s32 1, %v7033_v32  ;;  %v7053_v47 = vrot.slane %v1237_v12, %v6122_v22  ;;  %5596 = vcosq.f32 %v6983_v9  ;;  %v2478_v51 = vand.u32 2147483647, %v2477_v11 }
 0x20c   : > { %vm5210_vm2 = vcmp.lt.s32.totalorder %v5209_v61, 0  ;;  %vm2721_vm12 = vcmp.gt.s32.totalorder %v2720_v50, 0  ;;  %v2661_v3 = vmul.u32 %v2654_v24, %v2645_v21  ;;  %vm2663_vm10 = vc.u32 %v7038_v43, %v7032_v17 }
 0x20d   : > { %v2717_v25 = vand.u32 8388607, %v9153_v19  ;;  %v2722_v30 = vsel %vm2721_vm12, %v2720_v50, 0  ;;  %v7063_v60 = vsel %vm2296_vm7, %v2378_v56, %v6985_v46  ;;  %v2480_v4 = vcvt.s32.f32 %v2473_v37 }
 0x20e   : > { %v2665_v18 = vsel %vm2663_vm10, %v2664_v28, %v7033_v32  ;;  %v1421_v29 = vrot.slane %v7045_v55, %v6051_v10  ;;  %v7068_v42 = vsel %vm5210_vm2, 0, %v5209_v61  ;;  %v2724_v24 = vand.u32 31, %v2722_v30 }
 0x20f   : > { %v2666_v39 = vadd.s32 %v2665_v18, %v2661_v3  ;;  %v1325_v12 = vrot.slane %v7053_v47, %v6051_v10  ;;  %v7072_v41 = vmul.f32 %v2480_v4, %v2478_v51  ;;  %v2558_v46 = vadd.s32 %v6906_v35, %v6914_v34 }
 0x210   : > { %v1267_v7 = vcombine.high %v6889_v54, %v6889_v54  ;;  %v2718_v11 = vor.u32 8388608, %v2717_v25  ;;  %v2725_v61 = vsub.s32 32, %v2724_v24  ;;  %v2578_v27 = vsub.s32 4294967266, %v7068_v42 }
 0x211   : > { %v2667_v32 = vadd.s32 536870912, %v2666_v39  ;;  %v1363_v49 = vmul.f32 %v1325_v12, %v1155_v8  ;;  %v2723_v0 = vshrl.u32 %v2722_v30, 5  ;;  %v2727_v56 = vshll.u32 %v9211_v62, %v2724_v24 }
 0x212   : > { %v2730_v37 = vshll.u32 %v9217_v45, %v2724_v24  ;;  %v2728_v35 = vshrl.u32 %v9217_v45, %v2725_v61  ;;  %v2731_v34 = vshrl.u32 %v9218_v52, %v2725_v61  ;;  %v2733_v50 = vshll.u32 %v9218_v52, %v2724_v24 }
 0x213   : > { %v7083_v21 = vshrl.u32 %v2667_v32, 30  ;;  %v2734_v54 = vshrl.u32 %v9219_v33, %v2725_v61  ;;  %v2736_v28 = vshll.u32 %v9219_v33, %v2724_v24  ;;  %v2737_v51 = vshrl.u32 %v9226_v20, %v2725_v61 }
 0x214   : > { %v2740_v3 = vshrl.u32 %v9208_v38, %v2725_v61  ;;  %v7092_v25 = vpop.eup %5594  ;;  %v2729_v4 = vor.u32 %v2728_v35, %v2727_v56  ;;  %v2732_v18 = vor.u32 %v2731_v34, %v2730_v37  ;;  %v2739_v8 = vshll.u32 %v9226_v20, %v2724_v24 }
 0x215   : > { %9266 = vst [vmem:[#allocation45_spill] sm:$0xff] %v7092_v25  ;;  %v2669_v30 = vshll.u32 %v7083_v21, 30  ;;  %v7096_v12 = vpop.eup %5596  ;;  %v2574_v32 = vsub.s32 32, %v7068_v42  ;;  %v2579_v19 = vadd.s32 127, %v2578_v27  ;;  %v2735_v6 = vor.u32 %v2734_v54, %v2733_v50 }
 0x216   : > { %v2738_v5 = vor.u32 %v2737_v51, %v2736_v28  ;;  %v2741_v44 = vor.u32 %v2740_v3, %v2739_v8  ;;  %vm2742_vm13 = vcmp.lt.s32.totalorder %v2723_v0, 1  ;;  %v2758_v2 = vshll.u32 %v2718_v11, 8 }
 0x217   : > { %v7099_v22 = vsub.s32 %v2666_v39, %v2669_v30  ;;  %v2726_v25 = vshrl.u32 %v9211_v62, %v2725_v61  ;;  %vm2745_vm15 = vcmp.lt.s32.totalorder %v2723_v0, 4  ;;  %v2750_v56 = vsel %vm2742_vm13, %v2729_v4, %v2732_v18 }
 0x218   : > { %v7103_v37 = vadd.f32 %v1421_v29, %v1363_v49  ;;  %v9267_v24 = vand.u32 2147483647, %v6580_v31  ;;  %vm2744_vm2 = vcmp.lt.s32.totalorder %v2723_v0, 3  ;;  %v2747_v39 = vsel %vm2745_vm15, %v2735_v6, 2102212464 }
 0x219   : > { %v2672_v27 = vsub.s32 0, %v7099_v22  ;;  %v2751_v11 = vsel %vm2745_vm15, %v2738_v5, 920167782  ;;  %vm2400_vm12 = vcmp.lt.s32.totalorder %v6717_v1, 0  ;;  %v2580_v61 = vshll.u32 %v2579_v19, 23 }
 0x21a   : > { %vm7107_vm3 = vcmp.le.f32.partialorder %v9267_v24, 0.7853982  ;;  %vm2743_vm10 = vcmp.lt.s32.totalorder %v2723_v0, 2  ;;  %v2752_v34 = vsel %vm2744_vm2, %v2735_v6, %v2751_v11  ;;  %v2754_v29 = vsel %vm2742_vm13, %v2732_v18, %v2735_v6  ;;  %v1162_v24 = vpop.permute.xlu0 %1161 }
 0x21b   : > { %v5212_v49 = vmin.u32 %v2672_v27, %v7099_v22  ;;  %v2746_v50 = vsel %vm2742_vm13, %v2726_v25, %v2729_v4  ;;  %v2753_v54 = vsel %vm2743_vm10, %v2750_v56, %v2752_v34  ;;  %v2755_v28 = vsel %vm2745_vm15, %v2741_v44, 1326507024 }
 0x21c   : > { %v2748_v51 = vsel %vm2744_vm2, %v2732_v18, %v2747_v39  ;;  %v2756_v3 = vsel %vm2744_vm2, %v2738_v5, %v2755_v28  ;;  %v7120_v30 = vmul.u32.u64.low %v2758_v2, %v2753_v54  ;;  %v7121_v8 = vmul.u32.u64.high %v2758_v2, %v2753_v54, %v7120_v30 }
 0x21d   : > { %v2674_v19 = vclz %v5212_v49  ;;  %v2757_v11 = vsel %vm2743_vm10, %v2754_v29, %v2756_v3  ;;  %v2817_v6 = vand.u32 2139095040, %v7103_v37  ;;  %v1329_v27 = vrot.slane %v1267_v7, %v6051_v10 }
 0x21e   : > { %v9270_v25 = vand.u32 2147483647, %v6717_v1  ;;  %v9271_v4 = vmov 0  ;;  %v2482_v44 = vxor.u32 2147483648, %v7072_v41  ;;  %v2576_v5 = vshrl.u32 %v2558_v46, %v2574_v32 }
 0x21f   : > { %v7134_v18 = vmul.u32.u64.low %v2758_v2, %v2757_v11  ;;  %v7135_v56 = vmul.u32.u64.high %v2758_v2, %v2757_v11, %v7134_v18  ;;  %v5213_v39 = vadd.s32 4294967294, %v2674_v19  ;;  %v2749_v34 = vsel %vm2743_vm10, %v2746_v50, %v2748_v51 }
 0x220   : > { %vm7129_vm13 = vcmp.le.f32.partialorder %v9270_v25, 0.7853982  ;;  %v2818_v29 = vshrl.u32 %v2817_v6, 23  ;;  %v1364_v49 = vmul.f32 %v1329_v27, %v1162_v24  ;;  %v2484_v54 = vsub.s32 4, %v6878_v57 }
 0x221   : > { %v9272_v4 = vsel %vm7129_vm13, 4294967295, %v9271_v4  ;;  %v2575_v7 = vshll.u32 %v6996_v36, %v7068_v42  ;;  %v2581_v28 = vor.u32 4788187, %v2580_v61  ;;  %v2768_v3 = vadd.s32 1, %v7121_v8 }
 0x222   : > { %9273 = vst [vmem:[#allocation46_spill] sm:$0xff] %v9272_v4  ;;  %vm5214_vm15 = vcmp.lt.s32.totalorder %v5213_v39, 0  ;;  %v9158_v25 = vand.u32 2147483647, %v7103_v37  ;;  %v5219_v46 = vadd.s32 4294967169, %v2818_v29  ;;  %v9274_v32 = vcombine.high %v6932_v16, %v6932_v16 }
 0x223   : > { %v2382_v50 = vsel %vm7107_vm3, %v6580_v31, %v7063_v60  ;;  %v2577_v51 = vor.u32 %v2576_v5, %v2575_v7  ;;  %v2765_v24 = vmul.u32 %v2758_v2, %v2749_v34  ;;  %vm2767_vm2 = vc.u32 %v7135_v56, %v7120_v30 }
 0x224   : > { %v1425_v0 = vrot.slane %v9274_v32, %v6051_v10  ;;  %5598 = vsinq.f32 %v6983_v9  ;;  %v2483_v36 = vsel %vm2400_vm12, %v2482_v44, %v7072_v41  ;;  %v2769_v42 = vsel %vm2767_vm2, %v2768_v3, %v7121_v8 }
 0x225   : > { %v2582_v61 = vand.u32 2147483647, %v2581_v28  ;;  %v2677_v19 = vsel %vm5214_vm15, 0, %v5213_v39  ;;  %v2770_v11 = vadd.s32 %v2769_v42, %v2765_v24  ;;  %v2824_v6 = vadd.s32 1, %v5219_v46 }
 0x226   : > { %v7158_v16 = vadd.f32 %v1425_v0, %v1364_v49  ;;  %v9275_v2 = vsub.s32 4, %v6768_v13  ;;  %5600 = vcosq.f32 %v2382_v50  ;;  %v7170_v9 = vsel %vm2400_vm12, %v2484_v54, %v6878_v57 }
 0x227   : > { %v2821_v41 = vand.u32 8388607, %v9158_v25  ;;  %5602 = vsinq.f32 %v2382_v50  ;;  %v2584_v8 = vcvt.s32.f32 %v2577_v51  ;;  %v2771_v27 = vadd.s32 536870912, %v2770_v11 }
 0x228   : > { %v7165_v60 = vsel %vm2296_vm7, %v9275_v2, %v6768_v13  ;;  %vm2825_vm10 = vcmp.gt.s32.totalorder %v2824_v6, 0  ;;  %v7177_v44 = vsel %vm7129_vm13, %v6717_v1, %v2483_v36  ;;  %v2678_v13 = vsub.s32 32, %v2677_v19 }
 0x229   : > { %v2826_v5 = vsel %vm2825_vm10, %v2824_v6, 0  ;;  %v2921_v18 = vand.u32 2139095040, %v7158_v16  ;;  %v7180_v39 = vmul.f32 %v2584_v8, %v2582_v61  ;;  %v2662_v57 = vadd.s32 %v7032_v17, %v7038_v43 }
 0x22a   : > { %v7184_v34 = vshrl.u32 %v2771_v27, 30  ;;  %v2828_v29 = vand.u32 31, %v2826_v5  ;;  %v2822_v49 = vor.u32 8388608, %v2821_v41  ;;  %v2679_v3 = vshll.u32 %v7099_v22, %v2677_v19 }
 0x22b   : > { %v2682_v46 = vsub.s32 4294967266, %v2677_v19  ;;  %v2680_v50 = vshrl.u32 %v2662_v57, %v2678_v13  ;;  %v2827_v17 = vshrl.u32 %v2826_v5, 5  ;;  %v2922_v51 = vshrl.u32 %v2921_v18, 23 }
 0x22c   : > { %v2773_v32 = vshll.u32 %v7184_v34, 30  ;;  %v2829_v0 = vsub.s32 32, %v2828_v29  ;;  %v2831_v43 = vshll.u32 %v9211_v62, %v2828_v29  ;;  %v2834_v42 = vshll.u32 %v9217_v45, %v2828_v29 }
 0x22d   : > { %v2837_v61 = vshll.u32 %v9218_v52, %v2828_v29  ;;  %v2840_v2 = vshll.u32 %v9219_v33, %v2828_v29  ;;  %v2683_v8 = vadd.s32 127, %v2682_v46  ;;  %v2843_v25 = vshll.u32 %v9226_v20, %v2828_v29 }
 0x22e   : > { %v7194_v24 = vsub.s32 %v2770_v11, %v2773_v32  ;;  %v2832_v36 = vshrl.u32 %v9217_v45, %v2829_v0  ;;  %v7199_v6 = vpop.eup %5598  ;;  %v2835_v22 = vshrl.u32 %v9218_v52, %v2829_v0  ;;  %v2838_v19 = vshrl.u32 %v9219_v33, %v2829_v0 }
 0x22f   : > { %v2841_v41 = vshrl.u32 %v9226_v20, %v2829_v0  ;;  %v2844_v13 = vshrl.u32 %v9208_v38, %v2829_v0  ;;  %v7212_v28 = vor.u32 %v2680_v50, %v2679_v3  ;;  %v2862_v1 = vshll.u32 %v2822_v49, 8 }
 0x230   : > { %v2776_v11 = vsub.s32 0, %v7194_v24  ;;  %v2833_v27 = vor.u32 %v2832_v36, %v2831_v43  ;;  %v7207_v5 = vpop.eup %5600  ;;  %v2836_v18 = vor.u32 %v2835_v22, %v2834_v42  ;;  %v2839_v57 = vor.u32 %v2838_v19, %v2837_v61 }
 0x231   : > { %9276 = vst [vmem:[#allocation47_spill] sm:$0xff] %v7207_v5  ;;  %v2842_v32 = vor.u32 %v2841_v41, %v2840_v2  ;;  %v7210_v7 = vpop.eup %5602  ;;  %v9278_v46 = vand.u32 2147483647, %v7158_v16  ;;  %v2845_v43 = vor.u32 %v2844_v13, %v2843_v25  ;;  %vm2846_vm7 = vcmp.lt.s32.totalorder %v2827_v17, 1 }
 0x232   : > { %9277 = vst [vmem:[#allocation48_spill] sm:$0xff] %v7210_v7  ;;  %v5216_v54 = vmin.u32 %v2776_v11, %v7194_v24  ;;  %vm2849_vm12 = vcmp.lt.s32.totalorder %v2827_v17, 4  ;;  %v5223_v36 = vadd.s32 4294967169, %v2922_v51  ;;  %v2830_v61 = vshrl.u32 %v9211_v62, %v2829_v0 }
 0x233   : > { %v7217_v31 = vand.u32 8388607, %v9278_v46  ;;  %v2851_v29 = vsel %vm2849_vm12, %v2839_v57, 2102212464  ;;  %v2854_v22 = vsel %vm2846_vm7, %v2833_v27, %v2836_v18  ;;  %v2684_v19 = vshll.u32 %v2683_v8, 23 }
 0x234   : > { %v2778_v42 = vclz %v5216_v54  ;;  %vm2847_vm15 = vcmp.lt.s32.totalorder %v2827_v17, 2  ;;  %vm2848_vm2 = vcmp.lt.s32.totalorder %v2827_v17, 3  ;;  %v2855_v3 = vsel %vm2849_vm12, %v2842_v32, 920167782 }
 0x235   : > { %v2850_v50 = vsel %vm2846_vm7, %v2830_v61, %v2833_v27  ;;  %v2856_v2 = vsel %vm2848_vm2, %v2839_v57, %v2855_v3  ;;  %v2858_v41 = vsel %vm2846_vm7, %v2836_v18, %v2839_v57  ;;  %v2852_v11 = vsel %vm2848_vm2, %v2836_v18, %v2851_v29  ;;  %v1169_v27 = vpop.permute.xlu1 %1168 }
 0x236   : > { %v5217_v49 = vadd.s32 4294967294, %v2778_v42  ;;  %v2857_v25 = vsel %vm2847_vm15, %v2854_v22, %v2856_v2  ;;  %v2859_v51 = vsel %vm2849_vm12, %v2845_v43, 1326507024  ;;  %v2928_v54 = vadd.s32 1, %v5223_v36 }
 0x237   : > { %v2860_v0 = vsel %vm2848_vm2, %v2842_v32, %v2859_v51  ;;  %v7224_v13 = vmul.u32.u64.low %v2862_v1, %v2857_v25  ;;  %v7225_v46 = vmul.u32.u64.high %v2862_v1, %v2857_v25, %v7224_v13  ;;  %v2685_v8 = vor.u32 4788187, %v2684_v19 }
 0x238   : > { %vm5218_vm10 = vcmp.lt.s32.totalorder %v5217_v49, 0  ;;  %v2861_v42 = vsel %vm2847_vm15, %v2858_v41, %v2860_v0  ;;  %vm2929_vm1 = vcmp.gt.s32.totalorder %v2928_v54, 0  ;;  %v9279_v32 = vcombine.high %v7053_v47, %v7053_v47 }
 0x239   : > { %v7228_v5 = vsel %vm5218_vm10, 0, %v5217_v49  ;;  %v2930_v61 = vsel %vm2929_vm1, %v2928_v54, 0  ;;  %v2853_v36 = vsel %vm2847_vm15, %v2850_v50, %v2852_v11  ;;  %v2766_v3 = vadd.s32 %v7120_v30, %v7135_v56 }
 0x23a   : > { %v2786_v57 = vsub.s32 4294967266, %v7228_v5  ;;  %v1333_v43 = vrot.slane %v9279_v32, %v6051_v10  ;;  %v7238_v29 = vmul.u32.u64.low %v2862_v1, %v2861_v42  ;;  %v7239_v22 = vmul.u32.u64.high %v2862_v1, %v2861_v42, %v7238_v29 }
 0x23b   : > { %v2932_v19 = vand.u32 31, %v2930_v61  ;;  %v2872_v49 = vadd.s32 1, %v7225_v46  ;;  %v9280_v2 = vcombine.high %v7045_v55, %v7045_v55  ;;  %v2686_v51 = vand.u32 2147483647, %v2685_v8 }
 0x23c   : > { %v1365_v25 = vmul.f32 %v1333_v43, %v1169_v27  ;;  %v2688_v47 = vcvt.s32.f32 %v7212_v28  ;;  %v2926_v17 = vor.u32 8388608, %v7217_v31  ;;  %v2782_v11 = vsub.s32 32, %v7228_v5 }
 0x23d   : > { %v1429_v41 = vrot.slane %v9280_v2, %v6051_v10  ;;  %v2933_v50 = vsub.s32 32, %v2932_v19  ;;  %v2787_v54 = vadd.s32 127, %v2786_v57  ;;  %v2869_v0 = vmul.u32 %v2862_v1, %v2853_v36 }
 0x23e   : > { %v2931_v42 = vshrl.u32 %v2930_v61, 5  ;;  %vm2871_vm1 = vc.u32 %v7239_v22, %v7224_v13  ;;  %v2935_v30 = vshll.u32 %v9211_v62, %v2932_v19  ;;  %v2938_v56 = vshll.u32 %v9217_v45, %v2932_v19 }
 0x23f   : > { %v2936_v55 = vshrl.u32 %v9217_v45, %v2933_v50  ;;  %v2873_v8 = vsel %vm2871_vm1, %v2872_v49, %v7225_v46  ;;  %v2939_v28 = vshrl.u32 %v9218_v52, %v2933_v50  ;;  %v2941_v31 = vshll.u32 %v9218_v52, %v2932_v19 }
 0x240   : > { %v2944_v27 = vshll.u32 %v9219_v33, %v2932_v19  ;;  %vm2504_vm7 = vcmp.lt.s32.totalorder %v6770_v63, 0  ;;  %v2874_v1 = vadd.s32 %v2873_v8, %v2869_v0  ;;  %v2942_v61 = vshrl.u32 %v9219_v33, %v2933_v50 }
 0x241   : > { %v2937_v57 = vor.u32 %v2936_v55, %v2935_v30  ;;  %v2945_v32 = vshrl.u32 %v9226_v20, %v2933_v50  ;;  %v2940_v43 = vor.u32 %v2939_v28, %v2938_v56  ;;  %v2947_v36 = vshll.u32 %v9226_v20, %v2932_v19 }
 0x242   : > { %v2948_v29 = vshrl.u32 %v9208_v38, %v2933_v50  ;;  %v7265_v46 = vadd.f32 %v1429_v41, %v1365_v25  ;;  %v2689_v49 = vmul.f32 %v2688_v47, %v2686_v51  ;;  %v2875_v2 = vadd.s32 536870912, %v2874_v1 }
 0x243   : > { %v2943_v18 = vor.u32 %v2942_v61, %v2941_v31  ;;  %v2946_v10 = vor.u32 %v2945_v32, %v2944_v27  ;;  %v2788_v7 = vshll.u32 %v2787_v54, 23  ;;  %vm2950_vm12 = vcmp.lt.s32.totalorder %v2931_v42, 1 }
 0x244   : > { %v2949_v4 = vor.u32 %v2948_v29, %v2947_v36  ;;  %v2966_v0 = vshll.u32 %v2926_v17, 8  ;;  %v9281_v30 = vand.u32 2147483647, %v6770_v63  ;;  %v9282_v55 = vmov 0 }
 0x245   : > { %v2784_v56 = vshrl.u32 %v2766_v3, %v2782_v11  ;;  %v7273_v19 = vshrl.u32 %v2875_v2, 30  ;;  %vm2953_vm2 = vcmp.lt.s32.totalorder %v2931_v42, 4  ;;  %v2958_v41 = vsel %vm2950_vm12, %v2937_v57, %v2940_v43 }
 0x246   : > { %vm7269_vm15 = vcmp.le.f32.partialorder %v9281_v30, 0.7853982  ;;  %v2934_v25 = vshrl.u32 %v9211_v62, %v2933_v50  ;;  %vm2952_vm10 = vcmp.lt.s32.totalorder %v2931_v42, 3  ;;  %v2955_v51 = vsel %vm2953_vm2, %v2943_v18, 2102212464 }
 0x247   : > { %v9283_v55 = vsel %vm7269_vm15, 4294967295, %v9282_v55  ;;  %v2959_v47 = vsel %vm2953_vm2, %v2946_v10, 920167782  ;;  %vm9178_vm1 = vcmp.lt.s32.totalorder %v6893_v40, 0  ;;  %v2877_v17 = vshll.u32 %v7273_v19, 30 }
 0x248   : > { %9284 = vst [vmem:[#allocation49_spill] sm:$0xff] %v9283_v55  ;;  %vm2951_vm9 = vcmp.lt.s32.totalorder %v2931_v42, 2  ;;  %v2960_v54 = vsel %vm2952_vm10, %v2943_v18, %v2959_v47  ;;  %v2962_v8 = vsel %vm2950_vm12, %v2940_v43, %v2943_v18  ;;  %v2783_v3 = vshll.u32 %v7194_v24, %v7228_v5 }
 0x249   : > { %v2789_v11 = vor.u32 4788187, %v2788_v7  ;;  %v2961_v28 = vsel %vm2951_vm9, %v2958_v41, %v2960_v54  ;;  %v2963_v31 = vsel %vm2953_vm2, %v2949_v4, 1326507024  ;;  %v7283_v27 = vsub.s32 %v2874_v1, %v2877_v17 }
 0x24a   : > { %v2954_v50 = vsel %vm2950_vm12, %v2934_v25, %v2937_v57  ;;  %v2956_v61 = vsel %vm2952_vm10, %v2940_v43, %v2955_v51  ;;  %v2964_v32 = vsel %vm2952_vm10, %v2946_v10, %v2963_v31  ;;  %v9285_v36 = vxor.u32 2147483648, %v7180_v39 }
 0x24b   : > { %v9286_v18 = vand.u32 2147483647, %v6893_v40  ;;  %v9287_v24 = vmov 0  ;;  %v2965_v4 = vsel %vm2951_vm9, %v2962_v8, %v2964_v32  ;;  %v2785_v1 = vor.u32 %v2784_v56, %v2783_v3 }
 0x24c   : > { %v2587_v29 = vsel %vm2504_vm7, %v9285_v36, %v7180_v39  ;;  %v7298_v7 = vmul.u32.u64.low %v2966_v0, %v2961_v28  ;;  %v7299_v5 = vmul.u32.u64.high %v2966_v0, %v2961_v28, %v7298_v7  ;;  %v2880_v10 = vsub.s32 0, %v7283_v27 }
 0x24d   : > { %vm7293_vm8 = vcmp.le.f32.partialorder %v9286_v18, 0.7853982  ;;  %v7302_v57 = vmul.u32.u64.low %v2966_v0, %v2965_v4  ;;  %v7303_v43 = vmul.u32.u64.high %v2966_v0, %v2965_v4, %v7302_v57  ;;  %v2588_v2 = vsub.s32 4, %v6973_v58 }
 0x24e   : > { %v9288_v24 = vsel %vm7293_vm8, 4294967295, %v9287_v24  ;;  %v2690_v39 = vxor.u32 2147483648, %v2689_v49  ;;  %v2957_v30 = vsel %vm2951_vm9, %v2954_v50, %v2956_v61  ;;  %v3025_v41 = vand.u32 2139095040, %v7265_v46 }
 0x24f   : > { %9289 = vst [vmem:[#allocation50_spill] sm:$0xff] %v9288_v24  ;;  %5604 = vcosq.f32 %v7177_v44  ;;  %v2790_v25 = vand.u32 2147483647, %v2789_v11  ;;  %v5220_v51 = vmin.u32 %v2880_v10, %v7283_v27  ;;  %v9169_v47 = vand.u32 2147483647, %v7265_v46 }
 0x250   : > { %5606 = vsinq.f32 %v7177_v44  ;;  %v2590_v56 = vsel %vm7269_vm15, %v6770_v63, %v2587_v29  ;;  %v2976_v17 = vadd.s32 1, %v7299_v5  ;;  %v3026_v54 = vshrl.u32 %v3025_v41, 23 }
 0x251   : > { %v2792_v42 = vcvt.s32.f32 %v2785_v1  ;;  %v2882_v8 = vclz %v5220_v51  ;;  %v2973_v3 = vmul.u32 %v2966_v0, %v2957_v30  ;;  %vm2975_vm9 = vc.u32 %v7303_v43, %v7298_v7 }
 0x252   : > { %v2691_v11 = vsel %vm9178_vm1, %v2690_v39, %v2689_v49  ;;  %v2977_v28 = vsel %vm2975_vm9, %v2976_v17, %v7299_v5  ;;  %v5227_v31 = vadd.s32 4294967169, %v3026_v54  ;;  %v9170_v44 = vand.u32 2147483647, %v6149_v59  ;;  %v9292_v54 = vld [vmem:[#allocation11_spill] sm:$0xff] }
 0x253   : > { %v7321_v50 = vmul.f32 %v2792_v42, %v2790_v25  ;;  %v5221_v61 = vadd.s32 4294967294, %v2882_v8  ;;  %v2978_v32 = vadd.s32 %v2977_v28, %v2973_v3  ;;  %v3029_v36 = vand.u32 8388607, %v9169_v47 }
 0x254   : > { %v7328_v0 = vsel %vm2504_vm7, %v2588_v2, %v6973_v58  ;;  %5608 = vcosq.f32 %v2590_v56  ;;  %v3032_v29 = vadd.s32 1, %v5227_v31  ;;  %v7334_v18 = vsel %vm7293_vm8, %v6893_v40, %v2691_v11 }
 0x255   : > { %9290 = vst [vmem:[#allocation51_spill] sm:$0xff] %v7328_v0  ;;  %5610 = vsinq.f32 %v2590_v56  ;;  %vm5222_vm12 = vcmp.lt.s32.totalorder %v5221_v61, 0  ;;  %v2979_v4 = vadd.s32 536870912, %v2978_v32  ;;  %v2870_v5 = vadd.s32 %v7224_v13, %v7239_v22 }
 0x256   : > { %v7338_v1 = vsel %vm5222_vm12, 0, %v5221_v61  ;;  %vm3033_vm2 = vcmp.gt.s32.totalorder %v3032_v29, 0  ;;  %v7342_v58 = vand.u32 8388607, %v9170_v44  ;;  %v3030_v2 = vor.u32 8388608, %v3029_v36  ;;  %v9293_v61 = vld [vmem:[#allocation14_spill] sm:$0xff] }
 0x257   : > { %v7345_v57 = vshrl.u32 %v2979_v4, 30  ;;  %v1480_v39 = vshrl.u32 %v9217_v45, %v6303_v14  ;;  %v3034_v30 = vsel %vm3033_vm2, %v3032_v29, 0  ;;  %v1478_v41 = vshrl.u32 %v9211_v62, %v6303_v14 }
 0x258   : > { %v1483_v13 = vshrl.u32 %v9218_v52, %v6303_v14  ;;  %v1486_v22 = vshrl.u32 %v9219_v33, %v6303_v14  ;;  %v2890_v51 = vsub.s32 4294967266, %v7338_v1  ;;  %v7359_v56 = vadd.s32 %v7298_v7, %v7303_v43 }
 0x259   : > { %v7355_v25 = vpop.eup %5604  ;;  %v2981_v17 = vshll.u32 %v7345_v57, 30  ;;  %v1479_v42 = vshll.u32 %v9211_v62, %v9292_v54  ;;  %v3036_v3 = vand.u32 31, %v3034_v30  ;;  %v1482_v14 = vshll.u32 %v9217_v45, %v9292_v54 }
 0x25a   : > { %9291 = vst [vmem:[#allocation52_spill] sm:$0xff] %v7355_v25  ;;  %v7364_v8 = vpop.eup %5606  ;;  %v1485_v28 = vshll.u32 %v9218_v52, %v9292_v54  ;;  %v7373_v7 = vshll.u32 %v3030_v2, 8  ;;  %vm1494_vm7 = vcmp.lt.s32.totalorder %v9293_v61, 1  ;;  %v2886_v36 = vsub.s32 32, %v7338_v1 }
 0x25b   : > { %v7371_v31 = vsub.s32 %v2978_v32, %v2981_v17  ;;  %v1481_v43 = vor.u32 %v1480_v39, %v1479_v42  ;;  %v3037_v29 = vsub.s32 32, %v3036_v3  ;;  %v7377_v4 = vor.u32 %v1483_v13, %v1482_v14 }
 0x25c   : > { %v7379_v47 = vor.u32 %v1486_v22, %v1485_v28  ;;  %v2891_v44 = vadd.s32 127, %v2890_v51  ;;  %v3035_v49 = vshrl.u32 %v3034_v30, 5  ;;  %v3039_v54 = vshll.u32 %v9211_v62, %v3036_v3 }
 0x25d   : > { %v2984_v10 = vsub.s32 0, %v7371_v31  ;;  %v3040_v2 = vshrl.u32 %v9217_v45, %v3037_v29  ;;  %v3042_v39 = vshll.u32 %v9217_v45, %v3036_v3  ;;  %v3043_v17 = vshrl.u32 %v9218_v52, %v3037_v29 }
 0x25e   : > { %v7383_v32 = vpop.eup %5608  ;;  %v3046_v42 = vshrl.u32 %v9219_v33, %v3037_v29  ;;  %v3045_v51 = vshll.u32 %v9218_v52, %v3036_v3  ;;  %v3048_v30 = vshll.u32 %v9219_v33, %v3036_v3  ;;  %v3049_v14 = vshrl.u32 %v9226_v20, %v3037_v29 }
 0x25f   : > { %9294 = vst [vmem:[#allocation11_spill] sm:$0xff] %v7383_v32  ;;  %v7389_v13 = vpop.eup %5610  ;;  %v5224_v22 = vmin.u32 %v2984_v10, %v7371_v31  ;;  %v3041_v28 = vor.u32 %v3040_v2, %v3039_v54  ;;  %v3044_v11 = vor.u32 %v3043_v17, %v3042_v39  ;;  %v3051_v63 = vshll.u32 %v9226_v20, %v3036_v3 }
 0x260   : > { %9295 = vst [vmem:[#allocation14_spill] sm:$0xff] %v7389_v13  ;;  %v3052_v32 = vshrl.u32 %v9208_v38, %v3037_v29  ;;  %v2887_v24 = vshll.u32 %v7283_v27, %v7338_v1  ;;  %v3047_v0 = vor.u32 %v3046_v42, %v3045_v51  ;;  %v3050_v13 = vor.u32 %v3049_v14, %v3048_v30 }
 0x261   : > { %v2986_v55 = vclz %v5224_v22  ;;  %v2888_v25 = vshrl.u32 %v2870_v5, %v2886_v36  ;;  %vm1496_vm9 = vcmp.lt.s32.totalorder %v9293_v61, 3  ;;  %v1498_v54 = vsel %vm1494_vm7, %v1478_v41, %v1481_v43 }
 0x262   : > { %v3053_v10 = vor.u32 %v3052_v32, %v3051_v63  ;;  %v2892_v2 = vshll.u32 %v2891_v44, 23  ;;  %vm3054_vm12 = vcmp.lt.s32.totalorder %v3035_v49, 1  ;;  %vm3057_vm2 = vcmp.lt.s32.totalorder %v3035_v49, 4 }
 0x263   : > { %v5225_v39 = vadd.s32 4294967294, %v2986_v55  ;;  %v3038_v3 = vshrl.u32 %v9211_v62, %v3037_v29  ;;  %vm3056_vm1 = vcmp.lt.s32.totalorder %v3035_v49, 3  ;;  %v3062_v27 = vsel %vm3054_vm12, %v3041_v28, %v3044_v11 }
 0x264   : > { %v3063_v1 = vsel %vm3057_vm2, %v3050_v13, 920167782  ;;  %vm3055_vm15 = vcmp.lt.s32.totalorder %v3035_v49, 2  ;;  %v3059_v63 = vsel %vm3057_vm2, %v3047_v0, 2102212464  ;;  %v3066_v41 = vsel %vm3054_vm12, %v3044_v11, %v3047_v0 }
 0x265   : > { %vm5226_vm8 = vcmp.lt.s32.totalorder %v5225_v39, 0  ;;  %v3064_v5 = vsel %vm3056_vm1, %v3047_v0, %v3063_v1  ;;  %v3067_v44 = vsel %vm3057_vm2, %v3053_v10, 1326507024  ;;  %v2889_v55 = vor.u32 %v2888_v25, %v2887_v24 }
 0x266   : > { %v2989_v36 = vsel %vm5226_vm8, 0, %v5225_v39  ;;  %v3065_v32 = vsel %vm3055_vm15, %v3062_v27, %v3064_v5  ;;  %v3058_v42 = vsel %vm3054_vm12, %v3038_v3, %v3041_v28  ;;  %v1502_v29 = vsel %vm1494_vm7, %v1481_v43, %v7377_v4  ;;  %v9297_v43 = vld [vmem:[#allocation18_spill] sm:$0xff] }
 0x267   : > { %v2994_v17 = vsub.s32 4294967266, %v2989_v36  ;;  %vm2712_vm10 = vcmp.lt.s32.totalorder %v6955_v23, 0  ;;  %v3060_v22 = vsel %vm3056_vm1, %v3044_v11, %v3059_v63  ;;  %v3068_v51 = vsel %vm3056_vm1, %v3050_v13, %v3067_v44 }
 0x268   : > { %v7416_v30 = vmul.u32.u64.low %v7373_v7, %v3065_v32  ;;  %v7417_v14 = vmul.u32.u64.high %v7373_v7, %v3065_v32, %v7416_v30  ;;  %v2893_v0 = vor.u32 4788187, %v2892_v2  ;;  %v2990_v24 = vsub.s32 32, %v2989_v36  ;;  %v9299_v32 = vld [vmem:[#allocation19_spill] sm:$0xff] }
 0x269   : > { %v2995_v25 = vadd.s32 127, %v2994_v17  ;;  %v3069_v28 = vsel %vm3055_vm15, %v3066_v41, %v3068_v51  ;;  %vm9296_vm8 = vcmp.lt.s32.totalorder %v9293_v61, 4  ;;  %v1504_v13 = vsel %vm1496_vm9, %v7379_v47, %v9297_v43  ;;  %v9300_v41 = vld [vmem:[#allocation17_spill] sm:$0xff] }
 0x26a   : > { %v7422_v10 = vmul.u32.u64.low %v7373_v7, %v3069_v28  ;;  %v7423_v39 = vmul.u32.u64.high %v7373_v7, %v3069_v28, %v7422_v10  ;;  %v1499_v11 = vsel %vm9296_vm8, %v7379_v47, 2102212464  ;;  %v2896_v3 = vcvt.s32.f32 %v2889_v55  ;;  %v9307_v43 = vld [vmem:[#allocation9_spill] sm:$0xff] }
 0x26b   : > { %v2996_v27 = vshll.u32 %v2995_v25, 23  ;;  %v3061_v2 = vsel %vm3055_vm15, %v3058_v42, %v3060_v22  ;;  %vm9298_vm1 = vcmp.lt.s32.totalorder %v9293_v61, 2  ;;  %v3080_v63 = vadd.s32 1, %v7417_v14 }
 0x26c   : > { %v1505_v1 = vsel %vm9298_vm1, %v1502_v29, %v1504_v13  ;;  %v1506_v5 = vsel %vm1494_vm7, %v7377_v4, %v7379_v47  ;;  %v1508_v44 = vsel %vm1496_vm9, %v9300_v41, %v9299_v32  ;;  %v9301_v55 = vor.u32 8388608, %v7342_v58  ;;  %vm9302_vm15 = vmmov %vm9298_vm1  ;;  %v9311_v32 = vld [vmem:[#allocation15_spill] sm:$0xff] }
 0x26d   : > { %v2894_v49 = vand.u32 2147483647, %v2893_v0  ;;  %v2992_v42 = vshrl.u32 %v7359_v56, %v2990_v24  ;;  %v1500_v29 = vsel %vm1496_vm9, %v7377_v4, %v1499_v11  ;;  %v1509_v22 = vsel %vm9302_vm15, %v1506_v5, %v1508_v44  ;;  %vm9306_vm9 = vmmov %vm9298_vm1 }
 0x26e   : > { %v1510_v17 = vshll.u32 %v9301_v55, 8  ;;  %v3077_v47 = vmul.u32 %v7373_v7, %v3061_v2  ;;  %vm3079_vm7 = vc.u32 %v7423_v39, %v7416_v30  ;;  %v9303_v58 = vand.u32 2147483647, %v6955_v23  ;;  %v9312_v55 = vld [vmem:[#allocation13_spill] sm:$0xff] }
 0x26f   : > { %v2997_v56 = vor.u32 4788187, %v2996_v27  ;;  %v3081_v4 = vsel %vm3079_vm7, %v3080_v63, %v7417_v14  ;;  %v2991_v7 = vshll.u32 %v7371_v31, %v2989_v36  ;;  %v1501_v11 = vsel %vm9306_vm9, %v1498_v54, %v1500_v29 }
 0x270   : > { %v7455_v51 = vmul.u32.u64.low %v1510_v17, %v1509_v22  ;;  %v7456_v25 = vmul.u32.u64.high %v1510_v17, %v1509_v22, %v7455_v51  ;;  %vm7460_vm12 = vcmp.le.f32.partialorder %v9303_v58, 0.7853982  ;;  %v3082_v10 = vadd.s32 %v3081_v4, %v3077_v47 }
 0x271   : > { %v7465_v24 = vmul.u32.u64.low %v1510_v17, %v1505_v1  ;;  %v7466_v28 = vmul.u32.u64.high %v1510_v17, %v1505_v1, %v7465_v24  ;;  %v9181_v13 = vand.u32 2147483647, %v9307_v43  ;;  %v9308_v2 = vsub.s32 4, %v7083_v21 }
 0x272   : > { %vm9309_vm2 = vcmp.lt.s32.totalorder %v6893_v40, 0  ;;  %5612 = vcosq.f32 %v7334_v18  ;;  %v9310_v14 = vxor.u32 2147483648, %v7321_v50  ;;  %v2796_v61 = vsub.s32 4, %v7184_v34 }
 0x273   : > { %v7478_v27 = vsel %vm9309_vm2, %v9308_v2, %v7083_v21  ;;  %v2897_v54 = vmul.f32 %v2896_v3, %v2894_v49  ;;  %v2993_v36 = vor.u32 %v2992_v42, %v2991_v7  ;;  %v3083_v1 = vadd.s32 536870912, %v3082_v10 }
 0x274   : > { %v2795_v31 = vsel %vm2712_vm10, %v9310_v14, %v7321_v50  ;;  %vm1519_vm8 = vc.u32 %v7456_v25, %v7465_v24  ;;  %v2998_v63 = vand.u32 2147483647, %v2997_v56  ;;  %v1517_v5 = vmul.u32 %v1510_v17, %v1501_v11 }
 0x275   : > { %v1520_v21 = vadd.s32 1, %v7466_v28  ;;  %v1584_v41 = vshrl.u32 %v9217_v45, %v9311_v32  ;;  %v7492_v44 = vshrl.u32 %v3083_v1, 30  ;;  %v1573_v50 = vand.u32 8388607, %v9181_v13 }
 0x276   : > { %v1583_v3 = vshll.u32 %v9211_v62, %v9312_v55  ;;  %v1587_v49 = vshrl.u32 %v9218_v52, %v9311_v32  ;;  %vm2816_vm1 = vcmp.lt.s32.totalorder %v7103_v37, 0  ;;  %v1586_v42 = vshll.u32 %v9217_v45, %v9312_v55 }
 0x277   : > { %v1521_v17 = vsel %vm1519_vm8, %v1520_v21, %v7466_v28  ;;  %v1589_v29 = vshll.u32 %v9218_v52, %v9312_v55  ;;  %v1590_v22 = vshrl.u32 %v9219_v33, %v9311_v32  ;;  %5614 = vsinq.f32 %v7334_v18  ;;  %v7534_v55 = vpop.xlane.xlu0 %607 }
 0x278   : > { %v7512_v47 = vsel %vm2712_vm10, %v2796_v61, %v7184_v34  ;;  %v3085_v51 = vshll.u32 %v7492_v44, 30  ;;  %v1522_v58 = vadd.s32 %v1521_v17, %v1517_v5  ;;  %v3000_v56 = vcvt.s32.f32 %v2993_v36 }
 0x279   : > { %v1585_v4 = vor.u32 %v1584_v41, %v1583_v3  ;;  %v1588_v28 = vor.u32 %v1587_v49, %v1586_v42  ;;  %v1591_v7 = vor.u32 %v1590_v22, %v1589_v29  ;;  %v2798_v11 = vsel %vm7460_vm12, %v6955_v23, %v2795_v31  ;;  %v9317_v49 = vld [vmem:[#allocation21_spill] sm:$0xff]  ;;  %v9318_v42 = vld [vmem:[#allocation23_spill] sm:$0xff]  ;;  %v9319_v29 = vld [vmem:[#allocation20_spill] sm:$0xff] }
 0x27a   : > { %v2900_v2 = vsub.s32 4, %v7273_v19  ;;  %v7519_v14 = vsub.s32 %v3082_v10, %v3085_v51  ;;  %v1523_v18 = vadd.s32 536870912, %v1522_v58  ;;  %v9313_v1 = vand.u32 2147483647, %v7103_v37  ;;  %v9316_v10 = vld [vmem:[#allocation16_spill] sm:$0xff] }
 0x27b   : > { %v2898_v61 = vxor.u32 2147483648, %v2897_v54  ;;  %v3001_v36 = vmul.f32 %v3000_v56, %v2998_v63  ;;  %v3004_v5 = vsub.s32 4, %v7345_v57  ;;  %v1574_v21 = vor.u32 8388608, %v1573_v50 }
 0x27c   : > { %vm7523_vm10 = vcmp.le.f32.partialorder %v9313_v1, 0.7853982  ;;  %vm2920_vm15 = vcmp.lt.s32.totalorder %v7158_v16, 0  ;;  %v3088_v31 = vsub.s32 0, %v7519_v14  ;;  %v7530_v41 = vshrl.u32 %v1523_v18, 30  ;;  %v7536_v3 = vpop.eup %5612 }
 0x27d   : > { %vm1598_vm7 = vcmp.lt.s32.totalorder %v9316_v10, 1  ;;  %vm1600_vm9 = vcmp.lt.s32.totalorder %v9316_v10, 3  ;;  %vm1599_vm2 = vcmp.lt.s32.totalorder %v9316_v10, 2  ;;  %vm9320_vm8 = vcmp.lt.s32.totalorder %v9316_v10, 4 }
 0x27e   : > { %v1606_v63 = vsel %vm1598_vm7, %v1585_v4, %v1588_v28  ;;  %v1608_v50 = vsel %vm1600_vm9, %v1591_v7, %v9317_v49  ;;  %v1610_v17 = vsel %vm1598_vm7, %v1588_v28, %v1591_v7  ;;  %v1612_v22 = vsel %vm1600_vm9, %v9319_v29, %v9318_v42 }
 0x27f   : > { %v5228_v51 = vmin.u32 %v3088_v31, %v7519_v14  ;;  %v1525_v56 = vshll.u32 %v7530_v41, 30  ;;  %v1603_v18 = vsel %vm9320_vm8, %v1591_v7, 2102212464  ;;  %v1582_v1 = vshrl.u32 %v9211_v62, %v9311_v32 }
 0x280   : > { %v1613_v49 = vsel %vm1599_vm2, %v1610_v17, %v1612_v22  ;;  %v1614_v13 = vshll.u32 %v1574_v21, 8  ;;  %5616 = vrsqrt.f32 %v7534_v55  ;;  %v2899_v42 = vsel %vm2816_vm1, %v2898_v61, %v2897_v54 }
 0x281   : > { %v3090_v31 = vclz %v5228_v51  ;;  %v7561_v29 = vsub.s32 %v1522_v58, %v1525_v56  ;;  %v1609_v38 = vsel %vm1599_vm2, %v1606_v63, %v1608_v50  ;;  %v1602_v7 = vsel %vm1598_vm7, %v1582_v1, %v1585_v4  ;;  %v7572_v21 = vpop.eup %5614  ;;  %v9324_v56 = vld [vmem:[#allocation24_spill] sm:$0xff] }
 0x282   : > { %v1604_v32 = vsel %vm1600_vm9, %v1588_v28, %v1603_v18  ;;  %v7569_v20 = vmul.u32.u64.low %v1614_v13, %v1613_v49  ;;  %v7570_v17 = vmul.u32.u64.high %v1614_v13, %v1613_v49, %v7569_v20  ;;  %5618 = vcosq.f32 %v2798_v11 }
 0x283   : > { %v7577_v54 = vsel %vm2816_vm1, %v2900_v2, %v7273_v19  ;;  %v9321_v58 = vand.u32 2147483647, %v7158_v16  ;;  %v9322_v61 = vmov 0  ;;  %v5229_v4 = vadd.s32 4294967294, %v3090_v31 }
 0x284   : > { %v1528_v28 = vsub.s32 0, %v7561_v29  ;;  %5620 = vsinq.f32 %v2798_v11  ;;  %v3002_v63 = vxor.u32 2147483648, %v3001_v36  ;;  %v2902_v19 = vsel %vm7523_vm10, %v7103_v37, %v2899_v42 }
 0x285   : > { %vm7581_vm8 = vcmp.le.f32.partialorder %v9321_v58, 0.7853982  ;;  %v7586_v20 = vmul.u32.u64.low %v1614_v13, %v1609_v38  ;;  %v7587_v50 = vmul.u32.u64.high %v1614_v13, %v1609_v38, %v7586_v20  ;;  %vm5230_vm1 = vcmp.lt.s32.totalorder %v5229_v4, 0 }
 0x286   : > { %v9323_v61 = vsel %vm7581_vm8, 4294967295, %v9322_v61  ;;  %vm9184_vm7 = vcmp.lt.s32.totalorder %v6149_v59, 0  ;;  %v5168_v2 = vmin.u32 %v1528_v28, %v7561_v29  ;;  %v1605_v22 = vsel %vm1599_vm2, %v1602_v7, %v1604_v32 }
 0x287   : > { %v7600_v11 = vsel %vm2920_vm15, %v3004_v5, %v7345_v57  ;;  %v3078_v38 = vadd.s32 %v7416_v30, %v7423_v39  ;;  %v3093_v51 = vsel %vm5230_vm1, 0, %v5229_v4  ;;  %v1759_v1 = vsel %vm6536_vm6, 0, %v9324_v56 }
 0x288   : > { %v3094_v49 = vsub.s32 32, %v3093_v51  ;;  %v3098_v42 = vsub.s32 4294967266, %v3093_v51  ;;  %v1530_v31 = vclz %v5168_v2  ;;  %vm1623_vm9 = vc.u32 %v7570_v17, %v7586_v20 }
 0x289   : > { %5622 = vcosq.f32 %v2902_v19  ;;  %v3003_v10 = vsel %vm2920_vm15, %v3002_v63, %v3001_v36  ;;  %v9326_v57 = vand.u32 2147483647, %v6149_v59  ;;  %v1621_v30 = vmul.u32 %v1614_v13, %v1605_v22 }
 0x28a   : > { %v1624_v39 = vadd.s32 1, %v7587_v50  ;;  %v3095_v7 = vshll.u32 %v7519_v14, %v3093_v51  ;;  %v3096_v32 = vshrl.u32 %v3078_v38, %v3094_v49  ;;  %v3099_v58 = vadd.s32 127, %v3098_v42  ;;  %v5617_v28 = vpop.eup %5616 }
 0x28b   : > { %vm7613_vm2 = vcmp.le.f32.partialorder %v9326_v57, 0.7853982  ;;  %v5169_v4 = vadd.s32 4294967294, %v1530_v31  ;;  %5624 = vsinq.f32 %v2902_v19  ;;  %v1548_v2 = vsub.s32 4, %v7530_v41 }
 0x28c   : > { %v1625_v36 = vsel %vm1623_vm9, %v1624_v39, %v7587_v50  ;;  %v1763_v63 = vadd.s32 3, %v1759_v1  ;;  %v3097_v56 = vor.u32 %v3096_v32, %v3095_v7  ;;  %v3100_v18 = vshll.u32 %v3099_v58, 23  ;;  %v7627_v19 = vpop.eup %5618 }
 0x28d   : > { %vm5170_vm6 = vcmp.lt.s32.totalorder %v5169_v4, 0  ;;  %v1626_v57 = vadd.s32 %v1625_v36, %v1621_v30  ;;  %v3006_v13 = vsel %vm7581_vm8, %v7158_v16, %v3003_v10  ;;  %v1518_v14 = vadd.s32 %v7465_v24, %v7456_v25 }
 0x28e   : > { %v1533_v22 = vsel %vm5170_vm6, 0, %v5169_v4  ;;  %v613_v38 = vmul.f32 %v5617_v28, %v7534_v55  ;;  %v3101_v51 = vor.u32 4788187, %v3100_v18  ;;  %v3108_v50 = vsub.s32 4, %v7492_v44  ;;  %v7631_v49 = vpop.eup %5620 }
 0x28f   : > { %v1534_v1 = vsub.s32 32, %v1533_v22  ;;  %vm614_vm15 = vcmp.eq.f32.partialorder %v7534_v55, inf  ;;  %v1538_v42 = vsub.s32 4294967266, %v1533_v22  ;;  %v1549_v25 = vsel %vm9184_vm7, %v1548_v2, %v7530_v41 }
 0x290   : > { %v1627_v24 = vadd.s32 536870912, %v1626_v57  ;;  %v617_v31 = vand.u32 2147483648, %v7534_v55  ;;  %v3102_v10 = vand.u32 2147483647, %v3101_v51  ;;  %v3104_v30 = vcvt.s32.f32 %v3097_v56 }
 0x291   : > { %v1536_v39 = vshrl.u32 %v1518_v14, %v1534_v1  ;;  %v1764_v7 = vand.u32 3, %v1763_v63  ;;  %v1535_v32 = vshll.u32 %v7561_v29, %v1533_v22  ;;  %v1539_v58 = vadd.s32 127, %v1538_v42 }
 0x292   : > { %v1628_v4 = vshrl.u32 %v1627_v24, 30  ;;  %v615_v28 = vsel %vm614_vm15, %v7534_v55, %v613_v38  ;;  %v9329_v36 = vand.u32 2147483647, %v7265_v46  ;;  %v3105_v41 = vmul.f32 %v3104_v30, %v3102_v10  ;;  %v7670_v10 = vpop.xlane.xlu1 %610 }
 0x293   : > { %v1551_v2 = vsel %vm7613_vm2, 0, %v1549_v25  ;;  %v1767_v56 = vxor.u32 2147483648, %v6700_v48  ;;  %v1770_v63 = vxor.u32 2147483648, %v6613_v53  ;;  %v7651_v14 = vpop.eup %5622  ;;  %v1537_v29 = vor.u32 %v1536_v39, %v1535_v32  ;;  %v9335_v25 = vld [vmem:[#allocation26_spill] sm:$0xff] }
 0x294   : > { %vm7643_vm6 = vcmp.le.f32.partialorder %v9329_v36, 0.7853982  ;;  %v1540_v22 = vshll.u32 %v1539_v58, 23  ;;  %v9332_v38 = vand.u32 2147483647, %v9307_v43  ;;  %v1629_v1 = vshll.u32 %v1628_v4, 30 }
 0x295   : > { %vm616_vm7 = vcmp.eq.f32.partialorder %v7534_v55, 0.0  ;;  %v3106_v42 = vxor.u32 2147483648, %v3105_v41  ;;  %vm1766_vm9 = vcmp.eq.s32.totalorder %v1764_v7, 0  ;;  %v1863_v30 = vsel %vm6617_vm4, 0, %v9335_v25  ;;  %v7663_v36 = vpop.eup %5624  ;;  %v9343_v25 = vld [vmem:[#allocation32_spill] sm:$0xff] }
 0x296   : > { %vm7655_vm15 = vcmp.le.f32.partialorder %v9332_v38, 0.7853982  ;;  %v618_v24 = vsel %vm616_vm7, %v617_v31, %v615_v28  ;;  %v1541_v39 = vor.u32 4788187, %v1540_v22  ;;  %v7665_v32 = vsub.s32 %v1626_v57, %v1629_v1 }
 0x297   : > { %v1652_v58 = vsub.s32 4, %v1628_v4  ;;  %vm1769_vm1 = vcmp.eq.s32.totalorder %v1764_v7, 2  ;;  %5626 = vcosq.f32 %v3006_v13  ;;  %v1555_v38 = vadd.s32 3, %v1551_v2 }
 0x298   : > { %v1768_v33 = vsel %vm1766_vm9, %v6613_v53, %v1767_v56  ;;  %v1771_v55 = vsel %vm1769_vm1, %v1770_v63, %v6700_v48  ;;  %v1542_v52 = vand.u32 2147483647, %v1541_v39  ;;  %v1544_v31 = vcvt.s32.f32 %v1537_v29  ;;  %v9340_v29 = vld [vmem:[#allocation7_spill] sm:$0xff] }
 0x299   : > { %v1632_v28 = vsub.s32 0, %v7665_v32  ;;  %v1867_v45 = vadd.s32 3, %v1863_v30  ;;  %5628 = vsinq.f32 %v3006_v13  ;;  %vm9337_vm4 = vcmp.lt.s32.totalorder %v7265_v46, 0  ;;  %v9344_v39 = vld [vmem:[#allocation35_spill] sm:$0xff] }
 0x29a   : > { %v3107_v57 = vsel %vm9337_vm4, %v3106_v42, %v3105_v41  ;;  %vm9338_vm7 = vmmov %vm9337_vm4  ;;  %v626_v2 = vmax.f32 %v618_v24, 1e-12  ;;  %v1545_v53 = vmul.f32 %v1544_v31, %v1542_v52  ;;  %vm9339_vm1 = vcmp.lt.s32.totalorder %v9307_v43, 0  ;;  %v9346_v31 = vld [vmem:[#allocation8_spill] sm:$0xff] }
 0x29b   : > { %v7677_v22 = vsel %vm9338_vm7, %v3108_v50, %v7492_v44  ;;  %v5172_v48 = vmin.u32 %v1632_v28, %v7665_v32  ;;  %v1653_v56 = vsel %vm9339_vm1, %v1652_v58, %v1628_v4  ;;  %vm1765_vm9 = vcmp.lt.s32.totalorder %v1764_v7, 2  ;;  %v9341_v4 = vld [vmem:[#allocation36_spill] sm:$0xff] }
 0x29c   : > { %v7682_v63 = vand.u32 3, %v1555_v38  ;;  %vm1762_vm8 = vweird.f32 %v9340_v29  ;;  %v1772_v13 = vsel %vm1765_vm9, %v1768_v33, %v1771_v55  ;;  %5630 = vrsqrt.f32 %v7670_v10 }
 0x29d   : > { %v3110_v44 = vsel %vm7643_vm6, %v7265_v46, %v3107_v57  ;;  %v1546_v50 = vxor.u32 2147483648, %v1545_v53  ;;  %v1634_v41 = vclz %v5172_v48  ;;  %v1868_v52 = vand.u32 3, %v1867_v45 }
 0x29e   : > { %v1622_v1 = vadd.s32 %v7586_v20, %v7570_v17  ;;  %v1655_v7 = vsel %vm7655_vm15, 0, %v1653_v56  ;;  %5632 = vrcp.f32 %v626_v2  ;;  %v1871_v42 = vxor.u32 2147483648, %v9341_v4  ;;  %v9347_v2 = vld [vmem:[#allocation34_spill] sm:$0xff] }
 0x29f   : > { %vm9342_vm4 = vcmp.lt.s32.totalorder %v6149_v59, 0  ;;  %v5173_v24 = vadd.s32 4294967294, %v1634_v41  ;;  %v1874_v30 = vxor.u32 2147483648, %v9343_v25  ;;  %v1967_v38 = vsel %vm6806_vm11, 0, %v9344_v39 }
 0x2a0   : > { %v1547_v33 = vsel %vm9342_vm4, %v1546_v50, %v1545_v53  ;;  %5634 = vcosq.f32 %v3110_v44  ;;  %v7705_v17 = vsel %vm1762_vm8, nan, %v1772_v13  ;;  %v1971_v20 = vadd.s32 3, %v1967_v38 }
 0x2a1   : > { %v1550_v45 = vsel %vm7613_vm2, %v6149_v59, %v1547_v33  ;;  %vm5174_vm7 = vcmp.lt.s32.totalorder %v5173_v24, 0  ;;  %v1659_v55 = vadd.s32 3, %v1655_v7  ;;  %vm1866_vm1 = vweird.f32 %v9346_v31  ;;  %v7708_v28 = vpop.eup %5626 }
 0x2a2   : > { %5636 = vcosq.f32 %v1550_v45  ;;  %vm1870_vm9 = vcmp.eq.s32.totalorder %v1868_v52, 0  ;;  %v1637_v57 = vsel %vm5174_vm7, 0, %v5173_v24  ;;  %vm1873_vm11 = vcmp.eq.s32.totalorder %v1868_v52, 2 }
 0x2a3   : > { %5638 = vsinq.f32 %v1550_v45  ;;  %v2071_v5 = vsel %vm6705_vm14, 0, %v9347_v2  ;;  %v1638_v48 = vsub.s32 32, %v1637_v57  ;;  %v1642_v56 = vsub.s32 4294967266, %v1637_v57  ;;  %v7715_v50 = vpop.eup %5628 }
 0x2a4   : > { %v1872_v29 = vsel %vm1870_vm9, %v9343_v25, %v1871_v42  ;;  %v1875_v13 = vsel %vm1873_vm11, %v1874_v30, %v9341_v4  ;;  %vm1869_vm8 = vcmp.lt.s32.totalorder %v1868_v52, 2  ;;  %v1972_v41 = vand.u32 3, %v1971_v20 }
 0x2a5   : > { %v1975_v7 = vxor.u32 2147483648, %v7012_v15  ;;  %v2075_v33 = vadd.s32 3, %v2071_v5  ;;  %v1639_v24 = vshll.u32 %v7665_v32, %v1637_v57  ;;  %v1640_v39 = vshrl.u32 %v1622_v1, %v1638_v48  ;;  %v9349_v32 = vld [vmem:[#allocation39_spill] sm:$0xff]  ;;  %v9350_v57 = vld [vmem:[#allocation42_spill] sm:$0xff] }
 0x2a6   : > { %v1643_v58 = vadd.s32 127, %v1642_v56  ;;  %v1978_v38 = vxor.u32 2147483648, %v6965_v26  ;;  %v5631_v45 = vpop.eup %5630  ;;  %5640 = vsinq.f32 %v3110_v44  ;;  %v7720_v2 = vand.u32 3, %v1659_v55  ;;  %v9352_v56 = vld [vmem:[#allocation37_spill] sm:$0xff] }
 0x2a7   : > { %v1876_v42 = vsel %vm1869_vm8, %v1872_v29, %v1875_v13  ;;  %vm621_vm14 = vcmp.eq.f32.partialorder %v7670_v10, inf  ;;  %v1641_v4 = vor.u32 %v1640_v39, %v1639_v24  ;;  %v620_v52 = vmul.f32 %v5631_v45, %v7670_v10 }
 0x2a8   : > { %v1644_v25 = vshll.u32 %v1643_v58, 23  ;;  %v2076_v30 = vand.u32 3, %v2075_v33  ;;  %v7724_v20 = vpop.eup %5632  ;;  %vm1561_vm2 = vcmp.eq.s32.totalorder %v7682_v63, 2  ;;  %vm1974_vm4 = vcmp.eq.s32.totalorder %v1972_v41, 0 }
 0x2a9   : > { %vm1977_vm7 = vcmp.eq.s32.totalorder %v1972_v41, 2  ;;  %v2079_v1 = vxor.u32 2147483648, %v9349_v32  ;;  %v2175_v55 = vsel %vm6900_vm0, 0, %v9350_v57  ;;  %v1976_v5 = vsel %vm1974_vm4, %v6965_v26, %v1975_v7 }
 0x2aa   : > { %v1645_v53 = vor.u32 4788187, %v1644_v25  ;;  %v1979_v48 = vsel %vm1977_vm7, %v1978_v38, %v7012_v15  ;;  %v2082_v29 = vxor.u32 2147483648, %v9352_v56  ;;  %v7734_v13 = vpop.eup %5634  ;;  %vm1558_vm9 = vcmp.eq.s32.totalorder %v7682_v63, 0 }
 0x2ab   : > { %v7739_v33 = vsel %vm1866_vm1, nan, %v1876_v42  ;;  %v622_v24 = vsel %vm621_vm14, %v7670_v10, %v620_v52  ;;  %v624_v39 = vand.u32 2147483648, %v7670_v10  ;;  %v2179_v58 = vadd.s32 3, %v2175_v55 }
 0x2ac   : > { %v5637_v26 = vpop.eup %5636  ;;  %v1646_v7 = vand.u32 2147483647, %v1645_v53  ;;  %v1648_v15 = vcvt.s32.f32 %v1641_v4  ;;  %vm1973_vm0 = vcmp.lt.s32.totalorder %v1972_v41, 2  ;;  %vm2078_vm11 = vcmp.eq.s32.totalorder %v2076_v30, 0  ;;  %v9353_v4 = vld [vmem:[#allocation12_spill] sm:$0xff]  ;;  %v9354_v41 = vld [vmem:[#allocation10_spill] sm:$0xff] }
 0x2ad   : > { %v5639_v38 = vpop.eup %5638  ;;  %vm623_vm8 = vcmp.eq.f32.partialorder %v7670_v10, 0.0  ;;  %v1980_v45 = vsel %vm1973_vm0, %v1976_v5, %v1979_v48  ;;  %v2080_v31 = vsel %vm2078_vm11, %v9352_v56, %v2079_v1  ;;  %vm2081_vm1 = vcmp.eq.s32.totalorder %v2076_v30, 2 }
 0x2ae   : > { %v1562_v42 = vxor.u32 2147483648, %v5637_v26  ;;  %v1649_v25 = vmul.f32 %v1648_v15, %v1646_v7  ;;  %v625_v57 = vsel %vm623_vm8, %v624_v39, %v622_v24  ;;  %v2083_v52 = vsel %vm2081_vm1, %v2082_v29, %v9349_v32  ;;  %v9355_v32 = vld [vmem:[#allocation45_spill] sm:$0xff]  ;;  %v9356_v24 = vld [vmem:[#allocation43_spill] sm:$0xff] }
 0x2af   : > { %vm1557_vm14 = vcmp.lt.s32.totalorder %v7682_v63, 2  ;;  %vm1970_vm4 = vweird.f32 %v9353_v4  ;;  %vm2074_vm7 = vweird.f32 %v9354_v41  ;;  %v2180_v55 = vand.u32 3, %v2179_v58  ;;  %v9359_v4 = vld [vmem:[#allocation44_spill] sm:$0xff]  ;;  %v9362_v39 = vld [vmem:[#allocation47_spill] sm:$0xff] }
 0x2b0   : > { %v1559_v10 = vxor.u32 2147483648, %v5639_v38  ;;  %v1650_v53 = vxor.u32 2147483648, %v1649_v25  ;;  %v7753_v5 = vsel %vm1970_vm4, nan, %v1980_v45  ;;  %vm2077_vm0 = vcmp.lt.s32.totalorder %v2076_v30, 2  ;;  %v7755_v1 = vpop.eup %5640 }
 0x2b1   : > { %v627_v48 = vmax.f32 %v625_v57, 1e-12  ;;  %v2084_v56 = vsel %vm2077_vm0, %v2080_v31, %v2083_v52  ;;  %v2183_v29 = vxor.u32 2147483648, %v9355_v32  ;;  %v2279_v7 = vsel %vm6925_vm5, 0, %v9356_v24 }
 0x2b2   : > { %v1563_v15 = vsel %vm1561_vm2, %v1562_v42, %v5639_v38  ;;  %vm9358_vm11 = vcmp.lt.s32.totalorder %v9307_v43, 0  ;;  %v2186_v45 = vxor.u32 2147483648, %v9359_v4  ;;  %v2283_v44 = vadd.s32 3, %v2279_v7 }
 0x2b3   : > { %v1651_v58 = vsel %vm9358_vm11, %v1650_v53, %v1649_v25  ;;  %vm2182_vm8 = vcmp.eq.s32.totalorder %v2180_v55, 0  ;;  %vm2185_vm1 = vcmp.eq.s32.totalorder %v2180_v55, 2  ;;  %v2383_v31 = vsel %vm7107_vm3, 0, %v7165_v60 }
 0x2b4   : > { %v1654_v30 = vsel %vm7655_vm15, %v9307_v43, %v1651_v58  ;;  %vm1554_vm5 = vweird.f32 %v6149_v59  ;;  %v1560_v38 = vsel %vm1558_vm9, %v5637_v26, %v1559_v10  ;;  %v2284_v42 = vand.u32 3, %v2283_v44  ;;  %v9361_v44 = vld [vmem:[#allocation48_spill] sm:$0xff]  ;;  %v9372_v59 = vld [vmem:[#allocation11_spill] sm:$0xff] }
 0x2b5   : > { %5642 = vcosq.f32 %v1654_v30  ;;  %v2387_v25 = vadd.s32 3, %v2383_v31  ;;  %v2287_v57 = vxor.u32 2147483648, %v7199_v6  ;;  %v2290_v51 = vxor.u32 2147483648, %v7096_v12  ;;  %v9366_v31 = vld [vmem:[#allocation51_spill] sm:$0xff] }
 0x2b6   : > { %5644 = vsinq.f32 %v1654_v30  ;;  %v2487_v53 = vsel %vm7129_vm13, 0, %v7170_v9  ;;  %v7782_v35 = vsel %vm2074_vm7, nan, %v2084_v56  ;;  %v2184_v60 = vsel %vm2182_vm8, %v9359_v4, %v2183_v29  ;;  %v9363_v9 = vld [vmem:[#allocation22_spill] sm:$0xff]  ;;  %v9364_v29 = vld [vmem:[#allocation52_spill] sm:$0xff] }
 0x2b7   : > { %v2187_v26 = vsel %vm2185_vm1, %v2186_v45, %v9355_v32  ;;  %v2388_v10 = vand.u32 3, %v2387_v25  ;;  %5646 = vrcp.f32 %v627_v48  ;;  %v2391_v24 = vxor.u32 2147483648, %v9361_v44 }
 0x2b8   : > { %v2394_v7 = vxor.u32 2147483648, %v9362_v39  ;;  %v2491_v58 = vadd.s32 3, %v2487_v53  ;;  %v1564_v30 = vsel %vm1557_vm14, %v1560_v38, %v1563_v15  ;;  %vm1665_vm3 = vcmp.eq.s32.totalorder %v7720_v2, 2  ;;  %v9367_v38 = vld [vmem:[#allocation49_spill] sm:$0xff] }
 0x2b9   : > { %vm2178_vm13 = vweird.f32 %v9363_v9  ;;  %vm2181_vm15 = vcmp.lt.s32.totalorder %v2180_v55, 2  ;;  %vm2286_vm2 = vcmp.eq.s32.totalorder %v2284_v42, 0  ;;  %vm2289_vm9 = vcmp.eq.s32.totalorder %v2284_v42, 2 }
 0x2ba   : > { %vm1662_vm4 = vcmp.eq.s32.totalorder %v7720_v2, 0  ;;  %v2188_v41 = vsel %vm2181_vm15, %v2184_v60, %v2187_v26  ;;  %v2288_v48 = vsel %vm2286_vm2, %v7096_v12, %v2287_v57  ;;  %v2291_v56 = vsel %vm2289_vm9, %v2290_v51, %v7199_v6  ;;  %v9365_v12 = vld [vmem:[#allocation25_spill] sm:$0xff]  ;;  %v9369_v26 = vld [vmem:[#allocation50_spill] sm:$0xff] }
 0x2bb   : > { %v2492_v32 = vand.u32 3, %v2491_v58  ;;  %vm1661_vm7 = vcmp.lt.s32.totalorder %v7720_v2, 2  ;;  %vm2390_vm0 = vcmp.eq.s32.totalorder %v2388_v10, 0  ;;  %vm2393_vm11 = vcmp.eq.s32.totalorder %v2388_v10, 2  ;;  %v9371_v58 = vld [vmem:[#allocation14_spill] sm:$0xff] }
 0x2bc   : > { %v2495_v63 = vxor.u32 2147483648, %v7364_v8  ;;  %v2498_v15 = vxor.u32 2147483648, %v9364_v29  ;;  %v2392_v55 = vsel %vm2390_vm0, %v9362_v39, %v2391_v24  ;;  %v2395_v4 = vsel %vm2393_vm11, %v2394_v7, %v9361_v44 }
 0x2bd   : > { %vm2494_vm8 = vcmp.eq.s32.totalorder %v2492_v32, 0  ;;  %vm2497_vm1 = vcmp.eq.s32.totalorder %v2492_v32, 2  ;;  %vm2282_vm2 = vweird.f32 %v9365_v12  ;;  %vm9368_vm9 = vnez %v9367_v38 }
 0x2be   : > { %v2496_v6 = vsel %vm2494_vm8, %v9364_v29, %v2495_v63  ;;  %v2499_v45 = vsel %vm2497_vm1, %v2498_v15, %v7364_v8  ;;  %v2591_v25 = vsel %vm9368_vm9, 0, %v9366_v31  ;;  %v1565_v57 = vsel %vm1554_vm5, nan, %v1564_v30  ;;  %v9374_v15 = vld [vmem:[#allocation31_spill] sm:$0xff] }
 0x2bf   : > { %vm2285_vm14 = vcmp.lt.s32.totalorder %v2284_v42, 2  ;;  %vm2389_vm0 = vcmp.lt.s32.totalorder %v2388_v10, 2  ;;  %v2595_v51 = vadd.s32 3, %v2591_v25  ;;  %v5643_v52 = vpop.eup %5642  ;;  %vm2493_vm11 = vcmp.lt.s32.totalorder %v2492_v32, 2  ;;  %v9373_v32 = vld [vmem:[#allocation28_spill] sm:$0xff] }
 0x2c0   : > { %v2292_v53 = vsel %vm2285_vm14, %v2288_v48, %v2291_v56  ;;  %v2396_v60 = vsel %vm2389_vm0, %v2392_v55, %v2395_v4  ;;  %vm9370_vm15 = vnez %v9369_v26  ;;  %v5645_v24 = vpop.eup %5644  ;;  %v1666_v8 = vxor.u32 2147483648, %v5643_v52 }
 0x2c1   : > { %v2695_v44 = vsel %vm9370_vm15, 0, %v7478_v27  ;;  %v2500_v39 = vsel %vm2493_vm11, %v2496_v6, %v2499_v45  ;;  %v2596_v7 = vand.u32 3, %v2595_v51  ;;  %v2599_v63 = vxor.u32 2147483648, %v9371_v58  ;;  %v7817_v48 = vpop.eup %5646 }
 0x2c2   : > { %v1663_v29 = vxor.u32 2147483648, %v5645_v24  ;;  %v2602_v30 = vxor.u32 2147483648, %v9372_v59  ;;  %v2699_v42 = vadd.s32 3, %v2695_v44  ;;  %v2799_v10 = vsel %vm7460_vm12, 0, %v7512_v47 }
 0x2c3   : > { %v1667_v56 = vsel %vm1665_vm3, %v1666_v8, %v5645_v24  ;;  %v7823_v27 = vsel %vm2178_vm13, nan, %v2188_v41  ;;  %vm2386_vm5 = vweird.f32 %v9373_v32  ;;  %vm2490_vm14 = vweird.f32 %v9374_v15  ;;  %v5913_v15 = vld [vmem:[%s6020_s14 + $0x8] sm:$0xff] }
 0x2c4   : > { %v1664_v55 = vsel %vm1662_vm4, %v5643_v52, %v1663_v29  ;;  %v2293_v0 = vsel %vm2282_vm2, nan, %v2292_v53  ;;  %v7831_v47 = vsel %vm2386_vm5, nan, %v2396_v60  ;;  %v7833_v4 = vsel %vm2490_vm14, nan, %v2500_v39  ;;  %v9377_v60 = vld [vmem:[#allocation33_spill] sm:$0xff] }
 0x2c5   : > { %v1668_v6 = vsel %vm1661_vm7, %v1664_v55, %v1667_v56  ;;  %vm2598_vm12 = vcmp.eq.s32.totalorder %v2596_v7, 0  ;;  %vm2601_vm3 = vcmp.eq.s32.totalorder %v2596_v7, 2  ;;  %v2803_v9 = vadd.s32 3, %v2799_v10 }
 0x2c6   : > { %vm9375_vm13 = vweird.f32 %v9307_v43  ;;  %v2600_v45 = vsel %vm2598_vm12, %v9372_v59, %v2599_v63  ;;  %v2603_v31 = vsel %vm2601_vm3, %v2602_v30, %v9371_v58  ;;  %v2700_v38 = vand.u32 3, %v2699_v42 }
 0x2c7   : > { %v1669_v41 = vsel %vm9375_vm13, nan, %v1668_v6  ;;  %v3128_v25 = vpack.c.bf16 %v7782_v35, %v7753_v5  ;;  %v2703_v51 = vxor.u32 2147483648, %v7572_v21  ;;  %v2706_v2 = vxor.u32 2147483648, %v7536_v3 }
 0x2c8   : > { %v3126_v12 = vpack.c.bf16 %v1669_v41, %v1565_v57  ;;  %v3129_v52 = vpack.c.bf16 %v2293_v0, %v7823_v27  ;;  %vm2597_vm4 = vcmp.lt.s32.totalorder %v2596_v7, 2  ;;  %v2804_v53 = vand.u32 3, %v2803_v9 }
 0x2c9   : > { %v2903_v43 = vsel %vm7523_vm10, 0, %v7577_v54  ;;  %vm9376_vm7 = vcmask 392192   ;;  %v3130_v57 = vpack.c.bf16 %v7833_v4, %v7831_v47  ;;  %vm2594_vm8 = vweird.f32 %v9377_v60 }
 0x2ca   : > { %5351 = vmatprep.mubr.msk.bf16.mxu1 %vm9376_vm7, %v3126_v12  ;;  %v2604_v5 = vsel %vm2597_vm4, %v2600_v45, %v2603_v31  ;;  %v2807_v35 = vxor.u32 2147483648, %v7631_v49  ;;  %v2810_v26 = vxor.u32 2147483648, %v7627_v19  ;;  %v9378_v44 = vpack.c.bf16 %v7739_v33, %v7705_v17  ;;  %vm9379_vm1 = vmmov %vm9376_vm7 }
 0x2cb   : > { %vm2698_vm15 = vweird.f32 %v6893_v40  ;;  %vm2701_vm10 = vcmp.lt.s32.totalorder %v2700_v38, 2  ;;  %vm2702_vm2 = vcmp.eq.s32.totalorder %v2700_v38, 0  ;;  %vm2705_vm9 = vcmp.eq.s32.totalorder %v2700_v38, 2  ;;  %vm9380_vm0 = vmmov %vm9379_vm1 }
 0x2cc   : > { %5352 = vmatmul.mubr.msk.bf16.vlgmr.msra.gmra.mrb[0].mxu1 %vm9379_vm1, %v9378_v44  ;;  %v2907_v34 = vadd.s32 3, %v2903_v43  ;;  %v2704_v54 = vsel %vm2702_vm2, %v7536_v3, %v2703_v51  ;;  %v2707_v24 = vsel %vm2705_vm9, %v2706_v2, %v7572_v21  ;;  %v2911_v8 = vxor.u32 2147483648, %v7663_v36 }
 0x2cd   : > { %5355 = vmatprep.mubr.msk.bf16.mxu1 %vm9380_vm0, %v3128_v25  ;;  %v2914_v39 = vxor.u32 2147483648, %v7651_v14  ;;  %vm2806_vm11 = vcmp.eq.s32.totalorder %v2804_v53, 0  ;;  %vm2809_vm5 = vcmp.eq.s32.totalorder %v2804_v53, 2  ;;  %vm9381_vm14 = vnez %v9323_v61 }
 0x2ce   : > { %v2908_v17 = vand.u32 3, %v2907_v34  ;;  %v3007_v33 = vsel %vm9381_vm14, 0, %v7600_v11  ;;  %v2808_v7 = vsel %vm2806_vm11, %v7627_v19, %v2807_v35  ;;  %v2811_v58 = vsel %vm2809_vm5, %v2810_v26, %v7631_v49  ;;  %v5912_v49 = vld [vmem:[%s6020_s14] sm:$0xff] }
 0x2cf   : > { %v3011_v63 = vadd.s32 3, %v3007_v33  ;;  %v3111_v3 = vsel %vm7643_vm6, 0, %v7677_v22  ;;  %v2708_v21 = vsel %vm2701_vm10, %v2704_v54, %v2707_v24  ;;  %vm2805_vm12 = vcmp.lt.s32.totalorder %v2804_v53, 2  ;;  %vm9382_vm6 = vmmov %vm9380_vm0  ;;  %v9391_v53 = vld [vmem:[#allocation5_spill] sm:$0xff]  ;;  %v7921_v24 = vld [vmem:[%s9080_s5] ss:$0 sm:$0xff] }
 0x2d0   : > { %vm2910_vm3 = vcmp.eq.s32.totalorder %v2908_v17, 0  ;;  %vm2913_vm13 = vcmp.eq.s32.totalorder %v2908_v17, 2  ;;  %vm2909_vm4 = vcmp.lt.s32.totalorder %v2908_v17, 2  ;;  %v3115_v11 = vadd.s32 3, %v3111_v3  ;;  %vm9383_vm10 = vmmov %vm9380_vm0 }
 0x2d1   : > { %v2912_v29 = vsel %vm2910_vm3, %v7651_v14, %v2911_v8  ;;  %v2915_v61 = vsel %vm2913_vm13, %v2914_v39, %v7663_v36  ;;  %v2812_v59 = vsel %vm2805_vm12, %v2808_v7, %v2811_v58  ;;  %v3012_v30 = vand.u32 3, %v3011_v63  ;;  %vm9386_vm5 = vmmov %vm9382_vm6 }
 0x2d2   : > { %v2916_v19 = vsel %vm2909_vm4, %v2912_v29, %v2915_v61  ;;  %v629_v42 = vmul.f32 %v5912_v49, %v7724_v20  ;;  %v3015_v18 = vxor.u32 2147483648, %v7715_v50  ;;  %v3018_v22 = vxor.u32 2147483648, %v7708_v28  ;;  %vm9387_vm3 = vmmov %vm9386_vm5 }
 0x2d3   : > { %v3119_v10 = vxor.u32 2147483648, %v7755_v1  ;;  %v3122_v56 = vxor.u32 2147483648, %v7734_v13  ;;  %v2605_v14 = vsel %vm2594_vm8, nan, %v2604_v5  ;;  %vm2802_vm7 = vweird.f32 %v6955_v23  ;;  %vm9388_vm13 = vmmov %vm9387_vm3 }
 0x2d4   : > { %5356 = vmatmul.mubr.msk.bf16.gmra.mrb[4].mxu1 %vm9382_vm6, %v3129_v52  ;;  %vm2906_vm1 = vweird.f32 %v7103_v37  ;;  %v3116_v36 = vand.u32 3, %v3115_v11  ;;  %634 = vperm.xlu0 %5553, %v629_v42   ;;  %v2709_v20 = vsel %vm2698_vm15, nan, %v2708_v21  ;;  %v2813_v27 = vsel %vm2802_vm7, nan, %v2812_v59 }
 0x2d5   : > { %5359 = vmatprep.mubr.msk.bf16.mxu1 %vm9383_vm10, %v3130_v57  ;;  %v2917_v32 = vsel %vm2906_vm1, nan, %v2916_v19  ;;  %v631_v55 = vmul.f32 %v5913_v15, %v7817_v48  ;;  %vm3014_vm2 = vcmp.eq.s32.totalorder %v3012_v30, 0  ;;  %vm3017_vm9 = vcmp.eq.s32.totalorder %v3012_v30, 2 }
 0x2d6   : > { %vm3118_vm0 = vcmp.eq.s32.totalorder %v3116_v36, 0  ;;  %vm3121_vm8 = vcmp.eq.s32.totalorder %v3116_v36, 2  ;;  %v3016_v23 = vsel %vm3014_vm2, %v7708_v28, %v3015_v18  ;;  %v3019_v37 = vsel %vm3017_vm9, %v3018_v22, %v7715_v50 }
 0x2d7   : > { %v3120_v0 = vsel %vm3118_vm0, %v7734_v13, %v3119_v10  ;;  %v3123_v47 = vsel %vm3121_vm8, %v3122_v56, %v7755_v1  ;;  %639 = vperm.xlu1 %5554, %v631_v55   ;;  %v3131_v40 = vpack.c.bf16 %v2709_v20, %v2605_v14  ;;  %v9384_v4 = vmov 2  }
 0x2d8   : > { %5557 = vset.pattern.permute.xlu0 %v9384_v4  ;;  %v3132_v6 = vpack.c.bf16 %v2917_v32, %v2813_v27  ;;  %vm3013_vm15 = vcmp.lt.s32.totalorder %v3012_v30, 2  ;;  %vm3117_vm11 = vcmp.lt.s32.totalorder %v3116_v36, 2  ;;  %v9385_v41 = vmov 1  }
 0x2d9   : > { %v3020_v48 = vsel %vm3013_vm15, %v3016_v23, %v3019_v37  ;;  %v3124_v9 = vsel %vm3117_vm11, %v3120_v0, %v3123_v47  ;;  %vm3010_vm14 = vweird.f32 %v7158_v16  ;;  %vm3114_vm12 = vweird.f32 %v7265_v46  ;;  %v9389_v16 = vld [vmem:[#allocation3_spill] sm:$0xff]  ;;  %v9390_v46 = vld [vmem:[#allocation4_spill] sm:$0xff] }
 0x2da   : > { %v3021_v28 = vsel %vm3010_vm14, nan, %v3020_v48  ;;  %v3125_v50 = vsel %vm3114_vm12, nan, %v3124_v9  ;;  %vm5934_vm8 = vmmov 0  }
 0x2db   : > { %5555 = vset.pattern.permute.xlu1 %v9385_v41  ;;  %v3133_v13 = vpack.c.bf16 %v3125_v50, %v3021_v28 }
 0x2dc   : > { %5360 = vmatmul.mubr.msk.bf16.gmra.mrb[8].mxu1 %vm9386_vm5, %v3131_v40  ;;  %645 = vperm.xlu1 %5555, %v629_v42   ;;  %vm9410_vm5 = vcmask 195584  }
 0x2dd   : > { %5363 = vmatprep.mubr.msk.bf16.mxu1 %vm9387_vm3, %v3132_v6 }
 0x2e0   : > { %649 = vperm.xlu1 %5555, %v631_v55  }
 0x2e4   : > { %5364 = vmatmul.mubr.msk.bf16.gmra.mrb[12].mxu1 %vm9388_vm13, %v3133_v13  ;;  %5556 = vset.pattern.permute.xlu1 %v9384_v4 }
 0x2e5   : > { %657 = vperm.xlu1 %5556, %v629_v42  }
 0x2e9   : > { %661 = vperm.xlu1 %5556, %v631_v55  }
 0x353   : > { %v635_v38 = vpop.permute.xlu0 %634 }
 0x354   : > { %v642_v25 = vmul.f32 %v635_v38, %v9390_v46 }
 0x356   : > { %v640_v1 = vpop.permute.xlu1 %639 }
 0x357   : > { %v643_v57 = vmul.f32 %v640_v1, %v9390_v46 }
 0x35b   : > { %v646_v45 = vpop.permute.xlu1 %645 }
 0x35c   : > { %v652_v12 = vmul.f32 %v646_v45, %v9389_v16 }
 0x35e   : > { %v654_v2 = vadd.f32 %v652_v12, %v642_v25 }
 0x35f   : > { %v650_v31 = vpop.permute.xlu1 %649 }
 0x360   : > { %v653_v52 = vmul.f32 %v650_v31, %v9389_v16 }
 0x362   : > { %v655_v35 = vadd.f32 %v653_v52, %v643_v57 }
 0x364   : > { %v658_v51 = vpop.permute.xlu1 %657 }
 0x365   : > { %v664_v43 = vmul.f32 %v658_v51, %v9391_v53 }
 0x367   : > { %v7909_v60 = vadd.f32 %v664_v43, %v654_v2 }
 0x368   : > { %v662_v5 = vpop.permute.xlu1 %661 }
 0x369   : > { %v665_v26 = vmul.f32 %v662_v5, %v9391_v53  ;;  %v668_v44 = vadd.f32 1.5707964, %v7909_v60 }
 0x36b   : > { %v7913_v34 = vadd.f32 %v665_v26, %v655_v35  ;;  %672 = vrot.lane.b32.xlu1 %v668_v44, %s5925_s23 }
 0x36d   : > { %v669_v54 = vadd.f32 1.5707964, %v7913_v34 }
 0x36f   : > { %674 = vrot.lane.b32.xlu1 %v669_v54, %s5925_s23 }
 0x39f   : > { %v5353_v8 = vpop.f32.mrb[0].mxu1 }
 0x3a0   : > { %v7924_v39 = vadd.f32 %v5353_v8, %v7921_v24  ;;  %v3223_v17 = vpop.f32.mrb[1].mxu1 }
 0x3a1   : > { %v7927_v33 = vadd.f32 %v7921_v24, %v3223_v17  ;;  %v5354_v7 = vpop.f32.mrb[2].mxu1 }
 0x3a2   : > { %v3304_v58 = vand.u32 2147483647, %v7924_v39  ;;  %v7931_v63 = vadd.f32 %v5354_v7, %v7921_v24  ;;  %v3226_v3 = vpop.f32.mrb[3].mxu1  ;;  %v3288_v16 = vmax.f32 %v7924_v39, 0.0 }
 0x3a3   : > { %v3302_v21 = vand.u32 2147483647, %v7927_v33  ;;  %v7935_v29 = vadd.f32 %v7921_v24, %v3226_v3  ;;  %v3286_v52 = vmax.f32 %v7927_v33, 0.0 }
 0x3a4   : > { %v3320_v61 = vmul.f32 -10.0, %v3304_v58  ;;  %v3305_v11 = vand.u32 2147483647, %v7931_v63  ;;  %v3289_v5 = vmax.f32 %v7931_v63, 0.0 }
 0x3a5   : > { %v3318_v59 = vmul.f32 -10.0, %v3302_v21  ;;  %v3303_v19 = vand.u32 2147483647, %v7935_v29  ;;  %v3287_v35 = vmax.f32 %v7935_v29, 0.0 }
 0x3a6   : > { %v3338_v30 = vmul.f32 1.442695, %v3320_v61  ;;  %v3321_v49 = vmul.f32 -10.0, %v3305_v11 }
 0x3a7   : > { %v3334_v42 = vmul.f32 1.442695, %v3318_v59  ;;  %v3319_v18 = vmul.f32 -10.0, %v3303_v19  ;;  %v5357_v22 = vpop.f32.mrb[4].mxu1 }
 0x3a8   : > { %5648 = vpow2.f32 %v3338_v30  ;;  %v3340_v10 = vmul.f32 1.442695, %v3321_v49  ;;  %v7940_v56 = vadd.f32 %v5357_v22, %v7921_v24  ;;  %v3239_v14 = vpop.f32.mrb[5].mxu1 }
 0x3a9   : > { %5650 = vpow2.f32 %v3334_v42  ;;  %v3336_v36 = vmul.f32 1.442695, %v3319_v18  ;;  %v7943_v20 = vadd.f32 %v7921_v24, %v3239_v14  ;;  %v5358_v27 = vpop.f32.mrb[6].mxu1 }
 0x3aa   : > { %5652 = vpow2.f32 %v3340_v10  ;;  %v3308_v32 = vand.u32 2147483647, %v7940_v56  ;;  %v7947_v15 = vadd.f32 %v5358_v27, %v7921_v24  ;;  %v3242_v55 = vpop.f32.mrb[7].mxu1  ;;  %v3292_v58 = vmax.f32 %v7940_v56, 0.0 }
 0x3ab   : > { %5654 = vpow2.f32 %v3336_v36  ;;  %v3306_v23 = vand.u32 2147483647, %v7943_v20  ;;  %v7951_v37 = vadd.f32 %v7921_v24, %v3242_v55  ;;  %v3290_v61 = vmax.f32 %v7943_v20, 0.0 }
 0x3ac   : > { %v3324_v0 = vmul.f32 -10.0, %v3308_v32  ;;  %v3309_v47 = vand.u32 2147483647, %v7947_v15  ;;  %v3293_v30 = vmax.f32 %v7947_v15, 0.0 }
 0x3ad   : > { %v3322_v40 = vmul.f32 -10.0, %v3306_v23  ;;  %v3307_v4 = vand.u32 2147483647, %v7951_v37  ;;  %v3291_v49 = vmax.f32 %v7951_v37, 0.0 }
 0x3ae   : > { %v3346_v6 = vmul.f32 1.442695, %v3324_v0  ;;  %v3325_v48 = vmul.f32 -10.0, %v3309_v47 }
 0x3af   : > { %v3342_v9 = vmul.f32 1.442695, %v3322_v40  ;;  %v3323_v41 = vmul.f32 -10.0, %v3307_v4  ;;  %v5361_v28 = vpop.f32.mrb[8].mxu1 }
 0x3b0   : > { %5656 = vpow2.f32 %v3346_v6  ;;  %v3348_v50 = vmul.f32 1.442695, %v3325_v48  ;;  %v7956_v13 = vadd.f32 %v5361_v28, %v7921_v24  ;;  %v3255_v1 = vpop.f32.mrb[9].mxu1 }
 0x3b1   : > { %5658 = vpow2.f32 %v3342_v9  ;;  %v3344_v45 = vmul.f32 1.442695, %v3323_v41  ;;  %v5362_v31 = vpop.f32.mrb[10].mxu1  ;;  %v7978_v10 = vadd.f32 %v7921_v24, %v3255_v1 }
 0x3b2   : > { %v5649_v38 = vpop.eup %5648  ;;  %5660 = vpow2.f32 %v3348_v50  ;;  %v3312_v12 = vand.u32 2147483647, %v7956_v13  ;;  %v7960_v46 = vpop.f32.mrb[11].mxu1  ;;  %v7987_v23 = vadd.f32 %v5362_v31, %v7921_v24 }
 0x3b3   : > { %v5651_v25 = vpop.eup %5650  ;;  %v3384_v51 = vadd.f32 1.0, %v5649_v38  ;;  %v3387_v2 = vmul.f32 -0.5, %v5649_v38  ;;  %5662 = vpow2.f32 %v3344_v45  ;;  %v3390_v44 = vand.u32 2147483647, %v5649_v38 }
 0x3b4   : > { %v5653_v53 = vpop.eup %5652  ;;  %v3366_v43 = vadd.f32 1.0, %v5651_v25  ;;  %v3369_v57 = vmul.f32 -0.5, %v5651_v25  ;;  %v3328_v8 = vmul.f32 -10.0, %v3312_v12  ;;  %v3372_v17 = vand.u32 2147483647, %v5651_v25 }
 0x3b5   : > { %v5655_v26 = vpop.eup %5654  ;;  %5664 = vlog2.f32 %v3384_v51  ;;  %v3393_v54 = vadd.f32 1.0, %v5653_v53  ;;  %v3396_v7 = vmul.f32 -0.5, %v5653_v53  ;;  %v3388_v3 = vadd.f32 1.0, %v3387_v2 }
 0x3b6   : > { %5666 = vlog2.f32 %v3366_v43  ;;  %v3375_v21 = vadd.f32 1.0, %v5655_v26  ;;  %v3370_v59 = vadd.f32 1.0, %v3369_v57  ;;  %v3378_v19 = vmul.f32 -0.5, %v5655_v26 }
 0x3b7   : > { %5668 = vlog2.f32 %v3393_v54  ;;  %v7967_v11 = vpop.f32.mrb[12].mxu1  ;;  %vm7973_vm4 = vcmp.lt.f32.partialorder %v3390_v44, 0.0004427343  ;;  %v3354_v22 = vmul.f32 1.442695, %v3328_v8  ;;  %v3397_v32 = vadd.f32 1.0, %v3396_v7 }
 0x3b8   : > { %v7971_v42 = vpop.f32.mrb[13].mxu1  ;;  %5670 = vlog2.f32 %v3375_v21  ;;  %vm7982_vm6 = vcmp.lt.f32.partialorder %v3372_v17, 0.0004427343  ;;  %v3399_v55 = vand.u32 2147483647, %v5653_v53  ;;  %v3389_v40 = vmul.f32 %v5649_v38, %v3388_v3 }
 0x3b9   : > { %v7980_v14 = vpop.f32.mrb[14].mxu1  ;;  %5672 = vpow2.f32 %v3354_v22  ;;  %v3371_v9 = vmul.f32 %v5651_v25, %v3370_v59  ;;  %v3379_v41 = vadd.f32 1.0, %v3378_v19  ;;  %v3381_v28 = vand.u32 2147483647, %v5655_v26 }
 0x3ba   : > { %v5657_v36 = vpop.eup %5656  ;;  %v7989_v0 = vpop.f32.mrb[15].mxu1  ;;  %v3398_v31 = vmul.f32 %v5653_v53, %v3397_v32  ;;  %vm7993_vm7 = vcmp.lt.f32.partialorder %v3399_v55, 0.0004427343  ;;  %v3310_v44 = vand.u32 2147483647, %v7978_v10  ;;  %v8056_v29 = vadd.f32 %v7921_v24, %v7960_v46 }
 0x3bb   : > { %v5659_v47 = vpop.eup %5658  ;;  %v3420_v4 = vadd.f32 1.0, %v5657_v36  ;;  %v3423_v6 = vmul.f32 -0.5, %v5657_v36  ;;  %v3426_v45 = vand.u32 2147483647, %v5657_v36  ;;  %v3380_v17 = vmul.f32 %v5655_v26, %v3379_v41 }
 0x3bc   : > { %v5661_v48 = vpop.eup %5660  ;;  %v3402_v50 = vadd.f32 1.0, %v5659_v47  ;;  %v3405_v12 = vmul.f32 -0.5, %v5659_v47  ;;  %v3408_v38 = vand.u32 2147483647, %v5659_v47  ;;  %vm7999_vm1 = vcmp.lt.f32.partialorder %v3381_v28, 0.0004427343 }
 0x3bd   : > { %v7991_v1 = vpop.eup %5662  ;;  %5674 = vlog2.f32 %v3420_v4  ;;  %v3429_v51 = vadd.f32 1.0, %v5661_v48  ;;  %v3424_v57 = vadd.f32 1.0, %v3423_v6  ;;  %v3432_v53 = vmul.f32 -0.5, %v5661_v48 }
 0x3be   : > { %5676 = vlog2.f32 %v3402_v50  ;;  %v3411_v25 = vadd.f32 1.0, %v7991_v1  ;;  %vm8003_vm10 = vcmp.lt.f32.partialorder %v3426_v45, 0.0004427343  ;;  %v3406_v19 = vadd.f32 1.0, %v3405_v12 }
 0x3bf   : > { %v5665_v43 = vpop.eup %5664  ;;  %5678 = vlog2.f32 %v3429_v51  ;;  %v3435_v22 = vand.u32 2147483647, %v5661_v48  ;;  %vm8009_vm2 = vcmp.lt.f32.partialorder %v3408_v38, 0.0004427343  ;;  %v3414_v4 = vmul.f32 -0.5, %v7991_v1 }
 0x3c0   : > { %v5667_v54 = vpop.eup %5666  ;;  %v3386_v8 = vmul.f32 0.6931472, %v5665_v43  ;;  %5680 = vlog2.f32 %v3411_v25  ;;  %v3425_v50 = vmul.f32 %v5657_v36, %v3424_v57  ;;  %v3326_v45 = vmul.f32 -10.0, %v3310_v44 }
 0x3c1   : > { %v5669_v3 = vpop.eup %5668  ;;  %v3368_v21 = vmul.f32 0.6931472, %v5667_v54  ;;  %v3407_v25 = vmul.f32 %v5659_v47, %v3406_v19  ;;  %vm8020_vm9 = vcmp.lt.f32.partialorder %v3435_v22, 0.0004427343  ;;  %v3415_v36 = vadd.f32 1.0, %v3414_v4 }
 0x3c2   : > { %v3392_v32 = vsel %vm7973_vm4, %v3389_v40, %v3386_v8  ;;  %v3395_v55 = vmul.f32 0.6931472, %v5669_v3  ;;  %v5671_v6 = vpop.eup %5670  ;;  %v3433_v40 = vadd.f32 1.0, %v3432_v53  ;;  %v3350_v8 = vmul.f32 1.442695, %v3326_v45 }
 0x3c3   : > { %v3513_v41 = vmul.f32 0.1, %v3392_v32  ;;  %v3374_v28 = vsel %vm7982_vm6, %v3371_v9, %v3368_v21  ;;  %v3377_v18 = vmul.f32 0.6931472, %v5671_v6  ;;  %v8018_v43 = vpop.eup %5672  ;;  %v3417_v9 = vand.u32 2147483647, %v7991_v1  ;;  %vm9419_vm6 = vmmov %vm9410_vm5 }
 0x3c4   : > { %v3511_v12 = vmul.f32 0.1, %v3374_v28  ;;  %v3401_v51 = vsel %vm7993_vm7, %v3398_v31, %v3395_v55  ;;  %v3456_v2 = vadd.f32 1.0, %v8018_v43  ;;  %5682 = vpow2.f32 %v3350_v8 }
 0x3c5   : > { %v3514_v38 = vmul.f32 0.1, %v3401_v51  ;;  %v3383_v27 = vsel %vm7999_vm1, %v3380_v17, %v3377_v18  ;;  %v8030_v57 = vadd.f32 %v3513_v41, %v3288_v16  ;;  %v3434_v3 = vmul.f32 %v5661_v48, %v3433_v40 }
 0x3c6   : > { %v3512_v44 = vmul.f32 0.1, %v3383_v27  ;;  %v8038_v17 = vadd.f32 %v3511_v12, %v3286_v52  ;;  %v3313_v21 = vand.u32 2147483647, %v7987_v23  ;;  %5684 = vlog2.f32 %v3456_v2 }
 0x3c7   : > { %v5675_v31 = vpop.eup %5674  ;;  %v8034_v47 = vadd.f32 %v3514_v38, %v3289_v5  ;;  %v3416_v52 = vmul.f32 %v7991_v1, %v3415_v36  ;;  %vm3418_vm0 = vcmp.lt.f32.partialorder %v3417_v9, 0.0004427343  ;;  %v3311_v28 = vand.u32 2147483647, %v8056_v29  ;;  %v5561_v9 = vld [vmem:[%s9083_s8] sm:$0xff]  }
 0x3c8   : > { %v5677_v53 = vpop.eup %5676  ;;  %v3422_v7 = vmul.f32 0.6931472, %v5675_v31  ;;  %v8045_v63 = vadd.f32 %v3512_v44, %v3287_v35  ;;  %v3329_v22 = vmul.f32 -10.0, %v3313_v21  ;;  %v8067_v46 = vadd.f32 %v7967_v11, %v7921_v24 }
 0x3c9   : > { %v5679_v19 = vpop.eup %5678  ;;  %v3544_v39 = vpack.c.bf16 %v8034_v47, %v8030_v57  ;;  %v3404_v16 = vmul.f32 0.6931472, %v5677_v53  ;;  %v3327_v51 = vmul.f32 -10.0, %v3311_v28  ;;  %v8075_v18 = vadd.f32 %v7921_v24, %v7971_v42  ;;  %v5568_v47 = vld [vmem:[%s9084_s9] sm:$0xff]  }
 0x3ca   : > { %v3428_v5 = vsel %vm8003_vm10, %v3425_v50, %v3422_v7  ;;  %v3431_v33 = vmul.f32 0.6931472, %v5679_v19  ;;  %v5681_v48 = vpop.eup %5680  ;;  %v3543_v32 = vpack.c.bf16 %v8045_v63, %v8038_v17  ;;  %v3356_v41 = vmul.f32 1.442695, %v3329_v22  ;;  %5391 = vmatprep.subr.bf16.mxu1 %v5568_v47  ;;  %v5570_v63 = vld [vmem:[%s9084_s9 + $0x10] sm:$0xff]  }
 0x3cb   : > { %v3517_v55 = vmul.f32 0.1, %v3428_v5  ;;  %v3410_v4 = vsel %vm8009_vm2, %v3407_v25, %v3404_v16  ;;  %v3413_v6 = vmul.f32 0.6931472, %v5681_v48  ;;  %v3316_v40 = vand.u32 2147483647, %v8067_v46  ;;  %5392 = vmatpush3.bf16.msra.mxu1 %v5568_v47 }
 0x3cc   : > { %v3515_v35 = vmul.f32 0.1, %v3410_v4  ;;  %v3437_v59 = vsel %vm8020_vm9, %v3434_v3, %v3431_v33  ;;  %5686 = vpow2.f32 %v3356_v41  ;;  %v3352_v38 = vmul.f32 1.442695, %v3327_v51  ;;  %v5562_v16 = vld [vmem:[%s9083_s8 + $0x8] sm:$0xff]  }
 0x3cd   : > { %v3518_v1 = vmul.f32 0.1, %v3437_v59  ;;  %v8063_v50 = vadd.f32 %v3517_v55, %v3292_v58  ;;  %v3419_v26 = vsel %vm3418_vm0, %v3416_v52, %v3413_v6  ;;  %v3459_v58 = vmul.f32 -0.5, %v8018_v43 }
 0x3ce   : > { %v3516_v12 = vmul.f32 0.1, %v3419_v26  ;;  %v8079_v56 = vadd.f32 %v3515_v35, %v3290_v61  ;;  %v8083_v11 = vpop.eup %5682  ;;  %v8093_v42 = vadd.f32 %v7980_v14, %v7921_v24  ;;  %v3332_v61 = vmul.f32 -10.0, %v3316_v40  ;;  %v5563_v26 = vld [vmem:[%s9083_s8 + $0x10] sm:$0xff]  }
 0x3cf   : > { %v8071_v45 = vadd.f32 %v3518_v1, %v3293_v30  ;;  %v3438_v20 = vadd.f32 1.0, %v8083_v11  ;;  %5688 = vpow2.f32 %v3352_v38  ;;  %v3314_v8 = vand.u32 2147483647, %v8075_v18 }
 0x3d0   : > { %v8089_v30 = vadd.f32 %v3516_v12, %v3291_v49  ;;  %v5685_v25 = vpop.eup %5684  ;;  %v8101_v37 = vadd.f32 %v7921_v24, %v7989_v0  ;;  %v3362_v49 = vmul.f32 1.442695, %v3332_v61  ;;  %v3460_v27 = vadd.f32 1.0, %v3459_v58 }
 0x3d1   : > { %v3546_v15 = vpack.c.bf16 %v8071_v45, %v8063_v50  ;;  %5690 = vlog2.f32 %v3438_v20  ;;  %v3330_v36 = vmul.f32 -10.0, %v3314_v8  ;;  %v3317_v14 = vand.u32 2147483647, %v8093_v42 }
 0x3d2   : > { %v3545_v54 = vpack.c.bf16 %v8089_v30, %v8079_v56  ;;  %v3458_v2 = vmul.f32 0.6931472, %v5685_v25  ;;  %v3462_v31 = vand.u32 2147483647, %v8018_v43  ;;  %v3441_v44 = vmul.f32 -0.5, %v8083_v11 }
 0x3d3   : > { %5692 = vpow2.f32 %v3362_v49  ;;  %v3358_v53 = vmul.f32 1.442695, %v3330_v36  ;;  %v3333_v7 = vmul.f32 -10.0, %v3317_v14  ;;  %v3315_v24 = vand.u32 2147483647, %v8101_v37 }
 0x3d4   : > { %v5933_v3 = vmov 0.0   ;;  %v3461_v21 = vmul.f32 %v8018_v43, %v3460_v27  ;;  %vm8117_vm15 = vcmp.lt.f32.partialorder %v3462_v31, 0.0004427343  ;;  %v3442_v22 = vadd.f32 1.0, %v3441_v44  ;;  %v8402_v30 = vld [vmem:[%s9082_s7] ss:$0 sm:$0xff] }
 0x3d5   : > { %5335 = vmatprep.subr.bf16.mxu0 %v5933_v3  ;;  %5694 = vpow2.f32 %v3358_v53  ;;  %5341 = vmatprep.mubr.msk.bf16.mxu0 %vm5934_vm8, %v5933_v3  ;;  %v3364_v33 = vmul.f32 1.442695, %v3333_v7  ;;  %v3331_v52 = vmul.f32 -10.0, %v3315_v24  ;;  %v3296_v48 = vmax.f32 %v7956_v13, 0.0 }
 0x3d6   : > { %v8110_v0 = vpop.eup %5686  ;;  %5336 = vmatpush3.bf16.msra.mxu0 %v5561_v9  ;;  %v3464_v43 = vsel %vm8117_vm15, %v3461_v21, %v3458_v2  ;;  %v3444_v55 = vand.u32 2147483647, %v8083_v11  ;;  %v3294_v59 = vmax.f32 %v7978_v10, 0.0  ;;  %v3297_v6 = vmax.f32 %v7987_v23, 0.0  ;;  %v8136_v10 = vld [vmem:[%s9081_s6] sm:$0xff]  }
 0x3d7   : > { %v3465_v19 = vadd.f32 1.0, %v8110_v0  ;;  %5337 = vmatprep.subr.bf16.mxu0 %v5933_v3  ;;  %v3360_v4 = vmul.f32 1.442695, %v3331_v52  ;;  %v3468_v41 = vmul.f32 -0.5, %v8110_v0  ;;  %v3295_v1 = vmax.f32 %v8056_v29, 0.0 }
 0x3d8   : > { %v3521_v12 = vmul.f32 0.1, %v3464_v43  ;;  %v3300_v58 = vmax.f32 %v8067_v46, 0.0  ;;  %v3443_v38 = vmul.f32 %v8083_v11, %v3442_v22  ;;  %v3471_v20 = vand.u32 2147483647, %v8110_v0 }
 0x3d9   : > { %5696 = vlog2.f32 %v3465_v19  ;;  %v5689_v35 = vpop.eup %5688  ;;  %v3298_v61 = vmax.f32 %v8075_v18, 0.0  ;;  %vm8141_vm11 = vcmp.lt.f32.partialorder %v3444_v55, 0.0004427343  ;;  %v3469_v14 = vadd.f32 1.0, %v3468_v41 }
 0x3da   : > { %5698 = vpow2.f32 %v3364_v33  ;;  %5338 = vmatpush3.bf16.msra.mxu0 %v5562_v16  ;;  %v3447_v51 = vadd.f32 1.0, %v5689_v35  ;;  %v3450_v49 = vmul.f32 -0.5, %v5689_v35  ;;  %v8151_v2 = vadd.f32 %v3521_v12, %v3296_v48 }
 0x3db   : > { %v5691_v13 = vpop.eup %5690  ;;  %5700 = vpow2.f32 %v3360_v4  ;;  %5339 = vmatprep.subr.bf16.mxu0 %v5933_v3  ;;  %v3453_v31 = vand.u32 2147483647, %v5689_v35  ;;  %v3301_v44 = vmax.f32 %v8093_v42, 0.0  ;;  %v3299_v53 = vmax.f32 %v8101_v37, 0.0 }
 0x3dc   : > { %v3440_v40 = vmul.f32 0.6931472, %v5691_v13  ;;  %5702 = vlog2.f32 %v3447_v51  ;;  %vm8156_vm14 = vcmp.lt.f32.partialorder %v3471_v20, 0.0004427343  ;;  %v3451_v19 = vadd.f32 1.0, %v3450_v49 }
 0x3dd   : > { %v673_v28 = vpop.permute.xlu1 %672  ;;  %v5693_v25 = vpop.eup %5692  ;;  %v3470_v52 = vmul.f32 %v8110_v0, %v3469_v14  ;;  %vm8163_vm12 = vcmp.lt.f32.partialorder %v3453_v31, 0.0004427343 }
 0x3de   : > { %v8147_v27 = vsel %vm9410_vm5, %v7909_v60, %v673_v28  ;;  %v3446_v36 = vsel %vm8141_vm11, %v3443_v38, %v3440_v40  ;;  %v3492_v11 = vadd.f32 1.0, %v5693_v25  ;;  %v3495_v9 = vmul.f32 -0.5, %v5693_v25  ;;  %5340 = vmatpush3.bf16.msra.mxu0 %v5563_v26 }
 0x3df   : > { %5367 = vmatprep.subr.bf16.mxu0 %v8136_v10  ;;  %v5695_v7 = vpop.eup %5694  ;;  %v680_v24 = vand.u32 2147483647, %v8147_v27  ;;  %v683_v3 = vand.u32 2139095040, %v8147_v27  ;;  %v3519_v21 = vmul.f32 0.1, %v3446_v36  ;;  %v3452_v20 = vmul.f32 %v5689_v35, %v3451_v19 }
 0x3e0   : > { %5704 = vlog2.f32 %v3492_v11  ;;  %v3498_v16 = vand.u32 2147483647, %v5693_v25  ;;  %v3474_v5 = vadd.f32 1.0, %v5695_v7  ;;  %v3496_v43 = vadd.f32 1.0, %v3495_v9 }
 0x3e1   : > { %v3477_v22 = vmul.f32 -0.5, %v5695_v7  ;;  %v684_v48 = vshrl.u32 %v683_v3, 23  ;;  %v3480_v28 = vand.u32 2147483647, %v5695_v7  ;;  %v687_v51 = vand.u32 8388607, %v680_v24  ;;  %v675_v60 = vpop.permute.xlu1 %674 }
 0x3e2   : > { %5706 = vlog2.f32 %v3474_v5  ;;  %v8169_v38 = vadd.f32 %v3519_v21, %v3294_v59  ;;  %vm8173_vm3 = vcmp.lt.f32.partialorder %v3498_v16, 0.0004427343  ;;  %v3497_v36 = vmul.f32 %v5693_v25, %v3496_v43 }
 0x3e3   : > { %v5697_v33 = vpop.eup %5696  ;;  %v5155_v12 = vadd.s32 4294967169, %v684_v48  ;;  %v3478_v14 = vadd.f32 1.0, %v3477_v22  ;;  %vm8177_vm13 = vcmp.lt.f32.partialorder %v3480_v28, 0.0004427343  ;;  %v688_v5 = vor.u32 8388608, %v687_v51 }
 0x3e4   : > { %v5699_v55 = vpop.eup %5698  ;;  %v3467_v4 = vmul.f32 0.6931472, %v5697_v33  ;;  %v8191_v23 = vsel %vm9419_vm6, %v7913_v34, %v675_v60  ;;  %vm682_vm6 = vcmp.lt.s32.totalorder %v8147_v27, 0 }
 0x3e5   : > { %v3501_v26 = vadd.f32 1.0, %v5699_v55  ;;  %v3504_v13 = vmul.f32 -0.5, %v5699_v55  ;;  %v5701_v40 = vpop.eup %5700  ;;  %v3507_v31 = vand.u32 2147483647, %v5699_v55  ;;  %v690_v21 = vadd.s32 1, %v5155_v12 }
 0x3e6   : > { %v3473_v0 = vsel %vm8156_vm14, %v3470_v52, %v3467_v4  ;;  %v5703_v11 = vpop.eup %5702  ;;  %v3483_v59 = vadd.f32 1.0, %v5701_v40  ;;  %v3486_v3 = vmul.f32 -0.5, %v5701_v40  ;;  %v3489_v33 = vand.u32 2147483647, %v5701_v40 }
 0x3e7   : > { %v3522_v49 = vmul.f32 0.1, %v3473_v0  ;;  %5708 = vlog2.f32 %v3501_v26  ;;  %v3449_v19 = vmul.f32 0.6931472, %v5703_v11  ;;  %v3505_v16 = vadd.f32 1.0, %v3504_v13 }
 0x3e8   : > { %5710 = vlog2.f32 %v3483_v59  ;;  %v3487_v25 = vadd.f32 1.0, %v3486_v3  ;;  %vm691_vm4 = vcmp.gt.s32.totalorder %v690_v21, 0  ;;  %v3479_v28 = vmul.f32 %v5695_v7, %v3478_v14 }
 0x3e9   : > { %v8183_v35 = vadd.f32 %v3522_v49, %v3297_v6  ;;  %v3455_v22 = vsel %vm8163_vm12, %v3452_v20, %v3449_v19  ;;  %v692_v48 = vsel %vm691_vm4, %v690_v21, 0  ;;  %v3506_v13 = vmul.f32 %v5699_v55, %v3505_v16 }
 0x3ea   : > { %v5705_v52 = vpop.eup %5704  ;;  %v3520_v6 = vmul.f32 0.1, %v3455_v22  ;;  %v8193_v26 = vshrl.u32 %v692_v48, 5  ;;  %vm8195_vm7 = vcmp.lt.f32.partialorder %v3507_v31, 0.0004427343  ;;  %v694_v51 = vand.u32 31, %v692_v48 }
 0x3eb   : > { %v3494_v4 = vmul.f32 0.6931472, %v5705_v52  ;;  %v8199_v0 = vshll.u32 %v688_v5, 8  ;;  %v3488_v49 = vmul.f32 %v5701_v40, %v3487_v25  ;;  %vm8207_vm1 = vcmp.lt.f32.partialorder %v3489_v33, 0.0004427343 }
 0x3ec   : > { %v5707_v41 = vpop.eup %5706  ;;  %v8203_v20 = vadd.f32 %v3520_v6, %v3295_v1  ;;  %v787_v55 = vand.u32 2139095040, %v8191_v23  ;;  %v695_v31 = vsub.s32 32, %v694_v51  ;;  %vm712_vm10 = vcmp.lt.s32.totalorder %v8193_v26, 1 }
 0x3ed   : > { %v3500_v34 = vsel %vm8173_vm3, %v3497_v36, %v3494_v4  ;;  %v3476_v11 = vmul.f32 0.6931472, %v5707_v41  ;;  %v697_v1 = vshll.u32 %v9211_v62, %v694_v51  ;;  %v9424_v59 = vmov 2475754826  }
 0x3ee   : > { %v3525_v14 = vmul.f32 0.1, %v3500_v34  ;;  %v700_v8 = vshll.u32 %v9424_v59, %v694_v51  ;;  %v9425_v36 = vmov 2131351028   ;;  %vm713_vm2 = vcmp.lt.s32.totalorder %v8193_v26, 2 }
 0x3ef   : > { %v703_v40 = vshll.u32 %v9425_v36, %v694_v51  ;;  %v3482_v60 = vsel %vm8177_vm13, %v3479_v28, %v3476_v11  ;;  %v698_v19 = vshrl.u32 %v9424_v59, %v695_v31  ;;  %v9426_v16 = vmov 2102212464  }
 0x3f0   : > { %v8221_v21 = vadd.f32 %v3525_v14, %v3300_v58  ;;  %v706_v5 = vshll.u32 %v9426_v16, %v694_v51  ;;  %v3523_v25 = vmul.f32 0.1, %v3482_v60  ;;  %v701_v52 = vshrl.u32 %v9425_v36, %v695_v31 }
 0x3f1   : > { %v5709_v3 = vpop.eup %5708  ;;  %v704_v22 = vshrl.u32 %v9426_v16, %v695_v31  ;;  %v699_v48 = vor.u32 %v698_v19, %v697_v1  ;;  %v9427_v6 = vmov 920167782   ;;  %v9428_v58 = vmov 1326507024  }
 0x3f2   : > { %v3503_v33 = vmul.f32 0.6931472, %v5709_v3  ;;  %v707_v4 = vshrl.u32 %v9427_v6, %v695_v31  ;;  %v709_v46 = vshll.u32 %v9427_v6, %v694_v51  ;;  %v710_v41 = vshrl.u32 %v9428_v58, %v695_v31  ;;  %v5711_v34 = vpop.eup %5710 }
 0x3f3   : > { %v696_v28 = vshrl.u32 %v9211_v62, %v695_v31  ;;  %v702_v14 = vor.u32 %v701_v52, %v700_v8  ;;  %v705_v11 = vor.u32 %v704_v22, %v703_v40  ;;  %v3485_v60 = vmul.f32 0.6931472, %v5711_v34 }
 0x3f4   : > { %v3509_v9 = vsel %vm8195_vm7, %v3506_v13, %v3503_v33  ;;  %v708_v43 = vor.u32 %v707_v4, %v706_v5  ;;  %v711_v29 = vor.u32 %v710_v41, %v709_v46  ;;  %v8237_v1 = vadd.f32 %v3523_v25, %v3298_v61 }
 0x3f5   : > { %v3526_v3 = vmul.f32 0.1, %v3509_v9  ;;  %vm714_vm9 = vcmp.lt.s32.totalorder %v8193_v26, 3  ;;  %vm715_vm0 = vcmp.lt.s32.totalorder %v8193_v26, 4  ;;  %v720_v12 = vsel %vm712_vm10, %v699_v48, %v702_v14 }
 0x3f6   : > { %v3491_v51 = vsel %vm8207_vm1, %v3488_v49, %v3485_v60  ;;  %v717_v31 = vsel %vm715_vm0, %v705_v11, 2102212464  ;;  %v721_v8 = vsel %vm715_vm0, %v708_v43, 920167782  ;;  %v716_v18 = vsel %vm712_vm10, %v696_v28, %v699_v48 }
 0x3f7   : > { %v8245_v13 = vadd.f32 %v3526_v3, %v3301_v44  ;;  %v3524_v40 = vmul.f32 0.1, %v3491_v51  ;;  %v722_v61 = vsel %vm714_vm9, %v705_v11, %v721_v8  ;;  %v724_v19 = vsel %vm712_vm10, %v702_v14, %v705_v11 }
 0x3f8   : > { %v718_v44 = vsel %vm714_vm9, %v702_v14, %v717_v31  ;;  %v723_v49 = vsel %vm713_vm2, %v720_v12, %v722_v61  ;;  %v725_v7 = vsel %vm715_vm0, %v711_v29, 1326507024  ;;  %v788_v48 = vshrl.u32 %v787_v55, 23 }
 0x3f9   : > { %v3550_v42 = vpack.c.bf16 %v8245_v13, %v8221_v21  ;;  %v8263_v5 = vadd.f32 %v3524_v40, %v3299_v53  ;;  %v726_v25 = vsel %vm714_vm9, %v708_v43, %v725_v7  ;;  %v719_v53 = vsel %vm713_vm2, %v716_v18, %v718_v44 }
 0x3fa   : > { %v8268_v33 = vmul.u32.u64.low %v8199_v0, %v723_v49  ;;  %v8269_v52 = vmul.u32.u64.high %v8199_v0, %v723_v49, %v8268_v33  ;;  %v727_v22 = vsel %vm713_vm2, %v724_v19, %v726_v25  ;;  %v5159_v43 = vadd.s32 4294967169, %v788_v48 }
 0x3fb   : > { %v3549_v4 = vpack.c.bf16 %v8263_v5, %v8237_v1  ;;  %v8277_v29 = vmul.u32.u64.low %v8199_v0, %v727_v22  ;;  %v8278_v37 = vmul.u32.u64.high %v8199_v0, %v727_v22, %v8277_v29  ;;  %v735_v34 = vmul.u32 %v8199_v0, %v719_v53 }
 0x3fc   : > { %v738_v46 = vadd.s32 1, %v8269_v52  ;;  %v794_v41 = vadd.s32 1, %v5159_v43  ;;  %v784_v9 = vand.u32 2147483647, %v8191_v23  ;;  %vm8321_vm7 = vcmp.le.f32.partialorder %v680_v24, 0.7853982 }
 0x3fd   : > { %vm737_vm8 = vc.u32 %v8278_v37, %v8268_v33  ;;  %vm786_vm1 = vcmp.lt.s32.totalorder %v8191_v23, 0  ;;  %v9432_v17 = vpack.c.bf16 %v8203_v20, %v8169_v38  ;;  %v9433_v57 = vpack.c.bf16 %v8183_v35, %v8151_v2 }
 0x3fe   : > { %v739_v55 = vsel %vm737_vm8, %v738_v46, %v8269_v52  ;;  %vm795_vm15 = vcmp.gt.s32.totalorder %v794_v41, 0  ;;  %v791_v26 = vand.u32 8388607, %v784_v9  ;;  %vm785_vm10 = vcmp.le.f32.partialorder %v784_v9, 0.7853982 }
 0x3ff   : > { %v740_v28 = vadd.s32 %v739_v55, %v735_v34  ;;  %v796_v14 = vsel %vm795_vm15, %v794_v41, 0 }
 0x400   : > { %v798_v11 = vand.u32 31, %v796_v14  ;;  %v797_v60 = vshrl.u32 %v796_v14, 5  ;;  %v792_v53 = vor.u32 8388608, %v791_v26 }
 0x401   : > { %v741_v3 = vadd.s32 536870912, %v740_v28 }
 0x402   : > { %v799_v12 = vsub.s32 32, %v798_v11  ;;  %v801_v0 = vshll.u32 %v9211_v62, %v798_v11  ;;  %v804_v31 = vshll.u32 %v9424_v59, %v798_v11  ;;  %v807_v8 = vshll.u32 %v9425_v36, %v798_v11 }
 0x403   : > { %v8290_v51 = vshrl.u32 %v741_v3, 30  ;;  %v810_v19 = vshll.u32 %v9426_v16, %v798_v11  ;;  %v813_v7 = vshll.u32 %v9427_v6, %v798_v11  ;;  %vm816_vm11 = vcmp.lt.s32.totalorder %v797_v60, 1 }
 0x404   : > { %v802_v40 = vshrl.u32 %v9424_v59, %v799_v12  ;;  %v805_v18 = vshrl.u32 %v9425_v36, %v799_v12  ;;  %v808_v61 = vshrl.u32 %v9426_v16, %v799_v12  ;;  %v811_v49 = vshrl.u32 %v9427_v6, %v799_v12 }
 0x405   : > { %v743_v44 = vshll.u32 %v8290_v51, 30  ;;  %v814_v25 = vshrl.u32 %v9428_v58, %v799_v12  ;;  %vm819_vm5 = vcmp.lt.s32.totalorder %v797_v60, 4  ;;  %v800_v16 = vshrl.u32 %v9211_v62, %v799_v12 }
 0x406   : > { %v803_v52 = vor.u32 %v802_v40, %v801_v0  ;;  %v806_v22 = vor.u32 %v805_v18, %v804_v31  ;;  %v809_v48 = vor.u32 %v808_v61, %v807_v8  ;;  %v812_v59 = vor.u32 %v811_v49, %v810_v19 }
 0x407   : > { %v744_v29 = vsub.s32 %v740_v28, %v743_v44  ;;  %v815_v43 = vor.u32 %v814_v25, %v813_v7  ;;  %vm818_vm14 = vcmp.lt.s32.totalorder %v797_v60, 3  ;;  %vm817_vm12 = vcmp.lt.s32.totalorder %v797_v60, 2 }
 0x408   : > { %v821_v46 = vsel %vm819_vm5, %v809_v48, 2102212464  ;;  %v824_v41 = vsel %vm816_vm11, %v803_v52, %v806_v22  ;;  %v825_v34 = vsel %vm819_vm5, %v812_v59, 920167782  ;;  %v828_v55 = vsel %vm816_vm11, %v806_v22, %v809_v48 }
 0x409   : > { %v746_v36 = vsub.s32 0, %v744_v29  ;;  %v829_v6 = vsel %vm819_vm5, %v815_v43, 1326507024  ;;  %v826_v58 = vsel %vm818_vm14, %v809_v48, %v825_v34  ;;  %v832_v11 = vshll.u32 %v792_v53, 8 }
 0x40a   : > { %v820_v3 = vsel %vm816_vm11, %v800_v16, %v803_v52  ;;  %v822_v28 = vsel %vm818_vm14, %v806_v22, %v821_v46  ;;  %v827_v26 = vsel %vm817_vm12, %v824_v41, %v826_v58  ;;  %v830_v0 = vsel %vm818_vm14, %v812_v59, %v829_v6 }
 0x40b   : > { %v5156_v14 = vmin.u32 %v746_v36, %v744_v29  ;;  %v831_v8 = vsel %vm817_vm12, %v828_v55, %v830_v0  ;;  %v8304_v40 = vmul.u32.u64.low %v832_v11, %v827_v26  ;;  %v8305_v18 = vmul.u32.u64.high %v832_v11, %v827_v26, %v8304_v40 }
 0x40c   : > { %v8307_v62 = vmul.u32.u64.low %v832_v11, %v831_v8  ;;  %v8308_v12 = vmul.u32.u64.high %v832_v11, %v831_v8, %v8307_v62  ;;  %v823_v19 = vsel %vm817_vm12, %v820_v3, %v822_v28  ;;  %v736_v53 = vadd.s32 %v8268_v33, %v8278_v37 }
 0x40d   : > { %v748_v31 = vclz %v5156_v14  ;;  %v842_v44 = vadd.s32 1, %v8305_v18  ;;  %v839_v49 = vmul.u32 %v832_v11, %v823_v19  ;;  %vm772_vm5 = vweird.f32 %v8147_v27 }
 0x40e   : > { %vm841_vm13 = vc.u32 %v8308_v12, %v8304_v40  ;;  %v840_v33 = vadd.s32 %v8304_v40, %v8308_v12  ;;  %vm876_vm14 = vweird.f32 %v8191_v23  ;;  %vm3590_vm12 = vcmask 523264  }
 0x40f   : > { %v5157_v61 = vadd.s32 4294967294, %v748_v31  ;;  %v843_v25 = vsel %vm841_vm13, %v842_v44, %v8305_v18 }
 0x410   : > { %v844_v22 = vadd.s32 %v843_v25, %v839_v49 }
 0x411   : > { %vm5158_vm3 = vcmp.lt.s32.totalorder %v5157_v61, 0 }
 0x412   : > { %v751_v60 = vsel %vm5158_vm3, 0, %v5157_v61  ;;  %v845_v59 = vadd.s32 536870912, %v844_v22  ;;  %vm9431_vm3 = vcmask 392192  }
 0x413   : > { %v756_v7 = vsub.s32 4294967266, %v751_v60  ;;  %v752_v52 = vsub.s32 32, %v751_v60  ;;  %v753_v46 = vshll.u32 %v744_v29, %v751_v60 }
 0x414   : > { %v846_v16 = vshrl.u32 %v845_v59, 30 }
 0x415   : > { %v757_v48 = vadd.s32 127, %v756_v7  ;;  %v754_v36 = vshrl.u32 %v736_v53, %v752_v52  ;;  %v766_v7 = vsub.s32 4, %v8290_v51 }
 0x416   : > { %v847_v34 = vshll.u32 %v846_v16, 30 }
 0x417   : > { %v758_v43 = vshll.u32 %v757_v48, 23  ;;  %v755_v55 = vor.u32 %v754_v36, %v753_v46  ;;  %v870_v48 = vsub.s32 4, %v846_v16  ;;  %v767_v24 = vsel %vm682_vm6, %v766_v7, %v8290_v51 }
 0x418   : > { %v848_v6 = vsub.s32 %v844_v22, %v847_v34  ;;  %v769_v59 = vsel %vm8321_vm7, 0, %v767_v24 }
 0x419   : > { %v759_v41 = vor.u32 4788187, %v758_v43  ;;  %v762_v11 = vcvt.s32.f32 %v755_v55  ;;  %v871_v36 = vsel %vm786_vm1, %v870_v48, %v846_v16 }
 0x41a   : > { %v850_v58 = vsub.s32 0, %v848_v6  ;;  %v873_v34 = vsel %vm785_vm10, 0, %v871_v36 }
 0x41b   : > { %v760_v14 = vand.u32 2147483647, %v759_v41  ;;  %v773_v41 = vadd.s32 3, %v769_v59  ;;  %v877_v51 = vadd.s32 3, %v873_v34 }
 0x41c   : > { %v5160_v3 = vmin.u32 %v850_v58, %v848_v6 }
 0x41d   : > { %v763_v28 = vmul.f32 %v762_v11, %v760_v14  ;;  %v774_v14 = vand.u32 3, %v773_v41 }
 0x41e   : > { %v852_v26 = vclz %v5160_v3  ;;  %v878_v3 = vand.u32 3, %v877_v51 }
 0x41f   : > { %v764_v31 = vxor.u32 2147483648, %v763_v28  ;;  %vm776_vm2 = vcmp.eq.s32.totalorder %v774_v14, 0  ;;  %vm779_vm9 = vcmp.eq.s32.totalorder %v774_v14, 2  ;;  %vm775_vm0 = vcmp.lt.s32.totalorder %v774_v14, 2 }
 0x420   : > { %v5161_v0 = vadd.s32 4294967294, %v852_v26  ;;  %vm883_vm8 = vcmp.eq.s32.totalorder %v878_v3, 2  ;;  %vm880_vm15 = vcmp.eq.s32.totalorder %v878_v3, 0  ;;  %vm879_vm11 = vcmp.lt.s32.totalorder %v878_v3, 2 }
 0x421   : > { %v765_v29 = vsel %vm682_vm6, %v764_v31, %v763_v28 }
 0x422   : > { %vm5162_vm4 = vcmp.lt.s32.totalorder %v5161_v0, 0  ;;  %v768_v40 = vsel %vm8321_vm7, %v8147_v27, %v765_v29  ;;  %v5566_v27 = vld [vmem:[%s9081_s6 + $0x10] sm:$0xff]  }
 0x423   : > { %v855_v8 = vsel %vm5162_vm4, 0, %v5161_v0  ;;  %5712 = vcosq.f32 %v768_v40 }
 0x424   : > { %v856_v37 = vsub.s32 32, %v855_v8  ;;  %v860_v18 = vsub.s32 4294967266, %v855_v8  ;;  %v857_v62 = vshll.u32 %v848_v6, %v855_v8  ;;  %5714 = vsinq.f32 %v768_v40 }
 0x426   : > { %v858_v61 = vshrl.u32 %v840_v33, %v856_v37  ;;  %v861_v19 = vadd.s32 127, %v860_v18 }
 0x428   : > { %v859_v60 = vor.u32 %v858_v61, %v857_v62  ;;  %v862_v49 = vshll.u32 %v861_v19, 23  ;;  %v5565_v19 = vld [vmem:[%s9081_s6 + $0x8] sm:$0xff]  }
 0x42a   : > { %v863_v12 = vor.u32 4788187, %v862_v49  ;;  %v866_v52 = vcvt.s32.f32 %v859_v60 }
 0x42c   : > { %v864_v25 = vand.u32 2147483647, %v863_v12 }
 0x42d   : > { %v5713_v55 = vpop.eup %5712 }
 0x42e   : > { %v867_v22 = vmul.f32 %v866_v52, %v864_v25  ;;  %v5715_v6 = vpop.eup %5714  ;;  %v780_v11 = vxor.u32 2147483648, %v5713_v55 }
 0x42f   : > { %v777_v58 = vxor.u32 2147483648, %v5715_v6 }
 0x430   : > { %v868_v53 = vxor.u32 2147483648, %v867_v22  ;;  %v781_v9 = vsel %vm779_vm9, %v780_v11, %v5715_v6 }
 0x431   : > { %v778_v26 = vsel %vm776_vm2, %v5713_v55, %v777_v58 }
 0x432   : > { %v869_v43 = vsel %vm786_vm1, %v868_v53, %v867_v22  ;;  %v782_v8 = vsel %vm775_vm0, %v778_v26, %v781_v9 }
 0x433   : > { %v872_v46 = vsel %vm785_vm10, %v8191_v23, %v869_v43  ;;  %v783_v29 = vsel %vm772_vm5, nan, %v782_v8  ;;  %v5567_v23 = vld [vmem:[%s9081_s6 + $0x18] sm:$0xff]  }
 0x434   : > { %5716 = vcosq.f32 %v872_v46 }
 0x435   : > { %5718 = vsinq.f32 %v872_v46 }
 0x43e   : > { %v5717_v28 = vpop.eup %5716 }
 0x43f   : > { %v5719_v0 = vpop.eup %5718  ;;  %v884_v16 = vxor.u32 2147483648, %v5717_v28 }
 0x440   : > { %v881_v31 = vxor.u32 2147483648, %v5719_v0 }
 0x441   : > { %v885_v33 = vsel %vm883_vm8, %v884_v16, %v5719_v0 }
 0x442   : > { %v882_v37 = vsel %vm880_vm15, %v5717_v28, %v881_v31 }
 0x443   : > { %v886_v18 = vsel %vm879_vm11, %v882_v37, %v885_v33 }
 0x444   : > { %v887_v62 = vsel %vm876_vm14, nan, %v886_v18 }
 0x445   : > { %v888_v61 = vpack.c.bf16 %v887_v62, %v783_v29 }
 0x447   : > { %5342 = vmatmul.mubr.msk.bf16.vlgmr.msra.gmra.mrb[0].mxu0 %vm9431_vm3, %v888_v61 }
 0x448   : > { %5368 = vmatpush3.bf16.msra.mxu0 %v8136_v10  ;;  %5375 = vmatprep.mubr.msk.bf16.mxu0 %vm3590_vm12, %v3543_v32  ;;  %v5571_v32 = vld [vmem:[%s9084_s9 + $0x18] sm:$0xff]  }
 0x449   : > { %5369 = vmatprep.subr.bf16.mxu0 %v5565_v19 }
 0x44c   : > { %5370 = vmatpush3.bf16.msra.mxu0 %v5565_v19 }
 0x44d   : > { %5371 = vmatprep.subr.bf16.mxu0 %v5566_v27 }
 0x450   : > { %5372 = vmatpush3.bf16.msra.mxu0 %v5566_v27 }
 0x451   : > { %5373 = vmatprep.subr.bf16.mxu0 %v5567_v23 }
 0x454   : > { %5374 = vmatpush3.bf16.msra.mxu0 %v5567_v23 }
 0x457   : > { %5376 = vmatmul.mubr.msk.bf16.vlgmr.msra.gmra.mrb[4].mxu0 %vm3590_vm12, %v3544_v39  ;;  %v5569_v39 = vld [vmem:[%s9084_s9 + $0x8] sm:$0xff]  }
 0x458   : > { %5379 = vmatprep.mubr.msk.bf16.mxu0 %vm3590_vm12, %v3545_v54  ;;  %5393 = vmatprep.subr.bf16.mxu1 %v5569_v39 }
 0x459   : > { %5394 = vmatpush3.bf16.msra.mxu1 %v5569_v39 }
 0x45a   : > { %5395 = vmatprep.subr.bf16.mxu1 %v5570_v63 }
 0x45d   : > { %5396 = vmatpush3.bf16.msra.mxu1 %v5570_v63 }
 0x45e   : > { %5397 = vmatprep.subr.bf16.mxu1 %v5571_v32 }
 0x45f   : > { %5380 = vmatmul.mubr.msk.bf16.gmra.mrb[8].mxu0 %vm3590_vm12, %v3546_v15 }
 0x460   : > { %5383 = vmatprep.mubr.msk.bf16.mxu0 %vm3590_vm12, %v9432_v17 }
 0x461   : > { %5398 = vmatpush3.bf16.msra.mxu1 %v5571_v32 }
 0x467   : > { %5384 = vmatmul.mubr.msk.bf16.gmra.mrb[12].mxu0 %vm3590_vm12, %v9433_v57 }
 0x468   : > { %5387 = vmatprep.mubr.msk.bf16.mxu0 %vm3590_vm12, %v3549_v4 }
 0x46f   : > { %5388 = vmatmul.mubr.msk.bf16.gmra.mrb[16].mxu0 %vm3590_vm12, %v3550_v42 }
 0x51a   : > { %v8395_v50 = vpop.f32.mrb[0].mxu0 }
 0x51b   : > { %v5343_v45 = vpop.f32.mrb[1].mxu0 }
 0x51c   : > { %v8397_v56 = vpop.f32.mrb[2].mxu0 }
 0x51d   : > { %v5344_v15 = vpop.f32.mrb[3].mxu0 }
 0x52a   : > { %v5377_v54 = vpop.f32.mrb[4].mxu0 }
 0x52b   : > { %v8405_v10 = vadd.f32 %v5377_v54, %v8402_v30  ;;  %v3649_v2 = vpop.f32.mrb[5].mxu0 }
 0x52c   : > { %v8408_v38 = vadd.f32 %v8402_v30, %v3649_v2  ;;  %v5378_v35 = vpop.f32.mrb[6].mxu0 }
 0x52d   : > { %v3730_v20 = vand.u32 2147483647, %v8405_v10  ;;  %v8412_v21 = vadd.f32 %v5378_v35, %v8402_v30  ;;  %v3652_v1 = vpop.f32.mrb[7].mxu0  ;;  %v3714_v37 = vmax.f32 %v8405_v10, 0.0 }
 0x52e   : > { %v3728_v13 = vand.u32 2147483647, %v8408_v38  ;;  %v8416_v42 = vadd.f32 %v8402_v30, %v3652_v1  ;;  %v3712_v27 = vmax.f32 %v8408_v38, 0.0 }
 0x52f   : > { %v3746_v5 = vmul.f32 -10.0, %v3730_v20  ;;  %v3731_v4 = vand.u32 2147483647, %v8412_v21  ;;  %v3715_v47 = vmax.f32 %v8412_v21, 0.0 }
 0x530   : > { %v3744_v44 = vmul.f32 -10.0, %v3728_v13  ;;  %v3729_v60 = vand.u32 2147483647, %v8416_v42  ;;  %v3713_v39 = vmax.f32 %v8416_v42, 0.0 }
 0x531   : > { %v3764_v49 = vmul.f32 1.442695, %v3746_v5  ;;  %v3747_v40 = vmul.f32 -10.0, %v3731_v4 }
 0x532   : > { %v3760_v12 = vmul.f32 1.442695, %v3744_v44  ;;  %v3745_v7 = vmul.f32 -10.0, %v3729_v60  ;;  %v5381_v25 = vpop.f32.mrb[8].mxu0 }
 0x533   : > { %5720 = vpow2.f32 %v3764_v49  ;;  %v3766_v52 = vmul.f32 1.442695, %v3747_v40  ;;  %v8421_v22 = vadd.f32 %v5381_v25, %v8402_v30  ;;  %v3665_v48 = vpop.f32.mrb[9].mxu0 }
 0x534   : > { %5722 = vpow2.f32 %v3760_v12  ;;  %v3762_v24 = vmul.f32 1.442695, %v3745_v7  ;;  %v8424_v53 = vadd.f32 %v8402_v30, %v3665_v48  ;;  %v5382_v59 = vpop.f32.mrb[10].mxu0 }
 0x535   : > { %5724 = vpow2.f32 %v3766_v52  ;;  %v3734_v43 = vand.u32 2147483647, %v8421_v22  ;;  %v8428_v36 = vadd.f32 %v5382_v59, %v8402_v30  ;;  %v3668_v46 = vpop.f32.mrb[11].mxu0  ;;  %v3718_v45 = vmax.f32 %v8421_v22, 0.0 }
 0x536   : > { %5726 = vpow2.f32 %v3762_v24  ;;  %v3732_v41 = vand.u32 2147483647, %v8424_v53  ;;  %v8432_v34 = vadd.f32 %v8402_v30, %v3668_v46  ;;  %v3716_v60 = vmax.f32 %v8424_v53, 0.0 }
 0x537   : > { %v3750_v55 = vmul.f32 -10.0, %v3734_v43  ;;  %v3735_v6 = vand.u32 2147483647, %v8428_v36  ;;  %v3719_v49 = vmax.f32 %v8428_v36, 0.0 }
 0x538   : > { %v3748_v51 = vmul.f32 -10.0, %v3732_v41  ;;  %v3733_v14 = vand.u32 2147483647, %v8432_v34  ;;  %v3717_v12 = vmax.f32 %v8432_v34, 0.0 }
 0x539   : > { %v3772_v58 = vmul.f32 1.442695, %v3750_v55  ;;  %v3751_v11 = vmul.f32 -10.0, %v3735_v6 }
 0x53a   : > { %v3768_v3 = vmul.f32 1.442695, %v3748_v51  ;;  %v3749_v28 = vmul.f32 -10.0, %v3733_v14  ;;  %v5385_v26 = vpop.f32.mrb[12].mxu0 }
 0x53b   : > { %5728 = vpow2.f32 %v3772_v58  ;;  %v3774_v9 = vmul.f32 1.442695, %v3751_v11  ;;  %v8437_v0 = vadd.f32 %v5385_v26, %v8402_v30  ;;  %v3681_v16 = vpop.f32.mrb[13].mxu0 }
 0x53c   : > { %5730 = vpow2.f32 %v3768_v3  ;;  %v3770_v31 = vmul.f32 1.442695, %v3749_v28  ;;  %v5386_v8 = vpop.f32.mrb[14].mxu0  ;;  %v8455_v25 = vadd.f32 %v8402_v30, %v3681_v16 }
 0x53d   : > { %v5721_v33 = vpop.eup %5720  ;;  %5732 = vpow2.f32 %v3774_v9  ;;  %v3738_v18 = vand.u32 2147483647, %v8437_v0  ;;  %v8441_v29 = vpop.f32.mrb[15].mxu0  ;;  %v8464_v46 = vadd.f32 %v5386_v8, %v8402_v30 }
 0x53e   : > { %v5723_v62 = vpop.eup %5722  ;;  %v3810_v61 = vadd.f32 1.0, %v5721_v33  ;;  %v3813_v19 = vmul.f32 -0.5, %v5721_v33  ;;  %5734 = vpow2.f32 %v3770_v31  ;;  %v3816_v54 = vand.u32 2147483647, %v5721_v33 }
 0x53f   : > { %v5725_v23 = vpop.eup %5724  ;;  %v3792_v17 = vadd.f32 1.0, %v5723_v62  ;;  %v3795_v57 = vmul.f32 -0.5, %v5723_v62  ;;  %v3754_v15 = vmul.f32 -10.0, %v3738_v18  ;;  %v3798_v2 = vand.u32 2147483647, %v5723_v62 }
 0x540   : > { %v5727_v63 = vpop.eup %5726  ;;  %5736 = vlog2.f32 %v3810_v61  ;;  %v3819_v32 = vadd.f32 1.0, %v5725_v23  ;;  %v3822_v35 = vmul.f32 -0.5, %v5725_v23  ;;  %v3814_v20 = vadd.f32 1.0, %v3813_v19 }
 0x541   : > { %5738 = vlog2.f32 %v3792_v17  ;;  %v3796_v1 = vadd.f32 1.0, %v3795_v57  ;;  %v3801_v13 = vadd.f32 1.0, %v5727_v63  ;;  %v3825_v4 = vand.u32 2147483647, %v5725_v23 }
 0x542   : > { %5740 = vlog2.f32 %v3819_v32  ;;  %v8447_v5 = vpop.f32.mrb[16].mxu0  ;;  %v3804_v44 = vmul.f32 -0.5, %v5727_v63  ;;  %v3780_v7 = vmul.f32 1.442695, %v3754_v15  ;;  %vm8459_vm13 = vcmp.lt.f32.partialorder %v3816_v54, 0.0004427343 }
 0x543   : > { %v8451_v40 = vpop.f32.mrb[17].mxu0  ;;  %5742 = vlog2.f32 %v3801_v13  ;;  %v3823_v59 = vadd.f32 1.0, %v3822_v35  ;;  %v3807_v43 = vand.u32 2147483647, %v5727_v63  ;;  %v3815_v6 = vmul.f32 %v5721_v33, %v3814_v20 }
 0x544   : > { %v8457_v52 = vpop.f32.mrb[18].mxu0  ;;  %v3797_v51 = vmul.f32 %v5723_v62, %v3796_v1  ;;  %vm8468_vm4 = vcmp.lt.f32.partialorder %v3798_v2, 0.0004427343  ;;  %vm8472_vm6 = vcmp.lt.f32.partialorder %v3825_v4, 0.0004427343  ;;  %v3805_v28 = vadd.f32 1.0, %v3804_v44 }
 0x545   : > { %v5729_v48 = vpop.eup %5728  ;;  %v8466_v41 = vpop.f32.mrb[19].mxu0  ;;  %5744 = vpow2.f32 %v3780_v7  ;;  %v3824_v33 = vmul.f32 %v5725_v23, %v3823_v59  ;;  %vm8478_vm7 = vcmp.lt.f32.partialorder %v3807_v43, 0.0004427343  ;;  %v3736_v57 = vand.u32 2147483647, %v8455_v25 }
 0x546   : > { %v5731_v55 = vpop.eup %5730  ;;  %v3846_v58 = vadd.f32 1.0, %v5729_v48  ;;  %v3849_v16 = vmul.f32 -0.5, %v5729_v48  ;;  %v3852_v31 = vand.u32 2147483647, %v5729_v48  ;;  %v3806_v54 = vmul.f32 %v5727_v63, %v3805_v28 }
 0x547   : > { %v5733_v11 = vpop.eup %5732  ;;  %v3828_v26 = vadd.f32 1.0, %v5731_v55  ;;  %v3831_v62 = vmul.f32 -0.5, %v5731_v55  ;;  %v3834_v19 = vand.u32 2147483647, %v5731_v55  ;;  %v8525_v38 = vadd.f32 %v8402_v30, %v8441_v29 }
 0x548   : > { %v8476_v9 = vpop.eup %5734  ;;  %5746 = vlog2.f32 %v3846_v58  ;;  %v3855_v8 = vadd.f32 1.0, %v5733_v11  ;;  %v3858_v2 = vmul.f32 -0.5, %v5733_v11  ;;  %v3850_v1 = vadd.f32 1.0, %v3849_v16 }
 0x549   : > { %5748 = vlog2.f32 %v3828_v26  ;;  %v3837_v17 = vadd.f32 1.0, %v8476_v9  ;;  %v3840_v35 = vmul.f32 -0.5, %v8476_v9  ;;  %vm8485_vm1 = vcmp.lt.f32.partialorder %v3852_v31, 0.0004427343 }
 0x54a   : > { %v5737_v61 = vpop.eup %5736  ;;  %5750 = vlog2.f32 %v3855_v8  ;;  %v3832_v7 = vadd.f32 1.0, %v3831_v62  ;;  %v3861_v59 = vand.u32 2147483647, %v5733_v11  ;;  %vm8493_vm10 = vcmp.lt.f32.partialorder %v3834_v19, 0.0004427343 }
 0x54b   : > { %v5739_v32 = vpop.eup %5738  ;;  %v3812_v15 = vmul.f32 0.6931472, %v5737_v61  ;;  %5752 = vlog2.f32 %v3837_v17  ;;  %v3752_v26 = vmul.f32 -10.0, %v3736_v57  ;;  %v3859_v8 = vadd.f32 1.0, %v3858_v2 }
 0x54c   : > { %v5741_v23 = vpop.eup %5740  ;;  %v3794_v20 = vmul.f32 0.6931472, %v5739_v32  ;;  %v3841_v24 = vadd.f32 1.0, %v3840_v35  ;;  %v3851_v62 = vmul.f32 %v5729_v48, %v3850_v1  ;;  %v3833_v14 = vmul.f32 %v5731_v55, %v3832_v7 }
 0x54d   : > { %v3818_v4 = vsel %vm8459_vm13, %v3815_v6, %v3812_v15  ;;  %v3821_v44 = vmul.f32 0.6931472, %v5741_v23  ;;  %v5743_v43 = vpop.eup %5742  ;;  %v3776_v17 = vmul.f32 1.442695, %v3752_v26  ;;  %vm8503_vm2 = vcmp.lt.f32.partialorder %v3861_v59, 0.0004427343 }
 0x54e   : > { %v3938_v58 = vmul.f32 0.1, %v3818_v4  ;;  %v3800_v63 = vsel %vm8468_vm4, %v3797_v51, %v3794_v20  ;;  %v3803_v31 = vmul.f32 0.6931472, %v5743_v43  ;;  %v3843_v3 = vand.u32 2147483647, %v8476_v9 }
 0x54f   : > { %v3827_v16 = vsel %vm8472_vm6, %v3824_v33, %v3821_v44  ;;  %v3936_v6 = vmul.f32 0.1, %v3800_v63  ;;  %v8499_v32 = vpop.eup %5744  ;;  %5754 = vpow2.f32 %v3776_v17  ;;  %v3860_v18 = vmul.f32 %v5733_v11, %v3859_v8 }
 0x550   : > { %v3939_v61 = vmul.f32 0.1, %v3827_v16  ;;  %v3809_v51 = vsel %vm8478_vm7, %v3806_v54, %v3803_v31  ;;  %v3954_v57 = vadd.f32 %v3938_v58, %v3714_v37  ;;  %v3842_v55 = vmul.f32 %v8476_v9, %v3841_v24 }
 0x551   : > { %v3937_v15 = vmul.f32 0.1, %v3809_v51  ;;  %v3739_v54 = vand.u32 2147483647, %v8464_v46  ;;  %v3952_v20 = vadd.f32 %v3936_v6, %v3712_v27  ;;  %v3882_v4 = vadd.f32 1.0, %v8499_v32 }
 0x552   : > { %v5747_v33 = vpop.eup %5746  ;;  %v3955_v48 = vadd.f32 %v3939_v61, %v3715_v47  ;;  %vm3844_vm9 = vcmp.lt.f32.partialorder %v3843_v3, 0.0004427343  ;;  %v3737_v58 = vand.u32 2147483647, %v8525_v38  ;;  %v8535_v29 = vadd.f32 %v8447_v5, %v8402_v30 }
 0x553   : > { %v5749_v2 = vpop.eup %5748  ;;  %v3848_v35 = vmul.f32 0.6931472, %v5747_v33  ;;  %v3953_v10 = vadd.f32 %v3937_v15, %v3713_v39  ;;  %v3755_v11 = vmul.f32 -10.0, %v3739_v54  ;;  %v8542_v8 = vadd.f32 %v8402_v30, %v8451_v40 }
 0x554   : > { %v5751_v23 = vpop.eup %5750  ;;  %v3969_v1 = vpack.c.bf16 %v3955_v48, %v3954_v57  ;;  %v3830_v37 = vmul.f32 0.6931472, %v5749_v2  ;;  %v3753_v31 = vmul.f32 -10.0, %v3737_v58  ;;  %v8551_v36 = vadd.f32 %v8457_v52, %v8402_v30 }
 0x555   : > { %v3854_v21 = vsel %vm8485_vm1, %v3851_v62, %v3848_v35  ;;  %v3857_v47 = vmul.f32 0.6931472, %v5751_v23  ;;  %v5753_v44 = vpop.eup %5752  ;;  %v3968_v9 = vpack.c.bf16 %v3953_v10, %v3952_v20  ;;  %v3782_v13 = vmul.f32 1.442695, %v3755_v11 }
 0x556   : > { %v3942_v7 = vmul.f32 0.1, %v3854_v21  ;;  %v3836_v59 = vsel %vm8493_vm10, %v3833_v14, %v3830_v37  ;;  %v3839_v39 = vmul.f32 0.6931472, %v5753_v44  ;;  %v3778_v61 = vmul.f32 1.442695, %v3753_v31 }
 0x557   : > { %v3940_v42 = vmul.f32 0.1, %v3836_v59  ;;  %v3863_v27 = vsel %vm8503_vm2, %v3860_v18, %v3857_v47  ;;  %5399 = vmatprep.mubr.msk.bf16.mxu1 %vm3590_vm12, %v3968_v9  ;;  %5756 = vpow2.f32 %v3782_v13  ;;  %v3740_v53 = vand.u32 2147483647, %v8542_v8 }
 0x558   : > { %v3943_v43 = vmul.f32 0.1, %v3863_v27  ;;  %v3958_v63 = vadd.f32 %v3942_v7, %v3718_v45  ;;  %v3845_v28 = vsel %vm3844_vm9, %v3842_v55, %v3839_v39  ;;  %5400 = vmatmul.mubr.msk.bf16.vlgmr.msra.gmra.mrb[16].mxu1 %vm3590_vm12, %v3969_v1  ;;  %5758 = vlog2.f32 %v3882_v4 }
 0x559   : > { %v3941_v16 = vmul.f32 0.1, %v3845_v28  ;;  %v3956_v22 = vadd.f32 %v3940_v42, %v3716_v60  ;;  %v3742_v45 = vand.u32 2147483647, %v8535_v29  ;;  %v5755_v24 = vpop.eup %5754  ;;  %5760 = vpow2.f32 %v3778_v61 }
 0x55a   : > { %v3959_v26 = vadd.f32 %v3943_v43, %v3719_v49  ;;  %v3864_v49 = vadd.f32 1.0, %v5755_v24  ;;  %v8556_v60 = vadd.f32 %v8402_v30, %v8466_v41  ;;  %v3756_v51 = vmul.f32 -10.0, %v3740_v53 }
 0x55b   : > { %v3957_v6 = vadd.f32 %v3941_v16, %v3717_v12  ;;  %v3758_v62 = vmul.f32 -10.0, %v3742_v45  ;;  %v3743_v34 = vand.u32 2147483647, %v8551_v36  ;;  %v3885_v3 = vmul.f32 -0.5, %v8499_v32 }
 0x55c   : > { %v3971_v5 = vpack.c.bf16 %v3959_v26, %v3958_v63  ;;  %5762 = vlog2.f32 %v3864_v49  ;;  %v3784_v12 = vmul.f32 1.442695, %v3756_v51  ;;  %v3741_v14 = vand.u32 2147483647, %v8556_v60 }
 0x55d   : > { %v3970_v40 = vpack.c.bf16 %v3957_v6, %v3956_v22  ;;  %v3788_v17 = vmul.f32 1.442695, %v3758_v62  ;;  %v3759_v52 = vmul.f32 -10.0, %v3743_v34  ;;  %v3886_v48 = vadd.f32 1.0, %v3885_v3 }
 0x55e   : > { %v3757_v57 = vmul.f32 -10.0, %v3741_v14  ;;  %v3888_v35 = vand.u32 2147483647, %v8499_v32  ;;  %v3867_v18 = vmul.f32 -0.5, %v5755_v24  ;;  %v3870_v47 = vand.u32 2147483647, %v5755_v24 }
 0x55f   : > { %5403 = vmatprep.mubr.msk.bf16.mxu1 %vm3590_vm12, %v3970_v40  ;;  %5764 = vpow2.f32 %v3788_v17  ;;  %v3790_v41 = vmul.f32 1.442695, %v3759_v52  ;;  %v3887_v10 = vmul.f32 %v8499_v32, %v3886_v48  ;;  %v3722_v45 = vmax.f32 %v8437_v0, 0.0 }
 0x560   : > { %5404 = vmatmul.mubr.msk.bf16.gmra.mrb[20].mxu1 %vm3590_vm12, %v3971_v5  ;;  %5766 = vpow2.f32 %v3784_v12  ;;  %v3786_v15 = vmul.f32 1.442695, %v3757_v57  ;;  %vm8567_vm0 = vcmp.lt.f32.partialorder %v3888_v35, 0.0004427343  ;;  %v3868_v21 = vadd.f32 1.0, %v3867_v18 }
 0x561   : > { %v5757_v19 = vpop.eup %5756  ;;  %vm8574_vm8 = vcmp.lt.f32.partialorder %v3870_v47, 0.0004427343  ;;  %v3723_v61 = vmax.f32 %v8464_v46, 0.0  ;;  %v3720_v3 = vmax.f32 %v8455_v25, 0.0 }
 0x562   : > { %v3891_v33 = vadd.f32 1.0, %v5757_v19  ;;  %v5759_v30 = vpop.eup %5758  ;;  %v3894_v54 = vmul.f32 -0.5, %v5757_v19  ;;  %v3897_v59 = vand.u32 2147483647, %v5757_v19  ;;  %v3869_v39 = vmul.f32 %v5755_v24, %v3868_v21 }
 0x563   : > { %v5761_v2 = vpop.eup %5760  ;;  %v3884_v55 = vmul.f32 0.6931472, %v5759_v30 }
 0x564   : > { %5768 = vlog2.f32 %v3891_v33  ;;  %v3873_v23 = vadd.f32 1.0, %v5761_v2  ;;  %v3895_v44 = vadd.f32 1.0, %v3894_v54  ;;  %v3876_v42 = vmul.f32 -0.5, %v5761_v2 }
 0x565   : > { %5770 = vpow2.f32 %v3790_v41  ;;  %v3890_v11 = vsel %vm8567_vm0, %v3887_v10, %v3884_v55  ;;  %vm3898_vm15 = vcmp.lt.f32.partialorder %v3897_v59, 0.0004427343  ;;  %v3879_v24 = vand.u32 2147483647, %v5761_v2 }
 0x566   : > { %5772 = vpow2.f32 %v3786_v15  ;;  %v5763_v20 = vpop.eup %5762  ;;  %v3946_v58 = vmul.f32 0.1, %v3890_v11  ;;  %v3896_v28 = vmul.f32 %v5757_v19, %v3895_v44  ;;  %v3877_v16 = vadd.f32 1.0, %v3876_v42 }
 0x567   : > { %5774 = vlog2.f32 %v3873_v23  ;;  %v3866_v7 = vmul.f32 0.6931472, %v5763_v20  ;;  %vm3880_vm11 = vcmp.lt.f32.partialorder %v3879_v24, 0.0004427343  ;;  %v3721_v41 = vmax.f32 %v8525_v38, 0.0 }
 0x568   : > { %v3962_v40 = vadd.f32 %v3946_v58, %v3722_v45  ;;  %v3878_v12 = vmul.f32 %v5761_v2, %v3877_v16  ;;  %v3725_v45 = vmax.f32 %v8556_v60, 0.0  ;;  %v5574_v60 = vld [vmem:[%s9086_s11 + $0x10] sm:$0xff]  }
 0x569   : > { %v8564_v1 = vpop.eup %5764  ;;  %v3872_v26 = vsel %vm8574_vm8, %v3869_v39, %v3866_v7  ;;  %v3727_v39 = vmax.f32 %v8551_v36, 0.0  ;;  %v5572_v36 = vld [vmem:[%s9086_s11] sm:$0xff]  }
 0x56a   : > { %v3918_v4 = vadd.f32 1.0, %v8564_v1  ;;  %v5767_v9 = vpop.eup %5766  ;;  %v3921_v6 = vmul.f32 -0.5, %v8564_v1  ;;  %v3944_v53 = vmul.f32 0.1, %v3872_v26  ;;  %v3924_v46 = vand.u32 2147483647, %v8564_v1  ;;  %5415 = vmatprep.subr.bf16.mxu0 %v5572_v36  ;;  %5439 = vmatprep.subr.bf16.mxu1 %v5572_v36 }
 0x56b   : > { %v3900_v27 = vadd.f32 1.0, %v5767_v9  ;;  %v3903_v52 = vmul.f32 -0.5, %v5767_v9  ;;  %v3906_v23 = vand.u32 2147483647, %v5767_v9  ;;  %5416 = vmatpush3.bf16.msra.mxu0 %v5572_v36  ;;  %5443 = vmatpush3.bf16.msra.mxu1 %v5572_v36 }
 0x56c   : > { %5776 = vlog2.f32 %v3918_v4  ;;  %v3922_v14 = vadd.f32 1.0, %v3921_v6  ;;  %v3960_v15 = vadd.f32 %v3944_v53, %v3720_v3  ;;  %vm3925_vm5 = vcmp.lt.f32.partialorder %v3924_v46, 0.0004427343 }
 0x56d   : > { %5778 = vlog2.f32 %v3900_v27  ;;  %v3904_v35 = vadd.f32 1.0, %v3903_v52  ;;  %vm8587_vm14 = vcmp.lt.f32.partialorder %v3906_v23, 0.0004427343 }
 0x56e   : > { %v5769_v32 = vpop.eup %5768  ;;  %v3923_v54 = vmul.f32 %v8564_v1, %v3922_v14  ;;  %v8623_v14 = vld [vmem:[%s9085_s10] ss:$0 sm:$0xff] }
 0x56f   : > { %v5771_v43 = vpop.eup %5770  ;;  %v3893_v63 = vmul.f32 0.6931472, %v5769_v32  ;;  %v3905_v4 = vmul.f32 %v5767_v9, %v3904_v35  ;;  %v3726_v9 = vmax.f32 %v8535_v29, 0.0 }
 0x570   : > { %v3927_v31 = vadd.f32 1.0, %v5771_v43  ;;  %v5773_v22 = vpop.eup %5772  ;;  %v3930_v19 = vmul.f32 -0.5, %v5771_v43  ;;  %v3933_v25 = vand.u32 2147483647, %v5771_v43 }
 0x571   : > { %v3899_v5 = vsel %vm3898_vm15, %v3896_v28, %v3893_v63  ;;  %v5775_v62 = vpop.eup %5774  ;;  %v3909_v17 = vadd.f32 1.0, %v5773_v22  ;;  %v3912_v18 = vmul.f32 -0.5, %v5773_v22  ;;  %v3915_v59 = vand.u32 2147483647, %v5773_v22 }
 0x572   : > { %v3947_v49 = vmul.f32 0.1, %v3899_v5  ;;  %5780 = vlog2.f32 %v3927_v31  ;;  %v3875_v34 = vmul.f32 0.6931472, %v5775_v62  ;;  %v3931_v20 = vadd.f32 1.0, %v3930_v19 }
 0x573   : > { %5782 = vlog2.f32 %v3909_v17  ;;  %v3913_v11 = vadd.f32 1.0, %v3912_v18  ;;  %vm3934_vm3 = vcmp.lt.f32.partialorder %v3933_v25, 0.0004427343  ;;  %vm3916_vm13 = vcmp.lt.f32.partialorder %v3915_v59, 0.0004427343 }
 0x574   : > { %v3963_v51 = vadd.f32 %v3947_v49, %v3723_v61  ;;  %v3881_v30 = vsel %vm3880_vm11, %v3878_v12, %v3875_v34  ;;  %v3932_v7 = vmul.f32 %v5771_v43, %v3931_v20  ;;  %v3724_v31 = vmax.f32 %v8542_v8, 0.0  ;;  %v5573_v8 = vld [vmem:[%s9086_s11 + $0x8] sm:$0xff]   ;;  %v9454_v49 = vld [vmem:[#allocation6_spill] sm:$0xff] }
 0x575   : > { %v3945_v57 = vmul.f32 0.1, %v3881_v30  ;;  %v3914_v63 = vmul.f32 %v5773_v22, %v3913_v11  ;;  %5417 = vmatprep.subr.bf16.mxu0 %v5573_v8  ;;  %5440 = vmatprep.subr.bf16.mxu1 %v5573_v8  ;;  %v5575_v22 = vld [vmem:[%s9086_s11 + $0x18] sm:$0xff]   ;;  %v4145_v62 = vrot.slane %v8395_v50, %v9454_v49  ;;  %v4194_v18 = vrot.slane %v8397_v56, %v9454_v49 }
 0x576   : > { %v5777_v0 = vpop.eup %5776  ;;  %v3973_v33 = vpack.c.bf16 %v3963_v51, %v3962_v40  ;;  %5418 = vmatpush3.bf16.msra.mxu0 %v5573_v8  ;;  %5444 = vmatpush3.bf16.msra.mxu1 %v5573_v8  ;;  %v4138_v40 = vcombine.high %v8395_v50, %v8395_v50 }
 0x577   : > { %v3920_v48 = vmul.f32 0.6931472, %v5777_v0  ;;  %v5779_v2 = vpop.eup %5778  ;;  %v3961_v55 = vadd.f32 %v3945_v57, %v3721_v41  ;;  %5419 = vmatprep.subr.bf16.mxu0 %v5574_v60  ;;  %5441 = vmatprep.subr.bf16.mxu1 %v5574_v60  ;;  %v4153_v53 = vcombine.high %v4145_v62, %v4145_v62  ;;  %v4161_v17 = vrot.slane %v4145_v62, %v9454_v49 }
 0x578   : > { %v3902_v10 = vmul.f32 0.6931472, %v5779_v2  ;;  %v4152_v51 = vrot.slane %v4138_v40, %v9454_v49  ;;  %v4187_v57 = vcombine.high %v8397_v56, %v8397_v56 }
 0x579   : > { %v3972_v37 = vpack.c.bf16 %v3961_v55, %v3960_v15  ;;  %v3926_v21 = vsel %vm3925_vm5, %v3923_v54, %v3920_v48  ;;  %v4175_v34 = vrot.slane %v4153_v53, %v9454_v49  ;;  %v4183_v12 = vcombine.high %v4161_v17, %v4161_v17 }
 0x57a   : > { %v3950_v1 = vmul.f32 0.1, %v3926_v21  ;;  %v3908_v42 = vsel %vm8587_vm14, %v3905_v4, %v3902_v10  ;;  %5420 = vmatpush3.bf16.msra.mxu0 %v5574_v60  ;;  %5445 = vmatpush3.bf16.msra.mxu1 %v5574_v60  ;;  %v4154_v52 = vcombine.high %v4152_v51, %v4152_v51  ;;  %v4168_v3 = vrot.slane %v4152_v51, %v9454_v49 }
 0x57b   : > { %5407 = vmatprep.mubr.msk.bf16.mxu1 %vm3590_vm12, %v3972_v37  ;;  %v3948_v43 = vmul.f32 0.1, %v3908_v42  ;;  %5421 = vmatprep.subr.bf16.mxu0 %v5575_v22  ;;  %v4185_v19 = vcombine.high %v4175_v34, %v4175_v34  ;;  %v4201_v38 = vrot.slane %v4187_v57, %v9454_v49  ;;  %v8665_v60 = vrot.slane %v4194_v18, %v9454_v49 }
 0x57c   : > { %v5781_v47 = vpop.eup %5780  ;;  %5408 = vmatmul.mubr.msk.bf16.gmra.mrb[24].mxu1 %vm3590_vm12, %v3973_v33  ;;  %v3966_v28 = vadd.f32 %v3950_v1, %v3726_v9  ;;  %5442 = vmatprep.subr.bf16.mxu1 %v5575_v22  ;;  %v9455_v33 = vld [vmem:[#allocation2_spill] sm:$0xff]  ;;  %v4182_v41 = vrot.slane %v4154_v52, %v9454_v49 }
 0x57d   : > { %v3929_v44 = vmul.f32 0.6931472, %v5781_v47  ;;  %v5783_v27 = vpop.eup %5782  ;;  %v3964_v6 = vadd.f32 %v3948_v43, %v3724_v31  ;;  %v4247_v30 = vrot.slane %v4183_v12, %v9455_v33  ;;  %v4239_v15 = vrot.slane %v4161_v17, %v9455_v33 }
 0x57e   : > { %v3911_v58 = vmul.f32 0.6931472, %v5783_v27  ;;  %5422 = vmatpush3.bf16.msra.mxu0 %v5575_v22  ;;  %5446 = vmatpush3.bf16.msra.mxu1 %v5575_v22  ;;  %v4251_v54 = vrot.slane %v4185_v19, %v9455_v33  ;;  %v4243_v25 = vrot.slane %v4175_v34, %v9455_v33  ;;  %v4184_v47 = vcombine.high %v4168_v3, %v4168_v3 }
 0x57f   : > { %v3935_v32 = vsel %vm3934_vm3, %v3932_v7, %v3929_v44  ;;  %v4186_v11 = vcombine.high %v4182_v41, %v4182_v41  ;;  %v4202_v44 = vcombine.high %v4194_v18, %v4194_v18  ;;  %v4255_v9 = vrot.slane %v4168_v3, %v9455_v33 }
 0x580   : > { %v3951_v13 = vmul.f32 0.1, %v3935_v32  ;;  %v3917_v16 = vsel %vm3916_vm13, %v3914_v63, %v3911_v58  ;;  %v4259_v32 = vrot.slane %v4182_v41, %v9455_v33  ;;  %v4263_v63 = vrot.slane %v4184_v47, %v9455_v33 }
 0x581   : > { %v3949_v5 = vmul.f32 0.1, %v3917_v16  ;;  %v4203_v40 = vcombine.high %v4201_v38, %v4201_v38  ;;  %v8676_v19 = vrot.slane %v4201_v38, %v9454_v49  ;;  %v4271_v47 = vrot.slane %v8665_v60, %v9455_v33 }
 0x582   : > { %v3967_v26 = vadd.f32 %v3951_v13, %v3727_v39 }
 0x583   : > { %v3965_v61 = vadd.f32 %v3949_v5, %v3725_v45  ;;  %v4267_v45 = vrot.slane %v4186_v11, %v9455_v33  ;;  %v4287_v11 = vrot.slane %v8676_v19, %v9455_v33 }
 0x584   : > { %v3975_v24 = vpack.c.bf16 %v3967_v26, %v3966_v28 }
 0x585   : > { %v3974_v29 = vpack.c.bf16 %v3965_v61, %v3964_v6 }
 0x587   : > { %5411 = vmatprep.mubr.msk.bf16.mxu1 %vm3590_vm12, %v3974_v29 }
 0x588   : > { %5412 = vmatmul.mubr.msk.bf16.gmra.mrb[28].mxu1 %vm3590_vm12, %v3975_v24 }
 0x62b   : > { %v5401_v0 = vpop.f32.mrb[16].mxu1 }
 0x62c   : > { %v4082_v50 = vadd.f32 %v5401_v0, %v8623_v14  ;;  %v4073_v46 = vpop.f32.mrb[17].mxu1  ;;  %v8679_v0 = vrot.slane %v4202_v44, %v9454_v49 }
 0x62d   : > { %v4074_v48 = vadd.f32 %v8623_v14, %v4073_v46  ;;  %v5402_v35 = vpop.f32.mrb[18].mxu1  ;;  %v4232_v46 = vcombine.high %v8665_v60, %v8665_v60 }
 0x62e   : > { %v8635_v2 = vadd.f32 %v4247_v30, %v4082_v50  ;;  %v4085_v55 = vadd.f32 %v5402_v35, %v8623_v14  ;;  %v4076_v23 = vpop.f32.mrb[19].mxu1  ;;  %v8682_v30 = vrot.slane %v4203_v40, %v9454_v49  ;;  %v4234_v18 = vcombine.high %v8679_v0, %v8679_v0 }
 0x62f   : > { %v8639_v20 = vadd.f32 %v4239_v15, %v4074_v48  ;;  %v4077_v10 = vadd.f32 %v8623_v14, %v4076_v23  ;;  %v8691_v49 = vrot.slane %v4232_v46, %v9455_v33 }
 0x630   : > { %v4350_v37 = vand.u32 2147483647, %v8635_v2  ;;  %v8644_v21 = vadd.f32 %v4251_v54, %v4085_v55  ;;  %v4233_v55 = vcombine.high %v8676_v19, %v8676_v19  ;;  %v4235_v23 = vcombine.high %v8682_v30, %v8682_v30 }
 0x631   : > { %v4348_v56 = vand.u32 2147483647, %v8639_v20  ;;  %v8647_v4 = vadd.f32 %v4243_v25, %v4077_v10 }
 0x632   : > { %v4366_v7 = vmul.f32 -10.0, %v4350_v37  ;;  %v4351_v59 = vand.u32 2147483647, %v8644_v21 }
 0x633   : > { %v4364_v1 = vmul.f32 -10.0, %v4348_v56  ;;  %v4349_v42 = vand.u32 2147483647, %v8647_v4  ;;  %v5405_v27 = vpop.f32.mrb[20].mxu1  ;;  %v4275_v56 = vrot.slane %v8679_v0, %v9455_v33 }
 0x634   : > { %v4384_v39 = vmul.f32 1.442695, %v4366_v7  ;;  %v4367_v13 = vmul.f32 -10.0, %v4351_v59  ;;  %v4098_v58 = vadd.f32 %v5405_v27, %v8623_v14  ;;  %v4089_v43 = vpop.f32.mrb[21].mxu1  ;;  %v8705_v27 = vrot.slane %v4233_v55, %v9455_v33 }
 0x635   : > { %v4380_v28 = vmul.f32 1.442695, %v4364_v1  ;;  %v4365_v26 = vmul.f32 -10.0, %v4349_v42  ;;  %v4090_v16 = vadd.f32 %v8623_v14, %v4089_v43  ;;  %v5406_v31 = vpop.f32.mrb[22].mxu1  ;;  %v8702_v42 = vrot.slane %v4234_v18, %v9455_v33 }
 0x636   : > { %5784 = vpow2.f32 %v4384_v39  ;;  %v4386_v5 = vmul.f32 1.442695, %v4367_v13  ;;  %v8658_v24 = vadd.f32 %v4263_v63, %v4098_v58  ;;  %v4101_v6 = vadd.f32 %v5406_v31, %v8623_v14  ;;  %v4092_v61 = vpop.f32.mrb[23].mxu1 }
 0x637   : > { %5786 = vpow2.f32 %v4380_v28  ;;  %v4382_v29 = vmul.f32 1.442695, %v4365_v26  ;;  %v8661_v36 = vadd.f32 %v4255_v9, %v4090_v16  ;;  %v4093_v8 = vadd.f32 %v8623_v14, %v4092_v61 }
 0x638   : > { %5788 = vpow2.f32 %v4386_v5  ;;  %v4354_v22 = vand.u32 2147483647, %v8658_v24  ;;  %v8668_v62 = vadd.f32 %v4267_v45, %v4101_v6  ;;  %v4334_v9 = vmax.f32 %v8635_v2, 0.0 }
 0x639   : > { %5790 = vpow2.f32 %v4382_v29  ;;  %v4352_v53 = vand.u32 2147483647, %v8661_v36  ;;  %v8671_v17 = vadd.f32 %v4259_v32, %v4093_v8  ;;  %v8709_v39 = vrot.slane %v4235_v23, %v9455_v33 }
 0x63a   : > { %v4370_v51 = vmul.f32 -10.0, %v4354_v22  ;;  %v4355_v34 = vand.u32 2147483647, %v8668_v62  ;;  %v4332_v13 = vmax.f32 %v8639_v20, 0.0  ;;  %v4335_v28 = vmax.f32 %v8644_v21, 0.0 }
 0x63b   : > { %v4368_v12 = vmul.f32 -10.0, %v4352_v53  ;;  %v4353_v52 = vand.u32 2147483647, %v8671_v17  ;;  %v4333_v45 = vmax.f32 %v8647_v4, 0.0  ;;  %v4338_v5 = vmax.f32 %v8658_v24, 0.0 }
 0x63c   : > { %v4392_v3 = vmul.f32 1.442695, %v4370_v51  ;;  %v4371_v50 = vmul.f32 -10.0, %v4355_v34  ;;  %v4336_v6 = vmax.f32 %v8661_v36, 0.0  ;;  %v4337_v61 = vmax.f32 %v8671_v17, 0.0 }
 0x63d   : > { %v4388_v41 = vmul.f32 1.442695, %v4368_v12  ;;  %v4369_v57 = vmul.f32 -10.0, %v4353_v52 }
 0x63e   : > { %5792 = vpow2.f32 %v4392_v3  ;;  %v4394_v48 = vmul.f32 1.442695, %v4371_v50 }
 0x63f   : > { %5794 = vpow2.f32 %v4388_v41  ;;  %v4390_v15 = vmul.f32 1.442695, %v4369_v57 }
 0x640   : > { %v5785_v35 = vpop.eup %5784  ;;  %5796 = vpow2.f32 %v4394_v48 }
 0x641   : > { %v5787_v54 = vpop.eup %5786  ;;  %5798 = vpow2.f32 %v4390_v15  ;;  %v4430_v10 = vadd.f32 1.0, %v5785_v35  ;;  %v4433_v7 = vmul.f32 -0.5, %v5785_v35  ;;  %v4436_v63 = vand.u32 2147483647, %v5785_v35 }
 0x642   : > { %v5789_v25 = vpop.eup %5788  ;;  %v4412_v37 = vadd.f32 1.0, %v5787_v54  ;;  %v4415_v44 = vmul.f32 -0.5, %v5787_v54  ;;  %v4418_v58 = vand.u32 2147483647, %v5787_v54 }
 0x643   : > { %v5791_v38 = vpop.eup %5790  ;;  %5800 = vlog2.f32 %v4430_v10  ;;  %v4439_v59 = vadd.f32 1.0, %v5789_v25  ;;  %v4434_v26 = vadd.f32 1.0, %v4433_v7  ;;  %v4442_v16 = vmul.f32 -0.5, %v5789_v25 }
 0x644   : > { %5802 = vlog2.f32 %v4412_v37  ;;  %v4421_v1 = vadd.f32 1.0, %v5791_v38  ;;  %v4424_v32 = vmul.f32 -0.5, %v5791_v38  ;;  %v4416_v43 = vadd.f32 1.0, %v4415_v44 }
 0x645   : > { %5804 = vlog2.f32 %v4439_v59  ;;  %v4427_v22 = vand.u32 2147483647, %v5791_v38  ;;  %v4445_v40 = vand.u32 2147483647, %v5789_v25  ;;  %vm8722_vm4 = vcmp.lt.f32.partialorder %v4418_v58, 0.0004427343 }
 0x646   : > { %5806 = vlog2.f32 %v4421_v1  ;;  %v4425_v8 = vadd.f32 1.0, %v4424_v32  ;;  %vm8726_vm6 = vcmp.lt.f32.partialorder %v4436_v63, 0.0004427343  ;;  %v4417_v46 = vmul.f32 %v5787_v54, %v4416_v43 }
 0x647   : > { %v4435_v41 = vmul.f32 %v5785_v35, %v4434_v26  ;;  %v4443_v57 = vadd.f32 1.0, %v4442_v16  ;;  %vm8731_vm7 = vcmp.lt.f32.partialorder %v4427_v22, 0.0004427343  ;;  %vm8735_vm1 = vcmp.lt.f32.partialorder %v4445_v40, 0.0004427343 }
 0x648   : > { %v8713_v31 = vpop.eup %5792  ;;  %v4426_v10 = vmul.f32 %v5791_v38, %v4425_v8 }
 0x649   : > { %v5795_v29 = vpop.eup %5794  ;;  %v4469_v53 = vmul.f32 -0.5, %v8713_v31  ;;  %v4466_v48 = vadd.f32 1.0, %v8713_v31  ;;  %v4444_v63 = vmul.f32 %v5789_v25, %v4443_v57  ;;  %v4472_v38 = vand.u32 2147483647, %v8713_v31 }
 0x64a   : > { %v8720_v51 = vpop.eup %5796  ;;  %v4448_v12 = vadd.f32 1.0, %v5795_v29  ;;  %v4451_v52 = vmul.f32 -0.5, %v5795_v29  ;;  %v4454_v15 = vand.u32 2147483647, %v5795_v29 }
 0x64b   : > { %v5799_v50 = vpop.eup %5798  ;;  %v4470_v55 = vadd.f32 1.0, %v4469_v53  ;;  %v4475_v54 = vadd.f32 1.0, %v8720_v51  ;;  %v4481_v44 = vand.u32 2147483647, %v8720_v51  ;;  %vm8788_vm9 = vcmp.lt.f32.partialorder %v4472_v38, 0.0004427343 }
 0x64c   : > { %5808 = vlog2.f32 %v4448_v12  ;;  %v4457_v18 = vadd.f32 1.0, %v5799_v50  ;;  %v4452_v7 = vadd.f32 1.0, %v4451_v52  ;;  %v4460_v59 = vmul.f32 -0.5, %v5799_v50 }
 0x64d   : > { %v5801_v23 = vpop.eup %5800  ;;  %vm8741_vm10 = vcmp.lt.f32.partialorder %v4454_v15, 0.0004427343  ;;  %v4463_v16 = vand.u32 2147483647, %v5799_v50  ;;  %v8748_v40 = vmul.f32 %v8713_v31, %v4470_v55  ;;  %vm8802_vm0 = vcmp.lt.f32.partialorder %v4481_v44, 0.0004427343 }
 0x64e   : > { %v5803_v35 = vpop.eup %5802  ;;  %5810 = vlog2.f32 %v4457_v18  ;;  %v4432_v1 = vmul.f32 0.6931472, %v5801_v23  ;;  %v4453_v57 = vmul.f32 %v5795_v29, %v4452_v7 }
 0x64f   : > { %v5805_v32 = vpop.eup %5804  ;;  %v4414_v58 = vmul.f32 0.6931472, %v5803_v35  ;;  %5812 = vlog2.f32 %v4466_v48  ;;  %v4461_v48 = vadd.f32 1.0, %v4460_v59  ;;  %v5409_v15 = vpop.f32.mrb[24].mxu1  ;;  %vm8772_vm2 = vcmp.lt.f32.partialorder %v4463_v16, 0.0004427343 }
 0x650   : > { %v5807_v43 = vpop.eup %5806  ;;  %v4438_v8 = vsel %vm8726_vm6, %v4435_v41, %v4432_v1  ;;  %v4441_v22 = vmul.f32 0.6931472, %v5805_v32  ;;  %5814 = vlog2.f32 %v4475_v54  ;;  %v4114_v41 = vadd.f32 %v5409_v15, %v8623_v14  ;;  %v4105_v31 = vpop.f32.mrb[25].mxu1 }
 0x651   : > { %v4420_v53 = vsel %vm8722_vm4, %v4417_v46, %v4414_v58  ;;  %v4423_v25 = vmul.f32 0.6931472, %v5807_v43  ;;  %v4558_v12 = vmul.f32 0.1, %v4438_v8  ;;  %v4106_v23 = vadd.f32 %v8623_v14, %v4105_v31  ;;  %v5410_v54 = vpop.f32.mrb[26].mxu1 }
 0x652   : > { %v4556_v52 = vmul.f32 0.1, %v4420_v53  ;;  %v4447_v18 = vsel %vm8735_vm1, %v4444_v63, %v4441_v22  ;;  %v8766_v37 = vadd.f32 %v8691_v49, %v4114_v41  ;;  %v4108_v35 = vpop.f32.mrb[27].mxu1  ;;  %v4478_v59 = vmul.f32 -0.5, %v8720_v51 }
 0x653   : > { %v4429_v3 = vsel %vm8731_vm7, %v4426_v10, %v4423_v25  ;;  %v8759_v34 = vadd.f32 %v4558_v12, %v4334_v9  ;;  %v4559_v46 = vmul.f32 0.1, %v4447_v18  ;;  %v4117_v10 = vadd.f32 %v5410_v54, %v8623_v14 }
 0x654   : > { %v4572_v55 = vadd.f32 %v4556_v52, %v4332_v13  ;;  %v4557_v29 = vmul.f32 0.1, %v4429_v3  ;;  %v8779_v13 = vadd.f32 %v4271_v47, %v4106_v23  ;;  %v4109_v49 = vadd.f32 %v8623_v14, %v4108_v35 }
 0x655   : > { %v4758_v2 = vsub.f32 0.0, %v8759_v34  ;;  %v4575_v9 = vadd.f32 %v4559_v46, %v4335_v28  ;;  %v4462_v32 = vmul.f32 %v5799_v50, %v4461_v48  ;;  %v4358_v58 = vand.u32 2147483647, %v8766_v37 }
 0x656   : > { %v5809_v7 = vpop.eup %5808  ;;  %v8785_v21 = vadd.f32 %v8702_v42, %v4117_v10  ;;  %v4573_v47 = vadd.f32 %v4557_v29, %v4333_v45  ;;  %v4356_v63 = vand.u32 2147483647, %v8779_v13  ;;  %v8798_v50 = vadd.f32 %v4275_v56, %v4109_v49 }
 0x657   : > { %v4450_v1 = vmul.f32 0.6931472, %v5809_v7  ;;  %4808 = vrot.lane.b32.xlu0 %v4758_v2, %s5935_s21  ;;  %v4759_v42 = vsub.f32 0.0, %v4575_v9  ;;  %v4374_v8 = vmul.f32 -10.0, %v4358_v58  ;;  %v4756_v22 = vsub.f32 0.0, %v4572_v55 }
 0x658   : > { %v5811_v60 = vpop.eup %5810  ;;  %v4372_v45 = vmul.f32 -10.0, %v4356_v63  ;;  %v4359_v25 = vand.u32 2147483647, %v8785_v21  ;;  %v4479_v0 = vadd.f32 1.0, %v4478_v59  ;;  %v4357_v52 = vand.u32 2147483647, %v8798_v50 }
 0x659   : > { %v5813_v43 = vpop.eup %5812  ;;  %v4456_v16 = vsel %vm8741_vm10, %v4453_v57, %v4450_v1  ;;  %v4459_v38 = vmul.f32 0.6931472, %v5811_v60  ;;  %4810 = vrot.lane.b32.xlu1 %v4759_v42, %s5935_s21  ;;  %v4400_v26 = vmul.f32 1.442695, %v4374_v8  ;;  %v4589_v57 = vpack.c.bf16 %v4575_v9, %v8759_v34 }
 0x65a   : > { %v4560_v4 = vmul.f32 0.1, %v4456_v16  ;;  %v5815_v56 = vpop.eup %5814  ;;  %v4396_v18 = vmul.f32 1.442695, %v4372_v45  ;;  %v4375_v3 = vmul.f32 -10.0, %v4359_v25  ;;  %v4373_v41 = vmul.f32 -10.0, %v4357_v52 }
 0x65b   : > { %v4465_v12 = vsel %vm8772_vm2, %v4462_v32, %v4459_v38  ;;  %4804 = vrot.lane.b32.xlu0 %v4756_v22, %s5935_s21  ;;  %5816 = vpow2.f32 %v4400_v26  ;;  %v4588_v31 = vpack.c.bf16 %v4573_v47, %v4572_v55  ;;  %v4757_v46 = vsub.f32 0.0, %v4573_v47  ;;  %v5413_v34 = vpop.f32.mrb[28].mxu1 }
 0x65c   : > { %v8815_v48 = vadd.f32 %v4560_v4, %v4336_v6  ;;  %v4561_v15 = vmul.f32 0.1, %v4465_v12  ;;  %5818 = vpow2.f32 %v4396_v18  ;;  %v4402_v23 = vmul.f32 1.442695, %v4375_v3  ;;  %v4121_v6 = vpop.f32.mrb[29].mxu1 }
 0x65d   : > { %v4468_v54 = vmul.f32 0.6931472, %v5813_v43  ;;  %v4398_v44 = vmul.f32 1.442695, %v4373_v41  ;;  %v4130_v36 = vadd.f32 %v5413_v34, %v8623_v14  ;;  %5423 = vmatprep.mubr.msk.bf16.mxu0 %vm3590_vm12, %v4588_v31  ;;  %4806 = vrot.lane.b32.xlu1 %v4757_v46, %s5935_s21  ;;  %v4477_v10 = vmul.f32 0.6931472, %v5815_v56 }
 0x65e   : > { %v8819_v29 = vadd.f32 %v4561_v15, %v4337_v61  ;;  %v4480_v55 = vmul.f32 %v8720_v51, %v4479_v0  ;;  %5820 = vpow2.f32 %v4402_v23  ;;  %v4122_v17 = vadd.f32 %v8623_v14, %v4121_v6  ;;  %v5414_v61 = vpop.f32.mrb[30].mxu1  ;;  %5424 = vmatmul.mubr.msk.bf16.vlgmr.msra.gmra.mrb[20].mxu0 %vm3590_vm12, %v4589_v57 }
 0x65f   : > { %v4474_v35 = vsel %vm8788_vm9, %v8748_v40, %v4468_v54  ;;  %5822 = vpow2.f32 %v4398_v44  ;;  %v8833_v9 = vadd.f32 %v8705_v27, %v4130_v36  ;;  %v4133_v7 = vadd.f32 %v5414_v61, %v8623_v14  ;;  %v4124_v51 = vpop.f32.mrb[31].mxu1 }
 0x660   : > { %v4590_v2 = vpack.c.bf16 %v8819_v29, %v8815_v48  ;;  %v4562_v20 = vmul.f32 0.1, %v4474_v35  ;;  %v8839_v49 = vadd.f32 %v4287_v11, %v4122_v17  ;;  %v4125_v59 = vadd.f32 %v8623_v14, %v4124_v51 }
 0x661   : > { %v4291_v40 = vrot.slane %v8682_v30, %v9455_v33  ;;  %v4483_v1 = vsel %vm8802_vm0, %v4480_v55, %v4477_v10  ;;  %v4362_v27 = vand.u32 2147483647, %v8833_v9  ;;  %v8849_v32 = vadd.f32 %v8709_v39, %v4133_v7 }
 0x662   : > { %5427 = vmatprep.mubr.msk.bf16.mxu0 %vm3590_vm12, %v4590_v2  ;;  %v4578_v19 = vadd.f32 %v4562_v20, %v4338_v5  ;;  %v4339_v11 = vmax.f32 %v8668_v62, 0.0  ;;  %v4360_v14 = vand.u32 2147483647, %v8839_v49  ;;  %v4563_v33 = vmul.f32 0.1, %v4483_v1 }
 0x663   : > { %v8855_v58 = vadd.f32 %v4291_v40, %v4125_v59  ;;  %v4378_v30 = vmul.f32 -10.0, %v4362_v27  ;;  %v4363_v28 = vand.u32 2147483647, %v8849_v32  ;;  %v4760_v53 = vsub.f32 0.0, %v8815_v48 }
 0x664   : > { %v4762_v60 = vsub.f32 0.0, %v4578_v19  ;;  %v4376_v47 = vmul.f32 -10.0, %v4360_v14  ;;  %v4579_v42 = vadd.f32 %v4563_v33, %v4339_v11  ;;  %v4761_v26 = vsub.f32 0.0, %v8819_v29 }
 0x665   : > { %v4361_v63 = vand.u32 2147483647, %v8855_v58  ;;  %v8859_v39 = vpop.eup %5816  ;;  %v4408_v43 = vmul.f32 1.442695, %v4378_v30  ;;  %v4379_v24 = vmul.f32 -10.0, %v4363_v28  ;;  %v4342_v46 = vmax.f32 %v8766_v37, 0.0 }
 0x666   : > { %4816 = vrot.lane.b32.xlu0 %v4762_v60, %s5935_s21  ;;  %v5819_v62 = vpop.eup %5818  ;;  %v4404_v5 = vmul.f32 1.442695, %v4376_v47  ;;  %v4763_v38 = vsub.f32 0.0, %v4579_v42  ;;  %v4591_v8 = vpack.c.bf16 %v4579_v42, %v4578_v19  ;;  %v4502_v56 = vadd.f32 1.0, %v8859_v39 }
 0x667   : > { %v4377_v16 = vmul.f32 -10.0, %v4361_v63  ;;  %v4484_v22 = vadd.f32 1.0, %v5819_v62  ;;  %5824 = vpow2.f32 %v4408_v43  ;;  %v4410_v45 = vmul.f32 1.442695, %v4379_v24 }
 0x668   : > { %v8863_v4 = vpop.eup %5820  ;;  %5826 = vpow2.f32 %v4404_v5  ;;  %4818 = vrot.lane.b32.xlu1 %v4763_v38, %s5935_s21  ;;  %5428 = vmatmul.mubr.msk.bf16.gmra.mrb[24].mxu0 %vm3590_vm12, %v4591_v8  ;;  %v4487_v52 = vmul.f32 -0.5, %v5819_v62  ;;  %v4505_v48 = vmul.f32 -0.5, %v8859_v39  ;;  %v4490_v15 = vand.u32 2147483647, %v5819_v62 }
 0x669   : > { %v4406_v25 = vmul.f32 1.442695, %v4377_v16  ;;  %v5823_v0 = vpop.eup %5822  ;;  %5828 = vlog2.f32 %v4484_v22  ;;  %v4511_v57 = vadd.f32 1.0, %v8863_v4  ;;  %v4514_v41 = vmul.f32 -0.5, %v8863_v4 }
 0x66a   : > { %4812 = vrot.lane.b32.xlu0 %v4760_v53, %s5935_s21  ;;  %v4493_v12 = vadd.f32 1.0, %v5823_v0  ;;  %5830 = vpow2.f32 %v4410_v45  ;;  %v4496_v18 = vmul.f32 -0.5, %v5823_v0  ;;  %v4488_v3 = vadd.f32 1.0, %v4487_v52 }
 0x66b   : > { %5832 = vpow2.f32 %v4406_v25  ;;  %v4499_v29 = vand.u32 2147483647, %v5823_v0  ;;  %v4506_v23 = vadd.f32 1.0, %v4505_v48  ;;  %v4340_v54 = vmax.f32 %v8779_v13, 0.0 }
 0x66c   : > { %5834 = vlog2.f32 %v4493_v12  ;;  %4814 = vrot.lane.b32.xlu1 %v4761_v26, %s5935_s21  ;;  %v4343_v44 = vmax.f32 %v8785_v21, 0.0  ;;  %v4341_v36 = vmax.f32 %v8798_v50, 0.0  ;;  %vm8883_vm8 = vcmp.lt.f32.partialorder %v4490_v15, 0.0004427343 }
 0x66d   : > { %5836 = vlog2.f32 %v4502_v56  ;;  %v4497_v17 = vadd.f32 1.0, %v4496_v18  ;;  %v4508_v61 = vand.u32 2147483647, %v8859_v39  ;;  %v4489_v13 = vmul.f32 %v5819_v62, %v4488_v3 }
 0x66e   : > { %5838 = vlog2.f32 %v4511_v57  ;;  %v4515_v7 = vadd.f32 1.0, %v4514_v41  ;;  %vm8893_vm15 = vcmp.lt.f32.partialorder %v4499_v29, 0.0004427343  ;;  %v4507_v51 = vmul.f32 %v8859_v39, %v4506_v23 }
 0x66f   : > { %v4517_v19 = vand.u32 2147483647, %v8863_v4  ;;  %v4498_v33 = vmul.f32 %v5823_v0, %v4497_v17  ;;  %vm8904_vm11 = vcmp.lt.f32.partialorder %v4508_v61, 0.0004427343  ;;  %v4347_v30 = vmax.f32 %v8849_v32, 0.0 }
 0x670   : > { %v4516_v42 = vmul.f32 %v8863_v4, %v4515_v7  ;;  %v5269_v32 = vld [vmem:[%s9087_s12] ss:$0 sm:$0xff]  ;;  %vm5045_vm6 = vcmask 31744  }
 0x671   : > { %v8874_v31 = vpop.eup %5824  ;;  %vm4518_vm5 = vcmp.lt.f32.partialorder %v4517_v19, 0.0004427343 }
 0x672   : > { %v8877_v34 = vpop.eup %5826  ;;  %v4538_v6 = vadd.f32 1.0, %v8874_v31  ;;  %v4541_v28 = vmul.f32 -0.5, %v8874_v31  ;;  %v4544_v24 = vand.u32 2147483647, %v8874_v31 }
 0x673   : > { %v5829_v10 = vpop.eup %5828  ;;  %v4520_v37 = vadd.f32 1.0, %v8877_v34  ;;  %v4523_v1 = vmul.f32 -0.5, %v8877_v34  ;;  %v4526_v56 = vand.u32 2147483647, %v8877_v34 }
 0x674   : > { %v8889_v35 = vpop.eup %5830  ;;  %v4486_v2 = vmul.f32 0.6931472, %v5829_v10  ;;  %5840 = vlog2.f32 %v4538_v6  ;;  %v4542_v53 = vadd.f32 1.0, %v4541_v28  ;;  %vm8918_vm14 = vcmp.lt.f32.partialorder %v4544_v24, 0.0004427343 }
 0x675   : > { %v8891_v21 = vpop.eup %5832  ;;  %5842 = vlog2.f32 %v4520_v37  ;;  %v4547_v20 = vadd.f32 1.0, %v8889_v35  ;;  %v4524_v5 = vadd.f32 1.0, %v4523_v1  ;;  %v4550_v0 = vmul.f32 -0.5, %v8889_v35 }
 0x676   : > { %v5835_v59 = vpop.eup %5834  ;;  %v4492_v40 = vsel %vm8883_vm8, %v4489_v13, %v4486_v2  ;;  %v4529_v27 = vadd.f32 1.0, %v8891_v21  ;;  %v4532_v38 = vmul.f32 -0.5, %v8891_v21  ;;  %v4535_v48 = vand.u32 2147483647, %v8891_v21 }
 0x677   : > { %v5837_v11 = vpop.eup %5836  ;;  %v4495_v14 = vmul.f32 0.6931472, %v5835_v59  ;;  %v4564_v47 = vmul.f32 0.1, %v4492_v40  ;;  %v4525_v57 = vmul.f32 %v8877_v34, %v4524_v5  ;;  %v4551_v10 = vadd.f32 1.0, %v4550_v0 }
 0x678   : > { %v5839_v60 = vpop.eup %5838  ;;  %5844 = vlog2.f32 %v4529_v27  ;;  %v4504_v63 = vmul.f32 0.6931472, %v5837_v11  ;;  %v4533_v41 = vadd.f32 1.0, %v4532_v38  ;;  %vm8926_vm3 = vcmp.lt.f32.partialorder %v4526_v56, 0.0004427343 }
 0x679   : > { %v4501_v39 = vsel %vm8893_vm15, %v4498_v33, %v4495_v14  ;;  %v4513_v43 = vmul.f32 0.6931472, %v5839_v60  ;;  %5846 = vlog2.f32 %v4547_v20  ;;  %v4580_v45 = vadd.f32 %v4564_v47, %v4340_v54 }
 0x67a   : > { %v4565_v62 = vmul.f32 0.1, %v4501_v39  ;;  %v4510_v16 = vsel %vm8904_vm11, %v4507_v51, %v4504_v63  ;;  %v4543_v54 = vmul.f32 %v8874_v31, %v4542_v53  ;;  %v4346_v31 = vmax.f32 %v8833_v9, 0.0 }
 0x67b   : > { %v4566_v8 = vmul.f32 0.1, %v4510_v16  ;;  %v4519_v22 = vsel %vm4518_vm5, %v4516_v42, %v4513_v43  ;;  %vm8937_vm13 = vcmp.lt.f32.partialorder %v4535_v48, 0.0004427343  ;;  %v4534_v50 = vmul.f32 %v8891_v21, %v4533_v41 }
 0x67c   : > { %v4581_v4 = vadd.f32 %v4565_v62, %v4341_v36  ;;  %v4567_v25 = vmul.f32 0.1, %v4519_v22  ;;  %v4764_v51 = vsub.f32 0.0, %v4580_v45  ;;  %v4552_v1 = vmul.f32 %v8889_v35, %v4551_v10 }
 0x67d   : > { %v4582_v12 = vadd.f32 %v4566_v8, %v4342_v46  ;;  %v4344_v27 = vmax.f32 %v8839_v49, 0.0  ;;  %v4345_v11 = vmax.f32 %v8855_v58, 0.0 }
 0x67e   : > { %v5841_v52 = vpop.eup %5840  ;;  %v4583_v15 = vadd.f32 %v4567_v25, %v4343_v44  ;;  %v4592_v18 = vpack.c.bf16 %v4581_v4, %v4580_v45  ;;  %v4553_v44 = vand.u32 2147483647, %v8889_v35  ;;  %v4765_v20 = vsub.f32 0.0, %v4581_v4 }
 0x67f   : > { %v5843_v3 = vpop.eup %5842  ;;  %v4766_v29 = vsub.f32 0.0, %v4582_v12  ;;  %v4540_v23 = vmul.f32 0.6931472, %v5841_v52 }
 0x680   : > { %v4522_v36 = vmul.f32 0.6931472, %v5843_v3  ;;  %v4767_v6 = vsub.f32 0.0, %v4583_v15  ;;  %5431 = vmatprep.mubr.msk.bf16.mxu0 %vm3590_vm12, %v4592_v18  ;;  %v4593_v46 = vpack.c.bf16 %v4583_v15, %v4582_v12  ;;  %vm4554_vm4 = vcmp.lt.f32.partialorder %v4553_v44, 0.0004427343 }
 0x681   : > { %4824 = vrot.lane.b32.xlu0 %v4766_v29, %s5935_s21  ;;  %v4546_v34 = vsel %vm8918_vm14, %v4543_v54, %v4540_v23 }
 0x682   : > { %v5845_v17 = vpop.eup %5844  ;;  %v4528_v37 = vsel %vm8926_vm3, %v4525_v57, %v4522_v36  ;;  %4826 = vrot.lane.b32.xlu1 %v4767_v6, %s5935_s21  ;;  %5432 = vmatmul.mubr.msk.bf16.gmra.mrb[28].mxu0 %vm3590_vm12, %v4593_v46  ;;  %v4570_v2 = vmul.f32 0.1, %v4546_v34 }
 0x683   : > { %v5847_v13 = vpop.eup %5846  ;;  %v4531_v7 = vmul.f32 0.6931472, %v5845_v17  ;;  %v4568_v59 = vmul.f32 0.1, %v4528_v37 }
 0x684   : > { %v4586_v9 = vadd.f32 %v4570_v2, %v4346_v31  ;;  %v4549_v40 = vmul.f32 0.6931472, %v5847_v13 }
 0x685   : > { %v4537_v19 = vsel %vm8937_vm13, %v4534_v50, %v4531_v7  ;;  %4820 = vrot.lane.b32.xlu0 %v4764_v51, %s5935_s21  ;;  %v4584_v60 = vadd.f32 %v4568_v59, %v4344_v27 }
 0x686   : > { %v4569_v14 = vmul.f32 0.1, %v4537_v19  ;;  %4822 = vrot.lane.b32.xlu1 %v4765_v20, %s5935_s21  ;;  %v4770_v21 = vsub.f32 0.0, %v4586_v9  ;;  %v4555_v33 = vsel %vm4554_vm4, %v4552_v1, %v4549_v40 }
 0x687   : > { %v4571_v28 = vmul.f32 0.1, %v4555_v33  ;;  %v4768_v39 = vsub.f32 0.0, %v4584_v60 }
 0x688   : > { %v4585_v35 = vadd.f32 %v4569_v14, %v4345_v11 }
 0x689   : > { %4832 = vrot.lane.b32.xlu0 %v4770_v21, %s5935_s21  ;;  %v4587_v49 = vadd.f32 %v4571_v28, %v4347_v30 }
 0x68a   : > { %v4594_v47 = vpack.c.bf16 %v4585_v35, %v4584_v60  ;;  %v4769_v58 = vsub.f32 0.0, %v4585_v35 }
 0x68b   : > { %v4595_v63 = vpack.c.bf16 %v4587_v49, %v4586_v9  ;;  %v4771_v42 = vsub.f32 0.0, %v4587_v49 }
 0x68c   : > { %5435 = vmatprep.mubr.msk.bf16.mxu1 %vm3590_vm12, %v4594_v47 }
 0x68d   : > { %4834 = vrot.lane.b32.xlu1 %v4771_v42, %s5935_s21  ;;  %5436 = vmatmul.mubr.msk.bf16.vlgmr.msra.gmra.mrb[32].mxu1 %vm3590_vm12, %v4595_v63  ;;  %vm4916_vm12 = vcmask 7168  }
 0x68e   : > { %4828 = vrot.lane.b32.xlu0 %v4768_v39, %s5935_s21 }
 0x691   : > { %4830 = vrot.lane.b32.xlu1 %v4769_v58, %s5935_s21 }
 0x6c9   : > { %v4809_v19 = vpop.permute.xlu0 %4808 }
 0x6cb   : > { %v4811_v11 = vpop.permute.xlu1 %4810 }
 0x6cd   : > { %v4805_v14 = vpop.permute.xlu0 %4804 }
 0x6cf   : > { %v4807_v21 = vpop.permute.xlu1 %4806 }
 0x6d8   : > { %v4817_v33 = vpop.permute.xlu0 %4816 }
 0x6da   : > { %v4819_v30 = vpop.permute.xlu1 %4818 }
 0x6dc   : > { %v4813_v28 = vpop.permute.xlu0 %4812 }
 0x6de   : > { %v4815_v60 = vpop.permute.xlu1 %4814 }
 0x6f3   : > { %v8977_v35 = vpop.permute.xlu0 %4824 }
 0x6f4   : > { %v8979_v49 = vpop.permute.xlu1 %4826 }
 0x6f7   : > { %v8981_v47 = vpop.permute.xlu0 %4820 }
 0x6f8   : > { %v8983_v63 = vpop.permute.xlu1 %4822 }
 0x6fb   : > { %v8985_v42 = vpop.permute.xlu0 %4832 }
 0x6ff   : > { %v8987_v39 = vpop.permute.xlu1 %4834 }
 0x700   : > { %v8989_v58 = vpop.permute.xlu0 %4828 }
 0x731   : > { %v5425_v43 = vpop.f32.mrb[20].mxu0 }
 0x732   : > { %v4702_v24 = vadd.f32 %v5425_v43, %v5269_v32  ;;  %v4693_v62 = vpop.f32.mrb[21].mxu0 }
 0x733   : > { %v5426_v5 = vpop.f32.mrb[22].mxu0  ;;  %v4694_v38 = vadd.f32 %v5269_v32, %v4693_v62 }
 0x734   : > { %v4774_v16 = vsub.f32 0.0, %v4702_v24  ;;  %v4705_v8 = vadd.f32 %v5426_v5, %v5269_v32  ;;  %v4696_v22 = vpop.f32.mrb[23].mxu0 }
 0x735   : > { %v4697_v45 = vadd.f32 %v5269_v32, %v4696_v22  ;;  %v4772_v4 = vsub.f32 0.0, %v4694_v38 }
 0x736   : > { %v4775_v53 = vsub.f32 0.0, %v4705_v8  ;;  %4872 = vrot.lane.b32.xlu0 %v4774_v16, %s5936_s24 }
 0x737   : > { %v4773_v25 = vsub.f32 0.0, %v4697_v45 }
 0x738   : > { %4874 = vrot.lane.b32.xlu1 %v4775_v53, %s5936_s24 }
 0x73a   : > { %4868 = vrot.lane.b32.xlu0 %v4772_v4, %s5936_s24 }
 0x73b   : > { %v5429_v0 = vpop.f32.mrb[24].mxu0 }
 0x73c   : > { %v4718_v56 = vadd.f32 %v5429_v0, %v5269_v32  ;;  %v4709_v12 = vpop.f32.mrb[25].mxu0  ;;  %4870 = vrot.lane.b32.xlu1 %v4773_v25, %s5936_s24 }
 0x73d   : > { %v5430_v26 = vpop.f32.mrb[26].mxu0  ;;  %v4710_v57 = vadd.f32 %v5269_v32, %v4709_v12 }
 0x73e   : > { %v4778_v52 = vsub.f32 0.0, %v4718_v56  ;;  %v4721_v48 = vadd.f32 %v5430_v26, %v5269_v32  ;;  %v4712_v15 = vpop.f32.mrb[27].mxu0 }
 0x73f   : > { %v4713_v3 = vadd.f32 %v5269_v32, %v4712_v15  ;;  %v4776_v41 = vsub.f32 0.0, %v4710_v57 }
 0x740   : > { %v4779_v18 = vsub.f32 0.0, %v4721_v48  ;;  %4880 = vrot.lane.b32.xlu0 %v4778_v52, %s5936_s24 }
 0x741   : > { %v4777_v29 = vsub.f32 0.0, %v4713_v3 }
 0x742   : > { %4882 = vrot.lane.b32.xlu1 %v4779_v18, %s5936_s24 }
 0x744   : > { %4876 = vrot.lane.b32.xlu0 %v4776_v41, %s5936_s24 }
 0x746   : > { %4878 = vrot.lane.b32.xlu1 %v4777_v29, %s5936_s24 }
 0x755   : > { %v5433_v23 = vpop.f32.mrb[28].mxu0 }
 0x756   : > { %v4734_v54 = vadd.f32 %v5433_v23, %v5269_v32  ;;  %v4725_v36 = vpop.f32.mrb[29].mxu0 }
 0x757   : > { %v5434_v6 = vpop.f32.mrb[30].mxu0  ;;  %v4726_v10 = vadd.f32 %v5269_v32, %v4725_v36 }
 0x758   : > { %v4782_v46 = vsub.f32 0.0, %v4734_v54  ;;  %v4737_v55 = vadd.f32 %v5434_v6, %v5269_v32  ;;  %v4728_v34 = vpop.f32.mrb[31].mxu0 }
 0x759   : > { %v4729_v17 = vadd.f32 %v5269_v32, %v4728_v34  ;;  %v4780_v31 = vsub.f32 0.0, %v4726_v10 }
 0x75a   : > { %v4783_v44 = vsub.f32 0.0, %v4737_v55  ;;  %4888 = vrot.lane.b32.xlu0 %v4782_v46, %s5936_s24 }
 0x75b   : > { %v4781_v37 = vsub.f32 0.0, %v4729_v17 }
 0x75c   : > { %4890 = vrot.lane.b32.xlu1 %v4783_v44, %s5936_s24 }
 0x75e   : > { %4884 = vrot.lane.b32.xlu0 %v4780_v31, %s5936_s24 }
 0x760   : > { %v5437_v61 = vpop.f32.mrb[32].mxu1  ;;  %4886 = vrot.lane.b32.xlu1 %v4781_v37, %s5936_s24 }
 0x761   : > { %v4741_v2 = vpop.f32.mrb[33].mxu1  ;;  %v4750_v51 = vadd.f32 %v5437_v61, %v5269_v32 }
 0x762   : > { %v4742_v13 = vadd.f32 %v5269_v32, %v4741_v2  ;;  %v5438_v7 = vpop.f32.mrb[34].mxu1 }
 0x763   : > { %v4744_v50 = vpop.f32.mrb[35].mxu1  ;;  %v4753_v9 = vadd.f32 %v5438_v7, %v5269_v32  ;;  %v4786_v1 = vsub.f32 0.0, %v4750_v51 }
 0x764   : > { %v4784_v20 = vsub.f32 0.0, %v4742_v13  ;;  %v4745_v59 = vadd.f32 %v5269_v32, %v4744_v50  ;;  %v8991_v32 = vpop.permute.xlu1 %4830 }
 0x765   : > { %v4787_v27 = vsub.f32 0.0, %v4753_v9 }
 0x766   : > { %v4785_v40 = vsub.f32 0.0, %v4745_v59  ;;  %4892 = vrot.lane.b32.xlu0 %v4784_v20, %s5936_s24 }
 0x768   : > { %4894 = vrot.lane.b32.xlu1 %v4785_v40, %s5936_s24 }
 0x76a   : > { %4896 = vrot.lane.b32.xlu0 %v4786_v1, %s5936_s24 }
 0x76c   : > { %4898 = vrot.lane.b32.xlu1 %v4787_v27, %s5936_s24 }
 0x7a8   : > { %v4873_v43 = vpop.permute.xlu0 %4872 }
 0x7a9   : > { %v4919_v24 = vsel %vm4916_vm12, %v4809_v19, %v4873_v43 }
 0x7aa   : > { %v4935_v62 = vmin.f32 %v4919_v24, 60.0  ;;  %v4875_v5 = vpop.permute.xlu1 %4874 }
 0x7ab   : > { %v4920_v16 = vsel %vm4916_vm12, %v4811_v11, %v4875_v5 }
 0x7ac   : > { %v4953_v38 = vmul.f32 1.442695, %v4935_v62  ;;  %v4936_v8 = vmin.f32 %v4920_v16, 60.0  ;;  %v4869_v22 = vpop.permute.xlu0 %4868 }
 0x7ad   : > { %v4917_v53 = vsel %vm4916_vm12, %v4805_v14, %v4869_v22 }
 0x7ae   : > { %5848 = vpow2.f32 %v4953_v38  ;;  %v4955_v45 = vmul.f32 1.442695, %v4936_v8  ;;  %v4933_v4 = vmin.f32 %v4917_v53, 60.0  ;;  %v4871_v25 = vpop.permute.xlu1 %4870 }
 0x7af   : > { %v4918_v0 = vsel %vm4916_vm12, %v4807_v21, %v4871_v25 }
 0x7b0   : > { %5850 = vpow2.f32 %v4955_v45  ;;  %v4949_v56 = vmul.f32 1.442695, %v4933_v4  ;;  %v4934_v12 = vmin.f32 %v4918_v0, 60.0 }
 0x7b2   : > { %5852 = vpow2.f32 %v4949_v56  ;;  %v4951_v26 = vmul.f32 1.442695, %v4934_v12  ;;  %v4881_v52 = vpop.permute.xlu0 %4880 }
 0x7b3   : > { %v4923_v57 = vsel %vm4916_vm12, %v4817_v33, %v4881_v52 }
 0x7b4   : > { %5854 = vpow2.f32 %v4951_v26  ;;  %v4939_v48 = vmin.f32 %v4923_v57, 60.0  ;;  %v4883_v15 = vpop.permute.xlu1 %4882 }
 0x7b5   : > { %v4924_v18 = vsel %vm4916_vm12, %v4819_v30, %v4883_v15 }
 0x7b6   : > { %v4961_v3 = vmul.f32 1.442695, %v4939_v48  ;;  %v4940_v41 = vmin.f32 %v4924_v18, 60.0  ;;  %v4877_v29 = vpop.permute.xlu0 %4876 }
 0x7b7   : > { %v4921_v23 = vsel %vm4916_vm12, %v4813_v28, %v4877_v29 }
 0x7b8   : > { %v5849_v54 = vpop.eup %5848  ;;  %5856 = vpow2.f32 %v4961_v3  ;;  %v4963_v36 = vmul.f32 1.442695, %v4940_v41  ;;  %v4937_v6 = vmin.f32 %v4921_v23, 60.0  ;;  %v4879_v46 = vpop.permute.xlu1 %4878 }
 0x7b9   : > { %v4999_v10 = vadd.f32 1.0, %v5849_v54  ;;  %v4922_v55 = vsel %vm4916_vm12, %v4815_v60, %v4879_v46  ;;  %v4983_v59 = vsub.f32 1.0, %v5849_v54 }
 0x7ba   : > { %v5851_v34 = vpop.eup %5850  ;;  %5858 = vpow2.f32 %v4963_v36  ;;  %v4957_v44 = vmul.f32 1.442695, %v4937_v6  ;;  %v4938_v17 = vmin.f32 %v4922_v55, 60.0 }
 0x7bb   : > { %5860 = vrcp.f32 %v4999_v10  ;;  %v5000_v31 = vadd.f32 1.0, %v5851_v34  ;;  %v4984_v19 = vsub.f32 1.0, %v5851_v34 }
 0x7bc   : > { %v5853_v37 = vpop.eup %5852  ;;  %5862 = vpow2.f32 %v4957_v44  ;;  %v4959_v61 = vmul.f32 1.442695, %v4938_v17 }
 0x7bd   : > { %5864 = vrcp.f32 %v5000_v31  ;;  %v4997_v2 = vadd.f32 1.0, %v5853_v37  ;;  %v4981_v30 = vsub.f32 1.0, %v5853_v37 }
 0x7be   : > { %v5855_v13 = vpop.eup %5854  ;;  %5866 = vpow2.f32 %v4959_v61 }
 0x7bf   : > { %5868 = vrcp.f32 %v4997_v2  ;;  %v4998_v7 = vadd.f32 1.0, %v5855_v13  ;;  %v4982_v24 = vsub.f32 1.0, %v5855_v13 }
 0x7c1   : > { %5870 = vrcp.f32 %v4998_v7 }
 0x7c2   : > { %v5857_v50 = vpop.eup %5856 }
 0x7c3   : > { %v5003_v51 = vadd.f32 1.0, %v5857_v50  ;;  %v4987_v8 = vsub.f32 1.0, %v5857_v50 }
 0x7c4   : > { %v5859_v20 = vpop.eup %5858 }
 0x7c5   : > { %v5861_v9 = vpop.eup %5860  ;;  %5872 = vrcp.f32 %v5003_v51  ;;  %v5004_v40 = vadd.f32 1.0, %v5859_v20  ;;  %v4988_v0 = vsub.f32 1.0, %v5859_v20 }
 0x7c6   : > { %v5863_v1 = vpop.eup %5862  ;;  %v5031_v27 = vsel %vm4916_vm12, %v4983_v59, %v5861_v9 }
 0x7c7   : > { %v5865_v11 = vpop.eup %5864  ;;  %5048 = vst.msk [vmem:[%s9006_s30 + $0x10] sm:$0xff] %vm5045_vm6, %v5031_v27  ;;  %5874 = vrcp.f32 %v5004_v40  ;;  %v5001_v14 = vadd.f32 1.0, %v5863_v1  ;;  %v4985_v57 = vsub.f32 1.0, %v5863_v1 }
 0x7c8   : > { %v5867_v21 = vpop.eup %5866  ;;  %v5032_v33 = vsel %vm4916_vm12, %v4984_v19, %v5865_v11 }
 0x7c9   : > { %v5869_v28 = vpop.eup %5868  ;;  %5049 = vst.msk [vmem:[%s9006_s30 + $0x18] sm:$0xff] %vm5045_vm6, %v5032_v33  ;;  %5876 = vrcp.f32 %v5001_v14  ;;  %v5002_v60 = vadd.f32 1.0, %v5867_v21  ;;  %v4986_v41 = vsub.f32 1.0, %v5867_v21 }
 0x7ca   : > { %v5029_v43 = vsel %vm4916_vm12, %v4981_v30, %v5869_v28 }
 0x7cb   : > { %v5871_v62 = vpop.eup %5870  ;;  %5046 = vst.msk [vmem:[%s9006_s30] sm:$0xff] %vm5045_vm6, %v5029_v43  ;;  %5878 = vrcp.f32 %v5002_v60 }
 0x7cc   : > { %v5030_v5 = vsel %vm4916_vm12, %v4982_v24, %v5871_v62  ;;  %v4889_v16 = vpop.permute.xlu0 %4888 }
 0x7cd   : > { %5047 = vst.msk [vmem:[%s9006_s30 + $0x8] sm:$0xff] %vm5045_vm6, %v5030_v5  ;;  %v4927_v38 = vsel %vm4916_vm12, %v8977_v35, %v4889_v16 }
 0x7ce   : > { %v4943_v22 = vmin.f32 %v4927_v38, 60.0  ;;  %v4891_v53 = vpop.permute.xlu1 %4890 }
 0x7cf   : > { %v5873_v45 = vpop.eup %5872  ;;  %v4928_v4 = vsel %vm4916_vm12, %v8979_v49, %v4891_v53 }
 0x7d0   : > { %v5035_v25 = vsel %vm4916_vm12, %v4987_v8, %v5873_v45  ;;  %v4969_v56 = vmul.f32 1.442695, %v4943_v22  ;;  %v4944_v12 = vmin.f32 %v4928_v4, 60.0  ;;  %v4885_v26 = vpop.permute.xlu0 %4884 }
 0x7d1   : > { %v5875_v52 = vpop.eup %5874  ;;  %5052 = vst.msk [vmem:[%s9006_s30 + $0x30] sm:$0xff] %vm5045_vm6, %v5035_v25  ;;  %v4925_v35 = vsel %vm4916_vm12, %v8981_v47, %v4885_v26 }
 0x7d2   : > { %v5036_v48 = vsel %vm4916_vm12, %v4988_v0, %v5875_v52  ;;  %5880 = vpow2.f32 %v4969_v56  ;;  %v4971_v15 = vmul.f32 1.442695, %v4944_v12  ;;  %v4941_v49 = vmin.f32 %v4925_v35, 60.0  ;;  %v4887_v18 = vpop.permute.xlu1 %4886 }
 0x7d3   : > { %v5877_v3 = vpop.eup %5876  ;;  %5053 = vst.msk [vmem:[%s9006_s30 + $0x38] sm:$0xff] %vm5045_vm6, %v5036_v48  ;;  %v4926_v29 = vsel %vm4916_vm12, %v8983_v63, %v4887_v18 }
 0x7d4   : > { %v5033_v23 = vsel %vm4916_vm12, %v4985_v57, %v5877_v3  ;;  %5882 = vpow2.f32 %v4971_v15  ;;  %v4965_v54 = vmul.f32 1.442695, %v4941_v49  ;;  %v4942_v36 = vmin.f32 %v4926_v29, 60.0 }
 0x7d5   : > { %v5879_v47 = vpop.eup %5878  ;;  %5050 = vst.msk [vmem:[%s9006_s30 + $0x20] sm:$0xff] %vm5045_vm6, %v5033_v23 }
 0x7d6   : > { %v5034_v6 = vsel %vm4916_vm12, %v4986_v41, %v5879_v47  ;;  %5884 = vpow2.f32 %v4965_v54  ;;  %v4967_v46 = vmul.f32 1.442695, %v4942_v36 }
 0x7d7   : > { %5051 = vst.msk [vmem:[%s9006_s30 + $0x28] sm:$0xff] %vm5045_vm6, %v5034_v6 }
 0x7d8   : > { %5886 = vpow2.f32 %v4967_v46  ;;  %v4893_v10 = vpop.permute.xlu0 %4892 }
 0x7d9   : > { %v4929_v55 = vsel %vm4916_vm12, %v8989_v58, %v4893_v10 }
 0x7da   : > { %v4945_v63 = vmin.f32 %v4929_v55, 60.0  ;;  %v4895_v34 = vpop.permute.xlu1 %4894 }
 0x7db   : > { %v4930_v44 = vsel %vm4916_vm12, %v8991_v32, %v4895_v34 }
 0x7dc   : > { %v5881_v17 = vpop.eup %5880  ;;  %v4973_v31 = vmul.f32 1.442695, %v4945_v63  ;;  %v4946_v37 = vmin.f32 %v4930_v44, 60.0  ;;  %v4897_v61 = vpop.permute.xlu0 %4896 }
 0x7dd   : > { %v5007_v2 = vadd.f32 1.0, %v5881_v17  ;;  %v4931_v13 = vsel %vm4916_vm12, %v8985_v42, %v4897_v61  ;;  %v4991_v14 = vsub.f32 1.0, %v5881_v17 }
 0x7de   : > { %v5883_v7 = vpop.eup %5882  ;;  %5888 = vpow2.f32 %v4973_v31  ;;  %v4975_v50 = vmul.f32 1.442695, %v4946_v37  ;;  %v4947_v51 = vmin.f32 %v4931_v13, 60.0  ;;  %v4899_v20 = vpop.permute.xlu1 %4898 }
 0x7df   : > { %5890 = vrcp.f32 %v5007_v2  ;;  %v5008_v58 = vadd.f32 1.0, %v5883_v7  ;;  %v4932_v59 = vsel %vm4916_vm12, %v8987_v39, %v4899_v20  ;;  %v4992_v28 = vsub.f32 1.0, %v5883_v7 }
 0x7e0   : > { %v5885_v9 = vpop.eup %5884  ;;  %5892 = vpow2.f32 %v4975_v50  ;;  %v4977_v32 = vmul.f32 1.442695, %v4947_v51  ;;  %v4948_v40 = vmin.f32 %v4932_v59, 60.0 }
 0x7e1   : > { %5894 = vrcp.f32 %v5008_v58  ;;  %v5005_v1 = vadd.f32 1.0, %v5885_v9  ;;  %v4989_v5 = vsub.f32 1.0, %v5885_v9 }
 0x7e2   : > { %v5887_v27 = vpop.eup %5886  ;;  %5896 = vpow2.f32 %v4977_v32  ;;  %v4979_v42 = vmul.f32 1.442695, %v4948_v40 }
 0x7e3   : > { %5898 = vrcp.f32 %v5005_v1  ;;  %v5006_v19 = vadd.f32 1.0, %v5887_v27  ;;  %v4990_v53 = vsub.f32 1.0, %v5887_v27 }
 0x7e4   : > { %5900 = vpow2.f32 %v4979_v42 }
 0x7e5   : > { %5902 = vrcp.f32 %v5006_v19 }
 0x7e8   : > { %v5889_v11 = vpop.eup %5888 }
 0x7e9   : > { %v5891_v21 = vpop.eup %5890  ;;  %v5009_v33 = vadd.f32 1.0, %v5889_v11  ;;  %v4993_v0 = vsub.f32 1.0, %v5889_v11 }
 0x7ea   : > { %v5893_v39 = vpop.eup %5892  ;;  %v5039_v30 = vsel %vm4916_vm12, %v4991_v14, %v5891_v21 }
 0x7eb   : > { %v5895_v60 = vpop.eup %5894  ;;  %5056 = vst.msk [vmem:[%s9006_s30 + $0x50] sm:$0xff] %vm5045_vm6, %v5039_v30  ;;  %5904 = vrcp.f32 %v5009_v33  ;;  %v5010_v43 = vadd.f32 1.0, %v5893_v39  ;;  %v4994_v26 = vsub.f32 1.0, %v5893_v39 }
 0x7ec   : > { %v5897_v24 = vpop.eup %5896  ;;  %v5040_v62 = vsel %vm4916_vm12, %v4992_v28, %v5895_v60 }
 0x7ed   : > { %v5899_v16 = vpop.eup %5898  ;;  %5057 = vst.msk [vmem:[%s9006_s30 + $0x58] sm:$0xff] %vm5045_vm6, %v5040_v62  ;;  %5906 = vrcp.f32 %v5010_v43  ;;  %v5011_v38 = vadd.f32 1.0, %v5897_v24  ;;  %v4995_v35 = vsub.f32 1.0, %v5897_v24 }
 0x7ee   : > { %v5901_v8 = vpop.eup %5900  ;;  %v5037_v22 = vsel %vm4916_vm12, %v4989_v5, %v5899_v16 }
 0x7ef   : > { %v5903_v45 = vpop.eup %5902  ;;  %5054 = vst.msk [vmem:[%s9006_s30 + $0x40] sm:$0xff] %vm5045_vm6, %v5037_v22  ;;  %5908 = vrcp.f32 %v5011_v38  ;;  %v5012_v4 = vadd.f32 1.0, %v5901_v8  ;;  %v4996_v49 = vsub.f32 1.0, %v5901_v8 }
 0x7f0   : > { %v5038_v25 = vsel %vm4916_vm12, %v4990_v53, %v5903_v45 }
 0x7f1   : > { %5055 = vst.msk [vmem:[%s9006_s30 + $0x48] sm:$0xff] %vm5045_vm6, %v5038_v25  ;;  %5910 = vrcp.f32 %v5012_v4 }
 0x7f5   : > { %v5905_v56 = vpop.eup %5904 }
 0x7f6   : > { %v5041_v12 = vsel %vm4916_vm12, %v4993_v0, %v5905_v56 }
 0x7f7   : > { %v5907_v52 = vpop.eup %5906  ;;  %5058 = vst.msk [vmem:[%s9006_s30 + $0x60] sm:$0xff] %vm5045_vm6, %v5041_v12 }
 0x7f8   : > { %v5042_v57 = vsel %vm4916_vm12, %v4994_v26, %v5907_v52 }
 0x7f9   : > { %v5909_v48 = vpop.eup %5908  ;;  %5059 = vst.msk [vmem:[%s9006_s30 + $0x68] sm:$0xff] %vm5045_vm6, %v5042_v57 }
 0x7fa   : > { %v5043_v15 = vsel %vm4916_vm12, %v4995_v35, %v5909_v48 }
 0x7fb   : > { %v5911_v18 = vpop.eup %5910  ;;  %5060 = vst.msk [vmem:[%s9006_s30 + $0x70] sm:$0xff] %vm5045_vm6, %v5043_v15 }
 0x7fc   : > { %v5044_v3 = vsel %vm4916_vm12, %v4996_v49, %v5911_v18 }
 0x7fd   : > { %5061 = vst.msk [vmem:[%s9006_s30 + $0x78] sm:$0xff] %vm5045_vm6, %v5044_v3 }
 0x7fe PF: > { %s23_s25 = sadd.s32 1, %s5920_s25  }
 0x7ff   : > { %p20_p5 = scmp.ge.s32.totalorder %s23_s25, 4  }
 0x801   :  { %22 = sbr.rel (!%p20_p5) target bundleno = 1 (0x1), region = 108 }

</bundles_post_ra>
